<compile_context>
chip_gen: v7x
topology: tpu7x:2x2x1
jax: 0.10.0
libtpu: 0.0.40
codegen_flags: <defaults>
</compile_context>

<pallas_src>
import functools
import math

import numpy as np
import jax
import jax.numpy as jnp
from jax.experimental import pallas as pl
from jax.experimental.pallas import tpu as pltpu

BN_EPS = 1e-4                     # nn.BatchNorm2d(eps=0.0001)
_ROW_TILE_TARGET = 512            # target rows per streaming tile
_LANE = 128


def _round_up(v, m):
    return (v + m - 1) // m * m


def _cdiv(a, b):
    return -(-a // b)


def _row_tiling(M, Wrow):
    """Balanced row tiling.  Tiles are multiples of L = lcm(W+2, 8) so every
    tile starts on an image-row boundary (keeps the dx stencil inside the
    tile) and respects the (8, 128) sublane rule.  Keep >= 2 tiles whenever
    possible so v7x's two TensorCores both get work from the parallel axis."""
    L = math.lcm(Wrow, 8)
    blocks_total = _cdiv(M, L)
    n_tiles = max(_cdiv(blocks_total, max(1, _ROW_TILE_TARGET // L)),
                  2 if blocks_total >= 2 else 1)
    tile_m = L * _cdiv(blocks_total, n_tiles)
    n_tiles = _cdiv(M, tile_m)
    return tile_m, n_tiles


def _compiler_params(tile_m, K, Coutp, out_tile_bytes):
    """Parallel grid axis + a VMEM limit sized from the real per-call footprint
    (double-buffered tiles + f32 temporaries) with 2x headroom, floored at
    8 MiB and capped at v7x's 64 MiB/TC."""
    x_tile = tile_m * max(K, _LANE) * 2        # bf16 input tile (lane-padded)
    w_res = 3 * max(K, _LANE) * Coutp * 2      # resident bf16 weights
    o_tile = max(out_tile_bytes, tile_m * _LANE * 4)  # lane-padded in VMEM
    interm = 8 * tile_m * Coutp * 4            # f32 matmul/roll/epilogue temps
    need = 2 * (x_tile + w_res + o_tile) + interm
    limit = int(min(max(2 * need, 8 << 20), 64 << 20))
    return pltpu.CompilerParams(dimension_semantics=("parallel",),
                                vmem_limit_bytes=limit)


# --------------------------------------------------------------------------
# Pass A: 3x3-conv-as-matmul (never spilled) + streaming BN partial statistics
# --------------------------------------------------------------------------
def _conv_stats_kernel(x_ref, w_ref, stats_ref, *, tile_m, wrow, w_valid,
                       m_total):
    """x_ref    : (tile_m, 3*Cin)   bf16  dy-expanded rows of the padded image
       w_ref    : (3, 3*Cin, Coutp) bf16  one (K, Coutp) matrix per dx tap
       stats_ref: (8, Coutp) f32    row 0 = sum(valid), row 1 = sum(valid^2)"""
    x = x_ref[...]
    # Three MXU matmuls (bf16 operands, f32 accumulation) combined by the
    # static dx stencil via XLU rolls: out[m] = z0[m] + z1[m+1] + z2[m+2].
    # The roll wrap only ever lands on pad-column / pad-tail rows.
    y = jnp.dot(x, w_ref[0], preferred_element_type=jnp.float32)
    y = y + pltpu.roll(jnp.dot(x, w_ref[1], preferred_element_type=jnp.float32),
                       tile_m - 1, 0)
    y = y + pltpu.roll(jnp.dot(x, w_ref[2], preferred_element_type=jnp.float32),
                       tile_m - 2, 0)
    coutp = y.shape[-1]
    # In-kernel validity mask: keep w' < W columns and rows < M (no HBM mask).
    row = (pl.program_id(0) * tile_m
           + jax.lax.broadcasted_iota(jnp.int32, (tile_m, coutp), 0))
    mask = jnp.logical_and(row % wrow < w_valid, row < m_total)
    ym = y * mask.astype(jnp.float32)
    # Single aligned (8, Coutp) store of the per-tile partial statistics.
    stats_ref[...] = jnp.concatenate(
        [jnp.sum(ym, axis=0, keepdims=True),
         jnp.sum(ym * y, axis=0, keepdims=True),
         jnp.zeros((6, coutp), jnp.float32)], axis=0)


# --------------------------------------------------------------------------
# Pass B: recomputed conv + folded BatchNorm affine + activation
# --------------------------------------------------------------------------
def _conv_bn_act_kernel(x_ref, w_ref, scale_ref, shift_ref, o_ref, *,
                        tile_m, activation):
    x = x_ref[...]
    y = jnp.dot(x, w_ref[0], preferred_element_type=jnp.float32)
    y = y + pltpu.roll(jnp.dot(x, w_ref[1], preferred_element_type=jnp.float32),
                       tile_m - 1, 0)
    y = y + pltpu.roll(jnp.dot(x, w_ref[2], preferred_element_type=jnp.float32),
                       tile_m - 2, 0)
    y = y * scale_ref[...] + shift_ref[...]          # folded BN (f32 epilogue)
    if activation == "leaky":
        y = jnp.where(y >= 0.0, y, 0.1 * y)
    elif activation == "sigmoid":
        y = jax.nn.sigmoid(y)
    # Store only the real output channels (no 128x write amplification).
    o_ref[...] = y[:, :o_ref.shape[-1]].astype(o_ref.dtype)


# --------------------------------------------------------------------------
# ConvLayer wrapper: 3x3 / stride 1 / pad 1 conv + BN(batch stats) + activation
# --------------------------------------------------------------------------
def conv_bn_act(x, w, gamma, beta, activation):
    """x: (N, H, W, Cin).  w: (3, 3, Cin, Cout) f32.  Returns (N, H, W, Cout) f32."""
    N, H, W, Cin = x.shape
    Cout = w.shape[-1]
    Coutp = _round_up(Cout, _LANE)          # lane-dense MXU output width
    Wrow = W + 2                            # padded row width
    K = 3 * Cin
    M = N * H * Wrow

    # Plain-JAX glue: spatial zero-pad + 3x dy-expansion (NOT 9x im2col).
    xp = jnp.pad(x, ((0, 0), (1, 1), (1, 1), (0, 0))).astype(jnp.bfloat16)
    xr = jnp.concatenate([xp[:, dy:dy + H] for dy in range(3)], axis=-1)
    X = xr.reshape(M, K)

    tile_m, n_tiles = _row_tiling(M, Wrow)
    Mp = n_tiles * tile_m
    if Mp > M:
        X = jnp.pad(X, ((0, Mp - M), (0, 0)))

    # Weights: fold dy into K (matching the dy-expansion), pad Cout to 128 lanes.
    wp = jnp.zeros((3, 3, Cin, Coutp), jnp.float32).at[..., :Cout].set(w)
    wk = jnp.transpose(wp, (1, 0, 2, 3)).reshape(3, K, Coutp).astype(jnp.bfloat16)

    # Pass A: conv + streaming BN partial stats (no raw spill to HBM).
    stats = pl.pallas_call(
        functools.partial(_conv_stats_kernel, tile_m=tile_m, wrow=Wrow,
                          w_valid=W, m_total=M),
        grid=(n_tiles,),
        in_specs=[
            pl.BlockSpec((tile_m, K), lambda i: (i, 0)),
            pl.BlockSpec((3, K, Coutp), lambda i: (0, 0, 0)),   # resident weights
        ],
        out_specs=pl.BlockSpec((8, Coutp), lambda i: (i, 0)),
        out_shape=jax.ShapeDtypeStruct((n_tiles * 8, Coutp), jnp.float32),
        compiler_params=_compiler_params(tile_m, K, Coutp, 8 * Coutp * 4),
    )(X, wk)

    # Tiny XLA reduction of the per-tile partials; fold BN + affine into one
    # scale/shift pair (conv bias cancels exactly under batch-stat BN).
    tot = jnp.sum(stats.reshape(n_tiles, 8, Coutp), axis=0)
    inv_cnt = 1.0 / float(N * H * W)
    mean = tot[0] * inv_cnt
    var = jnp.maximum(tot[1] * inv_cnt - mean * mean, 0.0)   # biased, clamped
    gp = jnp.zeros((Coutp,), jnp.float32).at[:Cout].set(gamma)
    bp = jnp.zeros((Coutp,), jnp.float32).at[:Cout].set(beta)
    scale = gp * jax.lax.rsqrt(var + BN_EPS)
    shift = bp - mean * scale

    # Pass B: re-read the cheap bf16 input, recompute the conv, apply the
    # folded affine + activation, write only the Cout real channels.
    act = pl.pallas_call(
        functools.partial(_conv_bn_act_kernel, tile_m=tile_m,
                          activation=activation),
        grid=(n_tiles,),
        in_specs=[
            pl.BlockSpec((tile_m, K), lambda i: (i, 0)),
            pl.BlockSpec((3, K, Coutp), lambda i: (0, 0, 0)),
            pl.BlockSpec((1, Coutp), lambda i: (0, 0)),
            pl.BlockSpec((1, Coutp), lambda i: (0, 0)),
        ],
        out_specs=pl.BlockSpec((tile_m, Cout), lambda i: (i, 0)),
        out_shape=jax.ShapeDtypeStruct((Mp, Cout), jnp.float32),
        compiler_params=_compiler_params(tile_m, K, Coutp, tile_m * Cout * 4),
    )(X, wk, scale.reshape(1, Coutp), shift.reshape(1, Coutp))

    # Drop pad rows and pad columns.
    return act[:M].reshape(N, H, Wrow, Cout)[:, :, :W, :]


# --------------------------------------------------------------------------
# Score module
# --------------------------------------------------------------------------
def init_score_params(key, in_channels):
    """Deterministic synthetic parameters (no checkpoint load).  The conv bias
    is omitted: with training-mode BatchNorm right after the conv it cancels
    exactly (shifts the batch mean only)."""
    c = in_channels
    ks = jax.random.split(key, 6)

    def conv_w(k, cin, cout):
        return jax.random.normal(k, (3, 3, cin, cout), jnp.float32) / np.sqrt(9 * cin)

    return {
        "w1": conv_w(ks[0], c, c),
        "g1": 1.0 + 0.1 * jax.random.normal(ks[1], (c,), jnp.float32),
        "b1": 0.1 * jax.random.normal(ks[2], (c,), jnp.float32),
        "w2": conv_w(ks[3], c, 1),
        "g2": 1.0 + 0.1 * jax.random.normal(ks[4], (1,), jnp.float32),
        "b2": 0.1 * jax.random.normal(ks[5], (1,), jnp.float32),
    }


def score_forward(x, params):
    """x: (N, C, H, W)  (PyTorch layout).  Returns the score map (N, 1, H, W)."""
    xh = jnp.transpose(x, (0, 2, 3, 1))                                   # NHWC
    # Note: fusing layer-1's affine+LeakyReLU into layer-2's pass A was
    # intentionally NOT done: layer-2's spatial zero-padding must happen on the
    # *activated* h1 (leaky(affine(0)) != 0), so the fusion would need extra
    # border masking for no measurable gain at these shapes.
    h1 = conv_bn_act(xh, params["w1"], params["g1"], params["b1"], "leaky")
    h2 = conv_bn_act(h1, params["w2"], params["g2"], params["b2"], "sigmoid")
    return jnp.transpose(h2, (0, 3, 1, 2))                                # NCHW


# --------------------------------------------------------------------------
# Pure-JAX reference (same math, same bf16 rounding points) for validation
# --------------------------------------------------------------------------
def _conv3x3_ref(x, w):
    xb = x.astype(jnp.bfloat16).astype(jnp.float32)
    wb = w.astype(jnp.bfloat16).astype(jnp.float32)
    _, H, W, _ = x.shape
    xp = jnp.pad(xb, ((0, 0), (1, 1), (1, 1), (0, 0)))
    acc = 0.0
    for dy in range(3):
        for dx in range(3):
            acc = acc + jnp.einsum("nhwc,cd->nhwd",
                                   xp[:, dy:dy + H, dx:dx + W, :], wb[dy, dx],
                                   precision=jax.lax.Precision.HIGHEST)
    return acc


def _conv_bn_act_ref(x, w, gamma, beta, activation):
    y = _conv3x3_ref(x, w)
    mean = jnp.mean(y, axis=(0, 1, 2))
    var = jnp.mean(y * y, axis=(0, 1, 2)) - mean * mean
    y = (y - mean) * jax.lax.rsqrt(var + BN_EPS) * gamma + beta
    if activation == "leaky":
        y = jnp.where(y >= 0.0, y, 0.1 * y)
    elif activation == "sigmoid":
        y = jax.nn.sigmoid(y)
    return y


def score_reference(x, params):
    xh = jnp.transpose(x, (0, 2, 3, 1))
    h1 = _conv_bn_act_ref(xh, params["w1"], params["g1"], params["b1"], "leaky")
    h2 = _conv_bn_act_ref(h1, params["w2"], params["g2"], params["b2"], "sigmoid")
    return jnp.transpose(h2, (0, 3, 1, 2))


# --------------------------------------------------------------------------
if __name__ == "__main__":
    key = jax.random.PRNGKey(0)
    kx, kp = jax.random.split(key)

    # Equivalent of a torch input of shape (2, 4, 16, 16) for Score(in_channels=4).
    N, C, H, W = 2, 4, 16, 16
    x = jax.random.normal(kx, (N, C, H, W), jnp.float32)
    params = init_score_params(kp, C)

    out = jax.jit(score_forward)(x, params)
    jax.block_until_ready(out)

    assert out.shape == (N, 1, H, W), out.shape
    ref = score_reference(x, params)
    err = float(jnp.max(jnp.abs(out - ref)))
    assert err < 1e-2, f"max abs err vs reference = {err}"
    print("KERNEL_OK")
</pallas_src>

<mosaic_0001>
module attributes {stable_mosaic.version = 11 : i64} {
  func.func @_conv_stats_kernel(%arg0: i32, %arg1: memref<288x12xbf16, #tpu.memory_space<vmem>>, %arg2: memref<3x12x128xbf16, #tpu.memory_space<vmem>>, %arg3: memref<8x128xf32, #tpu.memory_space<vmem>>) attributes {dimension_semantics = [#tpu.dimension_semantics<parallel>], iteration_bounds = array<i64: 2>, scalar_prefetch = 0 : i64, scratch_operands = 0 : i64, tpu.core_type = #tpu.core_type<tc>, window_params = [{transform_indices = @transform_0, window_bounds = array<i64: 288, 12>}, {pipeline_mode = #tpu.pipeline_mode<synchronous>, transform_indices = @transform_1, window_bounds = array<i64: 3, 12, 128>}, {transform_indices = @transform_2, window_bounds = array<i64: 8, 128>}]} {
    %c0 = arith.constant 0 : index
    %c0_0 = arith.constant 0 : index
    %0 = vector.load %arg1[%c0, %c0_0] : memref<288x12xbf16, #tpu.memory_space<vmem>>, vector<288x12xbf16>
    %c0_1 = arith.constant 0 : index
    %c0_2 = arith.constant 0 : index
    %c0_3 = arith.constant 0 : index
    %1 = vector.load %arg2[%c0_1, %c0_2, %c0_3] : memref<3x12x128xbf16, #tpu.memory_space<vmem>>, vector<1x12x128xbf16>
    %2 = vector.shape_cast %1 : vector<1x12x128xbf16> to vector<12x128xbf16>
    %cst = arith.constant dense<0.000000e+00> : vector<288x128xf32>
    %3 = tpu.matmul %0, %2, %cst {dimension_numbers = #tpu.dot_dimension_numbers<[1], [0], [0], [1], [0, 0, 1, 1], [], []>} : vector<288x12xbf16>, vector<12x128xbf16>, vector<288x128xf32> -> vector<288x128xf32>
    %c1 = arith.constant 1 : index
    %c0_4 = arith.constant 0 : index
    %c0_5 = arith.constant 0 : index
    %4 = vector.load %arg2[%c1, %c0_4, %c0_5] : memref<3x12x128xbf16, #tpu.memory_space<vmem>>, vector<1x12x128xbf16>
    %5 = vector.shape_cast %4 : vector<1x12x128xbf16> to vector<12x128xbf16>
    %cst_6 = arith.constant dense<0.000000e+00> : vector<288x128xf32>
    %6 = tpu.matmul %0, %5, %cst_6 {dimension_numbers = #tpu.dot_dimension_numbers<[1], [0], [0], [1], [0, 0, 1, 1], [], []>} : vector<288x12xbf16>, vector<12x128xbf16>, vector<288x128xf32> -> vector<288x128xf32>
    %c287_i32 = arith.constant 287 : i32
    %7 = tpu.dynamic_rotate %6 by %c287_i32 dim 0 : vector<288x128xf32>, i32 -> vector<288x128xf32>
    %8 = arith.addf %3, %7 : vector<288x128xf32>
    %c2 = arith.constant 2 : index
    %c0_7 = arith.constant 0 : index
    %c0_8 = arith.constant 0 : index
    %9 = vector.load %arg2[%c2, %c0_7, %c0_8] : memref<3x12x128xbf16, #tpu.memory_space<vmem>>, vector<1x12x128xbf16>
    %10 = vector.shape_cast %9 : vector<1x12x128xbf16> to vector<12x128xbf16>
    %cst_9 = arith.constant dense<0.000000e+00> : vector<288x128xf32>
    %11 = tpu.matmul %0, %10, %cst_9 {dimension_numbers = #tpu.dot_dimension_numbers<[1], [0], [0], [1], [0, 0, 1, 1], [], []>} : vector<288x12xbf16>, vector<12x128xbf16>, vector<288x128xf32> -> vector<288x128xf32>
    %c286_i32 = arith.constant 286 : i32
    %12 = tpu.dynamic_rotate %11 by %c286_i32 dim 0 : vector<288x128xf32>, i32 -> vector<288x128xf32>
    %13 = arith.addf %8, %12 : vector<288x128xf32>
    %c288_i32 = arith.constant 288 : i32
    %14 = arith.muli %arg0, %c288_i32 : i32
    %15 = tpu.iota {dimensions = array<i32: 0>} : vector<288x128xi32>
    %16 = vector.broadcast %14 : i32 to vector<288x128xi32>
    %17 = arith.addi %16, %15 : vector<288x128xi32>
    %c18_i32 = arith.constant 18 : i32
    %c0_i32 = arith.constant 0 : i32
    %18 = arith.cmpi eq, %c18_i32, %c0_i32 : i32
    %c1_i32 = arith.constant 1 : i32
    %19 = arith.select %18, %c1_i32, %c18_i32 : i32
    %20 = vector.broadcast %19 : i32 to vector<288x128xi32>
    %21 = arith.remsi %17, %20 : vector<288x128xi32>
    %c0_i32_10 = arith.constant 0 : i32
    %22 = vector.broadcast %c0_i32_10 : i32 to vector<288x128xi32>
    %23 = arith.cmpi ne, %21, %22 : vector<288x128xi32>
    %c0_i32_11 = arith.constant 0 : i32
    %24 = vector.broadcast %c0_i32_11 : i32 to vector<288x128xi32>
    %25 = arith.cmpi slt, %21, %24 : vector<288x128xi32>
    %c0_i32_12 = arith.constant 0 : i32
    %26 = arith.cmpi slt, %19, %c0_i32_12 : i32
    %27 = vector.broadcast %26 : i1 to vector<288x128xi1>
    %28 = vector.broadcast %27 : vector<288x128xi1> to vector<288x128xi1>
    %29 = arith.xori %25, %28 : vector<288x128xi1>
    %30 = arith.andi %29, %23 : vector<288x128xi1>
    %31 = vector.broadcast %19 : i32 to vector<288x128xi32>
    %32 = arith.addi %21, %31 : vector<288x128xi32>
    %33 = arith.select %30, %32, %21 : vector<288x128xi1>, vector<288x128xi32>
    %c16_i32 = arith.constant 16 : i32
    %34 = vector.broadcast %c16_i32 : i32 to vector<288x128xi32>
    %35 = arith.cmpi slt, %33, %34 : vector<288x128xi32>
    %c576_i32 = arith.constant 576 : i32
    %36 = vector.broadcast %c576_i32 : i32 to vector<288x128xi32>
    %37 = arith.cmpi slt, %17, %36 : vector<288x128xi32>
    %38 = arith.andi %35, %37 : vector<288x128xi1>
    %39 = arith.extui %38 : vector<288x128xi1> to vector<288x128xi32>
    %40 = arith.sitofp %39 : vector<288x128xi32> to vector<288x128xf32>
    %41 = arith.mulf %13, %40 : vector<288x128xf32>
    %cst_13 = arith.constant dense<0.000000e+00> : vector<128xf32>
    %42 = vector.multi_reduction <add>, %41, %cst_13 [0] : vector<288x128xf32> to vector<128xf32>
    %43 = vector.shape_cast %42 : vector<128xf32> to vector<1x128xf32>
    %44 = arith.mulf %41, %13 : vector<288x128xf32>
    %cst_14 = arith.constant dense<0.000000e+00> : vector<128xf32>
    %45 = vector.multi_reduction <add>, %44, %cst_14 [0] : vector<288x128xf32> to vector<128xf32>
    %46 = vector.shape_cast %45 : vector<128xf32> to vector<1x128xf32>
    %cst_15 = arith.constant 0.000000e+00 : f32
    %47 = vector.broadcast %cst_15 : f32 to vector<6x128xf32>
    %48 = tpu.concatenate %43, %46, %47 in 0 : vector<1x128xf32>, vector<1x128xf32>, vector<6x128xf32> -> vector<8x128xf32>
    %c0_16 = arith.constant 0 : index
    %c0_17 = arith.constant 0 : index
    %49 = vector.load %arg3[%c0_16, %c0_17] : memref<8x128xf32, #tpu.memory_space<vmem>>, vector<8x128xf32>
    tpu.vector_store %arg3[%c0_16, %c0_17], %48 {strides = array<i32>} : memref<8x128xf32, #tpu.memory_space<vmem>>, vector<8x128xf32>,
    return
  }
  func.func @transform_0(%arg0: i32) -> (i32, i32) {
    %c0_i32 = arith.constant 0 : i32
    %c0_i32_0 = arith.constant 0 : i32
    return %arg0, %c0_i32 : i32, i32
  }
  func.func @transform_1(%arg0: i32) -> (i32, i32, i32) {
    %c0_i32 = arith.constant 0 : i32
    %c0_i32_0 = arith.constant 0 : i32
    %c0_i32_1 = arith.constant 0 : i32
    %c0_i32_2 = arith.constant 0 : i32
    return %c0_i32, %c0_i32_0, %c0_i32_1 : i32, i32, i32
  }
  func.func @transform_2(%arg0: i32) -> (i32, i32) {
    %c0_i32 = arith.constant 0 : i32
    %c0_i32_0 = arith.constant 0 : i32
    return %arg0, %c0_i32 : i32, i32
  }
}

module attributes {stable_mosaic.version = 11 : i64} {
  func.func @_conv_bn_act_kernel(%arg0: i32, %arg1: memref<288x12xbf16, #tpu.memory_space<vmem>>, %arg2: memref<3x12x128xbf16, #tpu.memory_space<vmem>>, %arg3: memref<1x128xf32, #tpu.memory_space<vmem>>, %arg4: memref<1x128xf32, #tpu.memory_space<vmem>>, %arg5: memref<288x4xf32, #tpu.memory_space<vmem>>) attributes {dimension_semantics = [#tpu.dimension_semantics<parallel>], iteration_bounds = array<i64: 2>, scalar_prefetch = 0 : i64, scratch_operands = 0 : i64, tpu.core_type = #tpu.core_type<tc>, window_params = [{transform_indices = @transform_0, window_bounds = array<i64: 288, 12>}, {pipeline_mode = #tpu.pipeline_mode<synchronous>, transform_indices = @transform_1, window_bounds = array<i64: 3, 12, 128>}, {pipeline_mode = #tpu.pipeline_mode<synchronous>, transform_indices = @transform_2, window_bounds = array<i64: 1, 128>}, {pipeline_mode = #tpu.pipeline_mode<synchronous>, transform_indices = @transform_3, window_bounds = array<i64: 1, 128>}, {transform_indices = @transform_4, window_bounds = array<i64: 288, 4>}]} {
    %c0 = arith.constant 0 : index
    %c0_0 = arith.constant 0 : index
    %0 = vector.load %arg1[%c0, %c0_0] : memref<288x12xbf16, #tpu.memory_space<vmem>>, vector<288x12xbf16>
    %c0_1 = arith.constant 0 : index
    %c0_2 = arith.constant 0 : index
    %c0_3 = arith.constant 0 : index
    %1 = vector.load %arg2[%c0_1, %c0_2, %c0_3] : memref<3x12x128xbf16, #tpu.memory_space<vmem>>, vector<1x12x128xbf16>
    %2 = vector.shape_cast %1 : vector<1x12x128xbf16> to vector<12x128xbf16>
    %cst = arith.constant dense<0.000000e+00> : vector<288x128xf32>
    %3 = tpu.matmul %0, %2, %cst {dimension_numbers = #tpu.dot_dimension_numbers<[1], [0], [0], [1], [0, 0, 1, 1], [], []>} : vector<288x12xbf16>, vector<12x128xbf16>, vector<288x128xf32> -> vector<288x128xf32>
    %c1 = arith.constant 1 : index
    %c0_4 = arith.constant 0 : index
    %c0_5 = arith.constant 0 : index
    %4 = vector.load %arg2[%c1, %c0_4, %c0_5] : memref<3x12x128xbf16, #tpu.memory_space<vmem>>, vector<1x12x128xbf16>
    %5 = vector.shape_cast %4 : vector<1x12x128xbf16> to vector<12x128xbf16>
    %cst_6 = arith.constant dense<0.000000e+00> : vector<288x128xf32>
    %6 = tpu.matmul %0, %5, %cst_6 {dimension_numbers = #tpu.dot_dimension_numbers<[1], [0], [0], [1], [0, 0, 1, 1], [], []>} : vector<288x12xbf16>, vector<12x128xbf16>, vector<288x128xf32> -> vector<288x128xf32>
    %c287_i32 = arith.constant 287 : i32
    %7 = tpu.dynamic_rotate %6 by %c287_i32 dim 0 : vector<288x128xf32>, i32 -> vector<288x128xf32>
    %8 = arith.addf %3, %7 : vector<288x128xf32>
    %c2 = arith.constant 2 : index
    %c0_7 = arith.constant 0 : index
    %c0_8 = arith.constant 0 : index
    %9 = vector.load %arg2[%c2, %c0_7, %c0_8] : memref<3x12x128xbf16, #tpu.memory_space<vmem>>, vector<1x12x128xbf16>
    %10 = vector.shape_cast %9 : vector<1x12x128xbf16> to vector<12x128xbf16>
    %cst_9 = arith.constant dense<0.000000e+00> : vector<288x128xf32>
    %11 = tpu.matmul %0, %10, %cst_9 {dimension_numbers = #tpu.dot_dimension_numbers<[1], [0], [0], [1], [0, 0, 1, 1], [], []>} : vector<288x12xbf16>, vector<12x128xbf16>, vector<288x128xf32> -> vector<288x128xf32>
    %c286_i32 = arith.constant 286 : i32
    %12 = tpu.dynamic_rotate %11 by %c286_i32 dim 0 : vector<288x128xf32>, i32 -> vector<288x128xf32>
    %13 = arith.addf %8, %12 : vector<288x128xf32>
    %c0_10 = arith.constant 0 : index
    %c0_11 = arith.constant 0 : index
    %14 = vector.load %arg3[%c0_10, %c0_11] : memref<1x128xf32, #tpu.memory_space<vmem>>, vector<1x128xf32>
    %15 = vector.broadcast %14 : vector<1x128xf32> to vector<288x128xf32>
    %16 = arith.mulf %13, %15 : vector<288x128xf32>
    %c0_12 = arith.constant 0 : index
    %c0_13 = arith.constant 0 : index
    %17 = vector.load %arg4[%c0_12, %c0_13] : memref<1x128xf32, #tpu.memory_space<vmem>>, vector<1x128xf32>
    %18 = vector.broadcast %17 : vector<1x128xf32> to vector<288x128xf32>
    %19 = arith.addf %16, %18 : vector<288x128xf32>
    %cst_14 = arith.constant 0.000000e+00 : f32
    %20 = vector.broadcast %cst_14 : f32 to vector<288x128xf32>
    %21 = arith.cmpf oge, %19, %20 : vector<288x128xf32>
    %cst_15 = arith.constant 1.000000e-01 : f32
    %22 = vector.broadcast %cst_15 : f32 to vector<288x128xf32>
    %23 = arith.mulf %22, %19 : vector<288x128xf32>
    %24 = arith.select %21, %19, %23 : vector<288x128xi1>, vector<288x128xf32>
    %25 = vector.extract_strided_slice %24 {offsets = [0, 0], sizes = [288, 4], strides = [1, 1]} : vector<288x128xf32> to vector<288x4xf32>
    %c0_16 = arith.constant 0 : index
    %c0_17 = arith.constant 0 : index
    %26 = vector.load %arg5[%c0_16, %c0_17] : memref<288x4xf32, #tpu.memory_space<vmem>>, vector<288x4xf32>
    tpu.vector_store %arg5[%c0_16, %c0_17], %25 {strides = array<i32>} : memref<288x4xf32, #tpu.memory_space<vmem>>, vector<288x4xf32>,
    return
  }
  func.func @transform_0(%arg0: i32) -> (i32, i32) {
    %c0_i32 = arith.constant 0 : i32
    %c0_i32_0 = arith.constant 0 : i32
    return %arg0, %c0_i32 : i32, i32
  }
  func.func @transform_1(%arg0: i32) -> (i32, i32, i32) {
    %c0_i32 = arith.constant 0 : i32
    %c0_i32_0 = arith.constant 0 : i32
    %c0_i32_1 = arith.constant 0 : i32
    %c0_i32_2 = arith.constant 0 : i32
    return %c0_i32, %c0_i32_0, %c0_i32_1 : i32, i32, i32
  }
  func.func @transform_2(%arg0: i32) -> (i32, i32) {
    %c0_i32 = arith.constant 0 : i32
    %c0_i32_0 = arith.constant 0 : i32
    %c0_i32_1 = arith.constant 0 : i32
    return %c0_i32, %c0_i32_0 : i32, i32
  }
  func.func @transform_3(%arg0: i32) -> (i32, i32) {
    %c0_i32 = arith.constant 0 : i32
    %c0_i32_0 = arith.constant 0 : i32
    %c0_i32_1 = arith.constant 0 : i32
    return %c0_i32, %c0_i32_0 : i32, i32
  }
  func.func @transform_4(%arg0: i32) -> (i32, i32) {
    %c0_i32 = arith.constant 0 : i32
    %c0_i32_0 = arith.constant 0 : i32
    return %arg0, %c0_i32 : i32, i32
  }
}

module attributes {stable_mosaic.version = 11 : i64} {
  func.func @_conv_bn_act_kernel(%arg0: i32, %arg1: memref<288x12xbf16, #tpu.memory_space<vmem>>, %arg2: memref<3x12x128xbf16, #tpu.memory_space<vmem>>, %arg3: memref<1x128xf32, #tpu.memory_space<vmem>>, %arg4: memref<1x128xf32, #tpu.memory_space<vmem>>, %arg5: memref<288x1xf32, #tpu.memory_space<vmem>>) attributes {dimension_semantics = [#tpu.dimension_semantics<parallel>], iteration_bounds = array<i64: 2>, scalar_prefetch = 0 : i64, scratch_operands = 0 : i64, tpu.core_type = #tpu.core_type<tc>, window_params = [{transform_indices = @transform_0, window_bounds = array<i64: 288, 12>}, {pipeline_mode = #tpu.pipeline_mode<synchronous>, transform_indices = @transform_1, window_bounds = array<i64: 3, 12, 128>}, {pipeline_mode = #tpu.pipeline_mode<synchronous>, transform_indices = @transform_2, window_bounds = array<i64: 1, 128>}, {pipeline_mode = #tpu.pipeline_mode<synchronous>, transform_indices = @transform_3, window_bounds = array<i64: 1, 128>}, {transform_indices = @transform_4, window_bounds = array<i64: 288, 1>}]} {
    %c0 = arith.constant 0 : index
    %c0_0 = arith.constant 0 : index
    %0 = vector.load %arg1[%c0, %c0_0] : memref<288x12xbf16, #tpu.memory_space<vmem>>, vector<288x12xbf16>
    %c0_1 = arith.constant 0 : index
    %c0_2 = arith.constant 0 : index
    %c0_3 = arith.constant 0 : index
    %1 = vector.load %arg2[%c0_1, %c0_2, %c0_3] : memref<3x12x128xbf16, #tpu.memory_space<vmem>>, vector<1x12x128xbf16>
    %2 = vector.shape_cast %1 : vector<1x12x128xbf16> to vector<12x128xbf16>
    %cst = arith.constant dense<0.000000e+00> : vector<288x128xf32>
    %3 = tpu.matmul %0, %2, %cst {dimension_numbers = #tpu.dot_dimension_numbers<[1], [0], [0], [1], [0, 0, 1, 1], [], []>} : vector<288x12xbf16>, vector<12x128xbf16>, vector<288x128xf32> -> vector<288x128xf32>
    %c1 = arith.constant 1 : index
    %c0_4 = arith.constant 0 : index
    %c0_5 = arith.constant 0 : index
    %4 = vector.load %arg2[%c1, %c0_4, %c0_5] : memref<3x12x128xbf16, #tpu.memory_space<vmem>>, vector<1x12x128xbf16>
    %5 = vector.shape_cast %4 : vector<1x12x128xbf16> to vector<12x128xbf16>
    %cst_6 = arith.constant dense<0.000000e+00> : vector<288x128xf32>
    %6 = tpu.matmul %0, %5, %cst_6 {dimension_numbers = #tpu.dot_dimension_numbers<[1], [0], [0], [1], [0, 0, 1, 1], [], []>} : vector<288x12xbf16>, vector<12x128xbf16>, vector<288x128xf32> -> vector<288x128xf32>
    %c287_i32 = arith.constant 287 : i32
    %7 = tpu.dynamic_rotate %6 by %c287_i32 dim 0 : vector<288x128xf32>, i32 -> vector<288x128xf32>
    %8 = arith.addf %3, %7 : vector<288x128xf32>
    %c2 = arith.constant 2 : index
    %c0_7 = arith.constant 0 : index
    %c0_8 = arith.constant 0 : index
    %9 = vector.load %arg2[%c2, %c0_7, %c0_8] : memref<3x12x128xbf16, #tpu.memory_space<vmem>>, vector<1x12x128xbf16>
    %10 = vector.shape_cast %9 : vector<1x12x128xbf16> to vector<12x128xbf16>
    %cst_9 = arith.constant dense<0.000000e+00> : vector<288x128xf32>
    %11 = tpu.matmul %0, %10, %cst_9 {dimension_numbers = #tpu.dot_dimension_numbers<[1], [0], [0], [1], [0, 0, 1, 1], [], []>} : vector<288x12xbf16>, vector<12x128xbf16>, vector<288x128xf32> -> vector<288x128xf32>
    %c286_i32 = arith.constant 286 : i32
    %12 = tpu.dynamic_rotate %11 by %c286_i32 dim 0 : vector<288x128xf32>, i32 -> vector<288x128xf32>
    %13 = arith.addf %8, %12 : vector<288x128xf32>
    %c0_10 = arith.constant 0 : index
    %c0_11 = arith.constant 0 : index
    %14 = vector.load %arg3[%c0_10, %c0_11] : memref<1x128xf32, #tpu.memory_space<vmem>>, vector<1x128xf32>
    %15 = vector.broadcast %14 : vector<1x128xf32> to vector<288x128xf32>
    %16 = arith.mulf %13, %15 : vector<288x128xf32>
    %c0_12 = arith.constant 0 : index
    %c0_13 = arith.constant 0 : index
    %17 = vector.load %arg4[%c0_12, %c0_13] : memref<1x128xf32, #tpu.memory_space<vmem>>, vector<1x128xf32>
    %18 = vector.broadcast %17 : vector<1x128xf32> to vector<288x128xf32>
    %19 = arith.addf %16, %18 : vector<288x128xf32>
    %20 = arith.negf %19 : vector<288x128xf32>
    %21 = math.exp %20 : vector<288x128xf32>
    %cst_14 = arith.constant 1.000000e+00 : f32
    %22 = vector.broadcast %cst_14 : f32 to vector<288x128xf32>
    %23 = arith.addf %22, %21 : vector<288x128xf32>
    %24 = arith.divf %22, %23 : vector<288x128xf32>
    %25 = vector.extract_strided_slice %24 {offsets = [0, 0], sizes = [288, 1], strides = [1, 1]} : vector<288x128xf32> to vector<288x1xf32>
    %c0_15 = arith.constant 0 : index
    %c0_16 = arith.constant 0 : index
    %26 = vector.load %arg5[%c0_15, %c0_16] : memref<288x1xf32, #tpu.memory_space<vmem>>, vector<288x1xf32>
    tpu.vector_store %arg5[%c0_15, %c0_16], %25 {strides = array<i32>} : memref<288x1xf32, #tpu.memory_space<vmem>>, vector<288x1xf32>,
    return
  }
  func.func @transform_0(%arg0: i32) -> (i32, i32) {
    %c0_i32 = arith.constant 0 : i32
    %c0_i32_0 = arith.constant 0 : i32
    return %arg0, %c0_i32 : i32, i32
  }
  func.func @transform_1(%arg0: i32) -> (i32, i32, i32) {
    %c0_i32 = arith.constant 0 : i32
    %c0_i32_0 = arith.constant 0 : i32
    %c0_i32_1 = arith.constant 0 : i32
    %c0_i32_2 = arith.constant 0 : i32
    return %c0_i32, %c0_i32_0, %c0_i32_1 : i32, i32, i32
  }
  func.func @transform_2(%arg0: i32) -> (i32, i32) {
    %c0_i32 = arith.constant 0 : i32
    %c0_i32_0 = arith.constant 0 : i32
    %c0_i32_1 = arith.constant 0 : i32
    return %c0_i32, %c0_i32_0 : i32, i32
  }
  func.func @transform_3(%arg0: i32) -> (i32, i32) {
    %c0_i32 = arith.constant 0 : i32
    %c0_i32_0 = arith.constant 0 : i32
    %c0_i32_1 = arith.constant 0 : i32
    return %c0_i32, %c0_i32_0 : i32, i32
  }
  func.func @transform_4(%arg0: i32) -> (i32, i32) {
    %c0_i32 = arith.constant 0 : i32
    %c0_i32_0 = arith.constant 0 : i32
    return %arg0, %c0_i32 : i32, i32
  }
}

</mosaic_0001>

<bundles_post_ra>
// kernel: score_forward.5
= control target key start
LH: loop header
LB: loop body
LE: loop exit
PB: predicated region body
PF: predicated region fallthrough
CT: control target
= control target key end

     0   :  { %s1747_s15 = smov 0   ;;  %s2408_s0 = inlined_call_operand.vmem [shape: bf16[576,12], index: 0, kind: input, shape index: {}]   ;;  %s2409_s1 = inlined_call_operand.vmem [shape: bf16[3,12,128], index: 1, kind: input, shape index: {}]   ;;  %s2410_s2 = inlined_call_operand.vmem [shape: f32[1,128], index: 2, kind: input, shape index: {}]   ;;  %s2411_s3 = inlined_call_operand.vmem [shape: f32[1,128], index: 3, kind: input, shape index: {}]   ;;  %s2412_s4 = inlined_call_operand.vmem [shape: f32[576,4], index: 4, kind: output, shape index: {}]  }
   0x1 LB: > { %s1418_s16 = sadd.s32 4294967295, %s1720_s15   ;;  %p1422_p0 = scmp.ge.s32.totalorder %s1720_s15, 1  ;;  %s1720_s15 = sphi %s1747_s15, %s14_s15  }
   0x2   : > { %p163_p1 = scmp.lt.s32.totalorder %s1720_s15, 3 }
   0x4   : > { %p164_p2 = pnand %p1422_p0, %p163_p1 }
   0x5   : > { %v1693_v0 = vld [vmem:[%s2409_s1 + $0x8] sm:$0x3f] (!%p164_p2)   ;;  %vm393_vm0 = vcmask (!%p164_p2), 1045504   ;;  %s189_s19 = smul.u32 (!%p164_p2), 36, %s1418_s16  ;;  %v1696_v2 = vld [vmem:[%s2409_s1 + $0x10] sm:$0x3f] (!%p164_p2)   ;;  %v610_v24 = vlaneseq (!%p164_p2) }
   0x6   : > { %167 = sbr.rel (%p164_p2) target bundleno = 360 (0x168), region = 36  ;;  %1681 = vmatprep.subr.msk.bf16.mxu0 (!%p164_p2), %vm393_vm0, %v1693_v0  ;;  %1682 = vmatprep.subr.msk.bf16.mxu1 (!%p164_p2), %vm393_vm0, %v1693_v0  ;;  %v395_v1 = vsel (!%p164_p2), %vm393_vm0, %v1693_v0, 0  ;;  %v1703_v3 = vld [vmem:[%s2409_s1] sm:$0x3f] (!%p164_p2)   ;;  %vm338_vm1 = vcmask (!%p164_p2), 97280   ;;  %v843_v7 = vsel (!%p164_p2), %vm393_vm0, %v1696_v2, 0 }
   0x7   : > { %1566 = vmatpush3.bf16.msra.mxu0 (!%p164_p2), %v395_v1  ;;  %1680 = vmatpush3.bf16.msra.mxu1 (!%p164_p2), %v395_v1  ;;  %p190_p3 = scmp.lt.s32.totalorder (!%p164_p2), %s189_s19, 71  ;;  %v655_v9 = vsel (!%p164_p2), %vm393_vm0, %v1703_v3, 0  ;;  %v1851_v25 = vshrl.u32 (!%p164_p2), %v610_v24, 7  ;;  %vm1325_vm4 = vcmask (!%p164_p2), 31744  }
   0x8   : > { %1684 = vmatprep.subr.msk.bf16.mxu0 (!%p164_p2), %vm393_vm0, %v1696_v2  ;;  %1683 = vmatprep.subr.msk.bf16.mxu1 (!%p164_p2), %vm393_vm0, %v1703_v3 }
   0x9   : > { %vm612_vm2 = vcmp.lt.s32.totalorder (!%p164_p2), %v1851_v25, 7  ;;  %vm1058_vm3 = vcmp.lt.s32.totalorder (!%p164_p2), %v1851_v25, 6 }
   0xd   : > { %s2414_s19 = smov (!%p190_p3, %s189_s19), 71 }
   0xe   : > { %s1423_s24 = sshll.u32 %s2414_s19, 2  ;;  %s1424_s6 = sshll.u32 %s2414_s19, 3 }
   0xf   : > { %s1775_s27 = scalar_lea.vmem %s2408_s0, %s1423_s24  ;;  %s2064_s9 = scalar_lea.vmem %s2412_s4, %s1424_s6 }
  0x10   : > { %v1694_v4 = vld [vmem:[%s1775_s27] sm:$0xff]   ;;  %v1695_v5 = vld [vmem:[%s1775_s27 + $0x50] sm:$0xff]   ;;  %v1697_v6 = vld [vmem:[%s1775_s27 + $0x8] sm:$0xff]  }
  0x11   : > { %1567 = vmatprep.mubr.msk.bf16.mxu0 %vm338_vm1, %v1694_v4  ;;  %1587 = vmatprep.mubr.msk.bf16.mxu1 %vm338_vm1, %v1695_v5  ;;  %v1698_v8 = vld [vmem:[%s1775_s27 + $0x58] sm:$0xff]   ;;  %v1699_v10 = vld [vmem:[%s1775_s27 + $0x10] sm:$0xff]   ;;  %v1700_v11 = vld [vmem:[%s1775_s27 + $0x60] sm:$0xff]  }
  0x12   : > { %1568 = vmatmul.mubr.msk.bf16.vlgmr.msra.gmra.mrb[0].mxu0 %vm338_vm1, %v1697_v6  ;;  %1588 = vmatmul.mubr.msk.bf16.vlgmr.msra.gmra.mrb[0].mxu1 %vm338_vm1, %v1698_v8  ;;  %v1701_v12 = vld [vmem:[%s1775_s27 + $0x18] sm:$0xff]   ;;  %v1702_v13 = vld [vmem:[%s1775_s27 + $0x68] sm:$0xff]   ;;  %v1704_v14 = vld [vmem:[%s1775_s27 + $0x20] sm:$0xff]  }
  0x13   : > { %1642 = vmatpush3.bf16.msra.mxu0 %v843_v7  ;;  %1571 = vmatprep.mubr.msk.bf16.mxu0 %vm338_vm1, %v1699_v10  ;;  %v1705_v15 = vld [vmem:[%s1775_s27 + $0x70] sm:$0xff]   ;;  %v1706_v16 = vld [vmem:[%s1775_s27 + $0x28] sm:$0xff]   ;;  %v1707_v17 = vld [vmem:[%s1775_s27 + $0x78] sm:$0xff]  }
  0x14   : > { %1604 = vmatpush3.bf16.msra.mxu1 %v655_v9  ;;  %1591 = vmatprep.mubr.msk.bf16.mxu1 %vm338_vm1, %v1700_v11  ;;  %v1708_v18 = vld [vmem:[%s1775_s27 + $0x30] sm:$0xff]   ;;  %v1709_v19 = vld [vmem:[%s1775_s27 + $0x80] sm:$0xff]   ;;  %v1710_v20 = vld [vmem:[%s1775_s27 + $0x38] sm:$0xff]  }
  0x15   : > { %v1711_v21 = vld [vmem:[%s1775_s27 + $0x88] sm:$0xff]   ;;  %v1712_v22 = vld [vmem:[%s1775_s27 + $0x40] sm:$0xff]  }
  0x16   : > { %v1713_v23 = vld [vmem:[%s1775_s27 + $0x48] sm:$0xff]  }
  0x1a   : > { %1572 = vmatmul.mubr.msk.bf16.gmra.mrb[4].mxu0 %vm338_vm1, %v1701_v12  ;;  %1592 = vmatmul.mubr.msk.bf16.gmra.mrb[4].mxu1 %vm338_vm1, %v1702_v13 }
  0x1b   : > { %1575 = vmatprep.mubr.msk.bf16.mxu0 %vm338_vm1, %v1704_v14  ;;  %1595 = vmatprep.mubr.msk.bf16.mxu1 %vm338_vm1, %v1705_v15 }
  0x22   : > { %1576 = vmatmul.mubr.msk.bf16.gmra.mrb[8].mxu0 %vm338_vm1, %v1706_v16  ;;  %1596 = vmatmul.mubr.msk.bf16.gmra.mrb[8].mxu1 %vm338_vm1, %v1707_v17 }
  0x23   : > { %1579 = vmatprep.mubr.msk.bf16.mxu0 %vm338_vm1, %v1708_v18  ;;  %1599 = vmatprep.mubr.msk.bf16.mxu1 %vm338_vm1, %v1709_v19 }
  0x2a   : > { %1580 = vmatmul.mubr.msk.bf16.gmra.mrb[12].mxu0 %vm338_vm1, %v1710_v20  ;;  %1600 = vmatmul.mubr.msk.bf16.gmra.mrb[12].mxu1 %vm338_vm1, %v1711_v21 }
  0x2b   : > { %1583 = vmatprep.mubr.msk.bf16.mxu0 %vm338_vm1, %v1712_v22  ;;  %1605 = vmatprep.mubr.msk.bf16.mxu1 %vm338_vm1, %v1694_v4 }
  0x32   : > { %1584 = vmatmul.mubr.msk.bf16.gmra.mrb[16].mxu0 %vm338_vm1, %v1713_v23  ;;  %1606 = vmatmul.mubr.msk.bf16.vlgmr.msra.gmra.mrb[16].mxu1 %vm338_vm1, %v1697_v6 }
  0x33   : > { %1643 = vmatprep.mubr.msk.bf16.mxu0 %vm338_vm1, %v1694_v4  ;;  %1609 = vmatprep.mubr.msk.bf16.mxu1 %vm338_vm1, %v1699_v10 }
  0x3a   : > { %1644 = vmatmul.mubr.msk.bf16.vlgmr.msra.gmra.mrb[20].mxu0 %vm338_vm1, %v1697_v6  ;;  %1610 = vmatmul.mubr.msk.bf16.gmra.mrb[20].mxu1 %vm338_vm1, %v1701_v12 }
  0x3b   : > { %1647 = vmatprep.mubr.msk.bf16.mxu0 %vm338_vm1, %v1699_v10  ;;  %1613 = vmatprep.mubr.msk.bf16.mxu1 %vm338_vm1, %v1704_v14 }
  0x42   : > { %1648 = vmatmul.mubr.msk.bf16.gmra.mrb[24].mxu0 %vm338_vm1, %v1701_v12  ;;  %1614 = vmatmul.mubr.msk.bf16.gmra.mrb[24].mxu1 %vm338_vm1, %v1706_v16 }
  0x43   : > { %1651 = vmatprep.mubr.msk.bf16.mxu0 %vm338_vm1, %v1704_v14  ;;  %1617 = vmatprep.mubr.msk.bf16.mxu1 %vm338_vm1, %v1708_v18 }
  0x4a   : > { %1652 = vmatmul.mubr.msk.bf16.gmra.mrb[28].mxu0 %vm338_vm1, %v1706_v16  ;;  %1618 = vmatmul.mubr.msk.bf16.gmra.mrb[28].mxu1 %vm338_vm1, %v1710_v20 }
  0x4b   : > { %1655 = vmatprep.mubr.msk.bf16.mxu0 %vm338_vm1, %v1708_v18  ;;  %1621 = vmatprep.mubr.msk.bf16.mxu1 %vm338_vm1, %v1712_v22 }
  0x52   : > { %1656 = vmatmul.mubr.msk.bf16.gmra.mrb[32].mxu0 %vm338_vm1, %v1710_v20  ;;  %1622 = vmatmul.mubr.msk.bf16.gmra.mrb[32].mxu1 %vm338_vm1, %v1713_v23 }
  0x53   : > { %1659 = vmatprep.mubr.msk.bf16.mxu0 %vm338_vm1, %v1712_v22  ;;  %1625 = vmatprep.mubr.msk.bf16.mxu1 %vm338_vm1, %v1695_v5 }
  0x5a   : > { %1660 = vmatmul.mubr.msk.bf16.gmra.mrb[36].mxu0 %vm338_vm1, %v1713_v23  ;;  %1626 = vmatmul.mubr.msk.bf16.gmra.mrb[36].mxu1 %vm338_vm1, %v1698_v8 }
  0x5b   : > { %1663 = vmatprep.mubr.msk.bf16.mxu0 %vm338_vm1, %v1695_v5  ;;  %1629 = vmatprep.mubr.msk.bf16.mxu1 %vm338_vm1, %v1700_v11 }
  0x62   : > { %1664 = vmatmul.mubr.msk.bf16.gmra.mrb[40].mxu0 %vm338_vm1, %v1698_v8  ;;  %1630 = vmatmul.mubr.msk.bf16.gmra.mrb[40].mxu1 %vm338_vm1, %v1702_v13 }
  0x63   : > { %1667 = vmatprep.mubr.msk.bf16.mxu0 %vm338_vm1, %v1700_v11  ;;  %1633 = vmatprep.mubr.msk.bf16.mxu1 %vm338_vm1, %v1705_v15 }
  0x6a   : > { %1668 = vmatmul.mubr.msk.bf16.gmra.mrb[44].mxu0 %vm338_vm1, %v1702_v13  ;;  %1634 = vmatmul.mubr.msk.bf16.gmra.mrb[44].mxu1 %vm338_vm1, %v1707_v17 }
  0x6b   : > { %1671 = vmatprep.mubr.msk.bf16.mxu0 %vm338_vm1, %v1705_v15  ;;  %1637 = vmatprep.mubr.msk.bf16.mxu1 %vm338_vm1, %v1709_v19 }
  0x72   : > { %1672 = vmatmul.mubr.msk.bf16.gmra.mrb[48].mxu0 %vm338_vm1, %v1707_v17  ;;  %1638 = vmatmul.mubr.msk.bf16.gmra.mrb[48].mxu1 %vm338_vm1, %v1711_v21 }
  0x73   : > { %1675 = vmatprep.mubr.msk.bf16.mxu0 %vm338_vm1, %v1709_v19 }
  0x7a   : > { %1676 = vmatmul.mubr.msk.bf16.gmra.mrb[52].mxu0 %vm338_vm1, %v1711_v21 }
  0xe5   : > { %v1569_v26 = vpop.f32.mrb[0].mxu0  ;;  %v1589_v28 = vpop.f32.mrb[0].mxu1 }
  0xe6   : > { %v1853_v27 = vpop.f32.mrb[1].mxu0  ;;  %v596_v30 = vrot.slane %v1589_v28, 1  ;;  %v1855_v31 = vpop.f32.mrb[1].mxu1  ;;  %v576_v32 = vrot.slane %v1569_v26, 1 }
  0xe7   : > { %v1570_v29 = vpop.f32.mrb[2].mxu0  ;;  %v594_v35 = vrot.slane %v1855_v31, 1  ;;  %v1590_v36 = vpop.f32.mrb[2].mxu1  ;;  %v574_v37 = vrot.slane %v1853_v27, 1 }
  0xe8   : > { %v577_v33 = vrot.slane %v1570_v29, 1  ;;  %v434_v34 = vpop.f32.mrb[3].mxu0  ;;  %v597_v39 = vrot.slane %v1590_v36, 1  ;;  %v514_v40 = vpop.f32.mrb[3].mxu1 }
  0xe9   : > { %v575_v38 = vrot.slane %v434_v34, 1  ;;  %v595_v41 = vrot.slane %v514_v40, 1 }
  0xea   : > { %v1862_v42 = vsel %vm612_vm2, %v576_v32, %v577_v33  ;;  %v1876_v45 = vsel %vm612_vm2, %v596_v30, %v597_v39 }
  0xeb   : > { %v1868_v43 = vsel %vm612_vm2, %v574_v37, %v575_v38  ;;  %v1872_v44 = vsel %vm612_vm2, %v575_v38, %v576_v32  ;;  %v1882_v46 = vsel %vm612_vm2, %v594_v35, %v595_v41  ;;  %v1886_v47 = vsel %vm612_vm2, %v595_v41, %v596_v30 }
  0xed   : > { %v1573_v48 = vpop.f32.mrb[4].mxu0  ;;  %v1593_v49 = vpop.f32.mrb[4].mxu1 }
  0xee   : > { %v447_v50 = vpop.f32.mrb[5].mxu0  ;;  %v600_v51 = vrot.slane %v1593_v49, 1  ;;  %v527_v53 = vpop.f32.mrb[5].mxu1  ;;  %v580_v55 = vrot.slane %v1573_v48, 1 }
  0xef   : > { %v578_v52 = vrot.slane %v447_v50, 1  ;;  %v1574_v54 = vpop.f32.mrb[6].mxu0  ;;  %v598_v56 = vrot.slane %v527_v53, 1  ;;  %v1594_v59 = vpop.f32.mrb[6].mxu1 }
  0xf0   : > { %v581_v57 = vrot.slane %v1574_v54, 1  ;;  %v450_v58 = vpop.f32.mrb[7].mxu0  ;;  %v601_v61 = vrot.slane %v1594_v59, 1  ;;  %v530_v62 = vpop.f32.mrb[7].mxu1 }
  0xf1   : > { %v579_v60 = vrot.slane %v450_v58, 1  ;;  %v1890_v63 = vsel %vm612_vm2, %v577_v33, %v578_v52  ;;  %v599_v0 = vrot.slane %v530_v62, 1  ;;  %v1898_v2 = vsel %vm612_vm2, %v597_v39, %v598_v56 }
  0xf2   : > { %v1894_v1 = vsel %vm612_vm2, %v580_v55, %v581_v57  ;;  %v1910_v5 = vsel %vm612_vm2, %v600_v51, %v601_v61 }
  0xf3   : > { %v1902_v3 = vsel %vm612_vm2, %v578_v52, %v579_v60  ;;  %v1906_v4 = vsel %vm612_vm2, %v579_v60, %v580_v55  ;;  %v1914_v6 = vsel %vm612_vm2, %v598_v56, %v599_v0  ;;  %v1918_v7 = vsel %vm612_vm2, %v599_v0, %v600_v51 }
  0xf5   : > { %v1577_v8 = vpop.f32.mrb[8].mxu0  ;;  %v1597_v9 = vpop.f32.mrb[8].mxu1 }
  0xf6   : > { %v463_v10 = vpop.f32.mrb[9].mxu0  ;;  %v604_v11 = vrot.slane %v1597_v9, 1  ;;  %v543_v13 = vpop.f32.mrb[9].mxu1  ;;  %v584_v15 = vrot.slane %v1577_v8, 1 }
  0xf7   : > { %v582_v12 = vrot.slane %v463_v10, 1  ;;  %v1578_v14 = vpop.f32.mrb[10].mxu0  ;;  %v602_v16 = vrot.slane %v543_v13, 1  ;;  %v1598_v19 = vpop.f32.mrb[10].mxu1 }
  0xf8   : > { %v585_v17 = vrot.slane %v1578_v14, 1  ;;  %v466_v18 = vpop.f32.mrb[11].mxu0  ;;  %v605_v21 = vrot.slane %v1598_v19, 1  ;;  %v546_v22 = vpop.f32.mrb[11].mxu1 }
  0xf9   : > { %v583_v20 = vrot.slane %v466_v18, 1  ;;  %v1922_v23 = vsel %vm612_vm2, %v581_v57, %v582_v12  ;;  %v603_v24 = vrot.slane %v546_v22, 1  ;;  %v1930_v28 = vsel %vm612_vm2, %v601_v61, %v602_v16 }
  0xfa   : > { %v1926_v26 = vsel %vm612_vm2, %v584_v15, %v585_v17  ;;  %v1942_v32 = vsel %vm612_vm2, %v604_v11, %v605_v21 }
  0xfb   : > { %v1934_v29 = vsel %vm612_vm2, %v582_v12, %v583_v20  ;;  %v1938_v30 = vsel %vm612_vm2, %v583_v20, %v584_v15  ;;  %v1946_v33 = vsel %vm612_vm2, %v602_v16, %v603_v24  ;;  %v1950_v34 = vsel %vm612_vm2, %v603_v24, %v604_v11 }
  0xfd   : > { %v1581_v36 = vpop.f32.mrb[12].mxu0  ;;  %v1601_v38 = vpop.f32.mrb[12].mxu1 }
  0xfe   : > { %v479_v39 = vpop.f32.mrb[13].mxu0  ;;  %v608_v40 = vrot.slane %v1601_v38, 1  ;;  %v559_v48 = vpop.f32.mrb[13].mxu1  ;;  %v588_v50 = vrot.slane %v1581_v36, 1 }
  0xff   : > { %v586_v41 = vrot.slane %v479_v39, 1  ;;  %v1582_v49 = vpop.f32.mrb[14].mxu0  ;;  %v606_v51 = vrot.slane %v559_v48, 1  ;;  %v1602_v53 = vpop.f32.mrb[14].mxu1 }
 0x100   : > { %v589_v52 = vrot.slane %v1582_v49, 1  ;;  %v482_v54 = vpop.f32.mrb[15].mxu0  ;;  %v609_v55 = vrot.slane %v1602_v53, 1  ;;  %v562_v57 = vpop.f32.mrb[15].mxu1 }
 0x101   : > { %v587_v56 = vrot.slane %v482_v54, 1  ;;  %v1954_v58 = vsel %vm612_vm2, %v585_v17, %v586_v41  ;;  %v607_v59 = vrot.slane %v562_v57, 1  ;;  %v1962_v61 = vsel %vm612_vm2, %v605_v21, %v606_v51 }
 0x102   : > { %v1958_v60 = vsel %vm612_vm2, %v588_v50, %v589_v52  ;;  %v1974_v8 = vsel %vm612_vm2, %v608_v40, %v609_v55  ;;  %v1980_v9 = vsel %vm612_vm2, %v609_v55, %v574_v37 }
 0x103   : > { %v1966_v62 = vsel %vm612_vm2, %v586_v41, %v587_v56  ;;  %v1970_v0 = vsel %vm612_vm2, %v587_v56, %v588_v50  ;;  %v1984_v10 = vsel %vm612_vm2, %v606_v51, %v607_v59  ;;  %v1988_v11 = vsel %vm612_vm2, %v607_v59, %v608_v40 }
 0x105   : > { %v1585_v12 = vpop.f32.mrb[16].mxu0  ;;  %v1607_v13 = vpop.f32.mrb[16].mxu1 }
 0x106   : > { %v495_v14 = vpop.f32.mrb[17].mxu0  ;;  %v700_v15 = vadd.f32 %v1607_v13, %v1862_v42  ;;  %v691_v17 = vpop.f32.mrb[17].mxu1  ;;  %v592_v18 = vrot.slane %v1585_v12, 1  ;;  %v2034_v12 = vld [vmem:[%s2410_s2] ss:$0 sm:$0xff] }
 0x107   : > { %v590_v16 = vrot.slane %v495_v14, 1  ;;  %v1586_v27 = vpop.f32.mrb[18].mxu0  ;;  %v692_v37 = vadd.f32 %v691_v17, %v1868_v43  ;;  %v1608_v20 = vpop.f32.mrb[18].mxu1 }
 0x108   : > { %v593_v19 = vrot.slane %v1586_v27, 1  ;;  %v498_v21 = vpop.f32.mrb[19].mxu0  ;;  %v1993_v22 = vadd.f32 %v1608_v20, %v1890_v63  ;;  %v694_v36 = vpop.f32.mrb[19].mxu1 }
 0x109   : > { %v591_v24 = vrot.slane %v498_v21, 1  ;;  %v1997_v38 = vsel %vm612_vm2, %v589_v52, %v590_v16  ;;  %v695_v42 = vadd.f32 %v694_v36, %v1872_v44 }
 0x10a   : > { %v2002_v39 = vsel %vm612_vm2, %v592_v18, %v593_v19  ;;  %v2008_v43 = vsel %vm612_vm2, %v593_v19, %v594_v35 }
 0x10b   : > { %v2012_v63 = vsel %vm612_vm2, %v590_v16, %v591_v24  ;;  %v2016_v40 = vsel %vm612_vm2, %v591_v24, %v592_v18  ;;  %v2046_v16 = vld [vmem:[%s2411_s3] ss:$0 sm:$0xff] }
 0x10d   : > { %v1645_v41 = vpop.f32.mrb[20].mxu0  ;;  %v1611_v44 = vpop.f32.mrb[20].mxu1 }
 0x10e   : > { %v2018_v48 = vpop.f32.mrb[21].mxu0  ;;  %v716_v49 = vadd.f32 %v1611_v44, %v1894_v1  ;;  %v707_v50 = vpop.f32.mrb[21].mxu1  ;;  %v1024_v35 = vrot.slane %v1645_v41, 2 }
 0x10f   : > { %v1646_v31 = vpop.f32.mrb[22].mxu0  ;;  %v2023_v51 = vadd.f32 %v707_v50, %v1902_v3  ;;  %v1612_v52 = vpop.f32.mrb[22].mxu1  ;;  %v1022_v55 = vrot.slane %v2018_v48, 2 }
 0x110   : > { %v1025_v53 = vrot.slane %v1646_v31, 2  ;;  %v882_v54 = vpop.f32.mrb[23].mxu0  ;;  %v2027_v56 = vadd.f32 %v1612_v52, %v1922_v23  ;;  %v710_v57 = vpop.f32.mrb[23].mxu1 }
 0x111   : > { %v1023_v59 = vrot.slane %v882_v54, 2  ;;  %v711_v3 = vadd.f32 %v710_v57, %v1906_v4 }
 0x112   : > { %v1091_v1 = vsel %vm1058_vm3, %v1024_v35, %v1025_v53 }
 0x113   : > { %v1097_v13 = vadd.f32 %v1091_v1, %v700_v15  ;;  %v1092_v14 = vsel %vm1058_vm3, %v1023_v59, %v1024_v35  ;;  %v1093_v23 = vsel %vm1058_vm3, %v1022_v55, %v1023_v59 }
 0x114   : > { %v1095_v17 = vadd.f32 %v1093_v23, %v692_v37  ;;  %v1096_v27 = vadd.f32 %v1092_v14, %v695_v42 }
 0x115   : > { %v1140_v18 = vmul.f32 %v2034_v12, %v1097_v13  ;;  %v1649_v19 = vpop.f32.mrb[24].mxu0  ;;  %v1615_v20 = vpop.f32.mrb[24].mxu1 }
 0x116   : > { %v1138_v4 = vmul.f32 %v2034_v12, %v1095_v17  ;;  %v1139_v15 = vmul.f32 %v2034_v12, %v1096_v27  ;;  %v895_v21 = vpop.f32.mrb[25].mxu0  ;;  %v2054_v36 = vadd.f32 %v1615_v20, %v1926_v26  ;;  %v1028_v41 = vrot.slane %v1649_v19, 2  ;;  %v723_v44 = vpop.f32.mrb[25].mxu1 }
 0x117   : > { %v1183_v24 = vadd.f32 %v2046_v16, %v1140_v18  ;;  %v1026_v37 = vrot.slane %v895_v21, 2  ;;  %v1650_v42 = vpop.f32.mrb[26].mxu0  ;;  %v2059_v35 = vadd.f32 %v723_v44, %v1934_v29  ;;  %v1616_v52 = vpop.f32.mrb[26].mxu1 }
 0x118   : > { %v1181_v50 = vadd.f32 %v2046_v16, %v1138_v4  ;;  %v1182_v31 = vadd.f32 %v2046_v16, %v1139_v15  ;;  %v1029_v54 = vrot.slane %v1650_v42, 2  ;;  %v898_v57 = vpop.f32.mrb[27].mxu0  ;;  %v2069_v1 = vadd.f32 %v1616_v52, %v1954_v58  ;;  %v726_v29 = vpop.f32.mrb[27].mxu1 }
 0x119   : > { %vm1219_vm5 = vcmp.ge.f32.partialorder %v1183_v24, 0.0  ;;  %v1255_v26 = vmul.f32 0.1, %v1183_v24  ;;  %v1090_v59 = vsel %vm1058_vm3, %v1025_v53, %v1026_v37  ;;  %v727_v18 = vadd.f32 %v726_v29, %v1938_v30 }
 0x11a   : > { %vm1217_vm6 = vcmp.ge.f32.partialorder %v1181_v50, 0.0  ;;  %vm1218_vm7 = vcmp.ge.f32.partialorder %v1182_v31, 0.0  ;;  %v1253_v13 = vmul.f32 0.1, %v1181_v50  ;;  %v1254_v14 = vmul.f32 0.1, %v1182_v31 }
 0x11b   : > { %v1291_v23 = vsel %vm1219_vm5, %v1183_v24, %v1255_v26  ;;  %v1098_v17 = vadd.f32 %v1090_v59, %v1993_v22  ;;  %v1087_v27 = vsel %vm1058_vm3, %v1028_v41, %v1029_v54  ;;  %v1027_v4 = vrot.slane %v898_v57, 2 }
 0x11c   : > { %1328 = vst.msk [vmem:[%s2064_s9 + $0x10] sm:$0xff] %vm1325_vm4, %v1291_v23  ;;  %v1289_v53 = vsel %vm1217_vm6, %v1181_v50, %v1253_v13  ;;  %v1290_v19 = vsel %vm1218_vm7, %v1182_v31, %v1254_v14  ;;  %v1101_v58 = vadd.f32 %v1087_v27, %v716_v49 }
 0x11d   : > { %1326 = vst.msk [vmem:[%s2064_s9] sm:$0xff] %vm1325_vm4, %v1289_v53  ;;  %1327 = vst.msk [vmem:[%s2064_s9 + $0x8] sm:$0xff] %vm1325_vm4, %v1290_v19  ;;  %v1141_v15 = vmul.f32 %v2034_v12, %v1098_v17  ;;  %v1653_v20 = vpop.f32.mrb[28].mxu0  ;;  %v1088_v21 = vsel %vm1058_vm3, %v1027_v4, %v1028_v41  ;;  %v1089_v30 = vsel %vm1058_vm3, %v1026_v37, %v1027_v4  ;;  %v1619_v24 = vpop.f32.mrb[28].mxu1 }
 0x11e   : > { %v1144_v22 = vmul.f32 %v2034_v12, %v1101_v58  ;;  %v1032_v44 = vrot.slane %v1653_v20, 2  ;;  %v911_v42 = vpop.f32.mrb[29].mxu0  ;;  %v1099_v50 = vadd.f32 %v1089_v30, %v2023_v51  ;;  %v1100_v31 = vadd.f32 %v1088_v21, %v711_v3  ;;  %v739_v57 = vpop.f32.mrb[29].mxu1 }
 0x11f   : > { %v1184_v49 = vadd.f32 %v2046_v16, %v1141_v15  ;;  %v2090_v52 = vadd.f32 %v1619_v24, %v1958_v60  ;;  %v2092_v26 = vpop.f32.mrb[30].mxu0  ;;  %v2096_v41 = vadd.f32 %v739_v57, %v1966_v62  ;;  %v1030_v37 = vrot.slane %v911_v42, 2  ;;  %v1620_v29 = vpop.f32.mrb[30].mxu1 }
 0x120   : > { %v1187_v59 = vadd.f32 %v2046_v16, %v1144_v22  ;;  %v1033_v13 = vrot.slane %v2092_v26, 2  ;;  %v914_v14 = vpop.f32.mrb[31].mxu0  ;;  %v1142_v3 = vmul.f32 %v2034_v12, %v1099_v50  ;;  %v1143_v60 = vmul.f32 %v2034_v12, %v1100_v31  ;;  %v742_v23 = vpop.f32.mrb[31].mxu1 }
 0x121   : > { %vm1220_vm8 = vcmp.ge.f32.partialorder %v1184_v49, 0.0  ;;  %v1256_v51 = vmul.f32 0.1, %v1184_v49  ;;  %v1086_v62 = vsel %vm1058_vm3, %v1029_v54, %v1030_v37  ;;  %v2104_v27 = vadd.f32 %v1620_v29, %v1997_v38 }
 0x122   : > { %vm1223_vm9 = vcmp.ge.f32.partialorder %v1187_v59, 0.0  ;;  %v1259_v17 = vmul.f32 0.1, %v1187_v59  ;;  %v1185_v19 = vadd.f32 %v2046_v16, %v1142_v3  ;;  %v1186_v58 = vadd.f32 %v2046_v16, %v1143_v60 }
 0x123   : > { %v1292_v53 = vsel %vm1220_vm8, %v1184_v49, %v1256_v51  ;;  %v1102_v4 = vadd.f32 %v1086_v62, %v2027_v56  ;;  %v1083_v20 = vsel %vm1058_vm3, %v1032_v44, %v1033_v13  ;;  %v2114_v22 = vadd.f32 %v742_v23, %v1970_v0 }
 0x124   : > { %1329 = vst.msk [vmem:[%s2064_s9 + $0x18] sm:$0xff] %vm1325_vm4, %v1292_v53  ;;  %v1295_v15 = vsel %vm1223_vm9, %v1187_v59, %v1259_v17  ;;  %v1031_v54 = vrot.slane %v914_v14, 2  ;;  %vm1221_vm10 = vcmp.ge.f32.partialorder %v1185_v19, 0.0  ;;  %vm1222_vm11 = vcmp.ge.f32.partialorder %v1186_v58, 0.0 }
 0x125   : > { %1332 = vst.msk [vmem:[%s2064_s9 + $0x30] sm:$0xff] %vm1325_vm4, %v1295_v15  ;;  %v1257_v38 = vmul.f32 0.1, %v1185_v19  ;;  %v1258_v21 = vmul.f32 0.1, %v1186_v58  ;;  %v1145_v56 = vmul.f32 %v2034_v12, %v1102_v4  ;;  %v1105_v30 = vadd.f32 %v1083_v20, %v2054_v36  ;;  %v1623_v42 = vpop.f32.mrb[32].mxu1 }
 0x126   : > { %v1084_v24 = vsel %vm1058_vm3, %v1031_v54, %v1032_v44  ;;  %v1085_v0 = vsel %vm1058_vm3, %v1030_v37, %v1031_v54  ;;  %v1657_v49 = vpop.f32.mrb[32].mxu0  ;;  %v755_v59 = vpop.f32.mrb[33].mxu1  ;;  %v2132_v14 = vadd.f32 %v1623_v42, %v2002_v39 }
 0x127   : > { %v1293_v50 = vsel %vm1221_vm10, %v1185_v19, %v1257_v38  ;;  %v1294_v31 = vsel %vm1222_vm11, %v1186_v58, %v1258_v21  ;;  %v1103_v57 = vadd.f32 %v1085_v0, %v2059_v35  ;;  %v1104_v26 = vadd.f32 %v1084_v24, %v727_v18  ;;  %v927_v29 = vpop.f32.mrb[33].mxu0  ;;  %v1624_v51 = vpop.f32.mrb[34].mxu1 }
 0x128   : > { %1330 = vst.msk [vmem:[%s2064_s9 + $0x20] sm:$0xff] %vm1325_vm4, %v1293_v50  ;;  %1331 = vst.msk [vmem:[%s2064_s9 + $0x28] sm:$0xff] %vm1325_vm4, %v1294_v31  ;;  %v1188_v36 = vadd.f32 %v2046_v16, %v1145_v56  ;;  %v1148_v44 = vmul.f32 %v2034_v12, %v1105_v30  ;;  %v1036_v37 = vrot.slane %v1657_v49, 2  ;;  %v1658_v3 = vpop.f32.mrb[34].mxu0  ;;  %v2137_v18 = vadd.f32 %v755_v59, %v2012_v63  ;;  %v758_v17 = vpop.f32.mrb[35].mxu1 }
 0x129   : > { %v1146_v60 = vmul.f32 %v2034_v12, %v1103_v57  ;;  %v1147_v35 = vmul.f32 %v2034_v12, %v1104_v26  ;;  %v1034_v23 = vrot.slane %v927_v29, 2  ;;  %v930_v62 = vpop.f32.mrb[35].mxu0  ;;  %v2141_v39 = vadd.f32 %v1624_v51, %v2008_v43 }
 0x12a   : > { %vm1224_vm12 = vcmp.ge.f32.partialorder %v1188_v36, 0.0  ;;  %v1260_v53 = vmul.f32 0.1, %v1188_v36  ;;  %v1191_v19 = vadd.f32 %v2046_v16, %v1148_v44  ;;  %v1037_v63 = vrot.slane %v1658_v3, 2 }
 0x12b   : > { %v1189_v58 = vadd.f32 %v2046_v16, %v1146_v60  ;;  %v1190_v4 = vadd.f32 %v2046_v16, %v1147_v35  ;;  %v1082_v15 = vsel %vm1058_vm3, %v1033_v13, %v1034_v23  ;;  %v2154_v24 = vadd.f32 %v758_v17, %v2016_v40 }
 0x12c   : > { %v1296_v20 = vsel %vm1224_vm12, %v1188_v36, %v1260_v53  ;;  %vm1227_vm13 = vcmp.ge.f32.partialorder %v1191_v19, 0.0  ;;  %v1263_v54 = vmul.f32 0.1, %v1191_v19  ;;  %v1106_v38 = vadd.f32 %v1082_v15, %v2069_v1 }
 0x12d   : > { %1333 = vst.msk [vmem:[%s2064_s9 + $0x38] sm:$0xff] %vm1325_vm4, %v1296_v20  ;;  %vm1225_vm14 = vcmp.ge.f32.partialorder %v1189_v58, 0.0  ;;  %vm1226_vm15 = vcmp.ge.f32.partialorder %v1190_v4, 0.0  ;;  %v1261_v43 = vmul.f32 0.1, %v1189_v58  ;;  %v1079_v13 = vsel %vm1058_vm3, %v1036_v37, %v1037_v63  ;;  %v1627_v0 = vpop.f32.mrb[36].mxu1 }
 0x12e   : > { %v1262_v21 = vmul.f32 0.1, %v1190_v4  ;;  %v1299_v56 = vsel %vm1227_vm13, %v1191_v19, %v1263_v54  ;;  %v1149_v30 = vmul.f32 %v2034_v12, %v1106_v38  ;;  %v1661_v42 = vpop.f32.mrb[36].mxu0  ;;  %v1109_v50 = vadd.f32 %v1079_v13, %v2090_v52  ;;  %v771_v57 = vpop.f32.mrb[37].mxu1 }
 0x12f   : > { %1336 = vst.msk [vmem:[%s2064_s9 + $0x50] sm:$0xff] %vm1325_vm4, %v1299_v56  ;;  %v1297_v1 = vsel %vm1225_vm14, %v1189_v58, %v1261_v43  ;;  %v1035_v31 = vrot.slane %v930_v62, 2  ;;  %v943_v26 = vpop.f32.mrb[37].mxu0  ;;  %v2165_v40 = vadd.f32 %v1627_v0, %v1876_v45  ;;  %v1040_v29 = vrot.slane %v1661_v42, 2  ;;  %v1628_v44 = vpop.f32.mrb[38].mxu1 }
 0x130   : > { %v1298_v49 = vsel %vm1226_vm15, %v1190_v4, %v1262_v21  ;;  %1334 = vst.msk [vmem:[%s2064_s9 + $0x40] sm:$0xff] %vm1325_vm4, %v1297_v1  ;;  %v1192_v59 = vadd.f32 %v2046_v16, %v1149_v30  ;;  %v2168_v36 = vadd.f32 %v771_v57, %v1882_v46  ;;  %v2170_v51 = vpop.f32.mrb[38].mxu0  ;;  %v1152_v52 = vmul.f32 %v2034_v12, %v1109_v50  ;;  %v774_v17 = vpop.f32.mrb[39].mxu1 }
 0x131   : > { %1335 = vst.msk [vmem:[%s2064_s9 + $0x48] sm:$0xff] %vm1325_vm4, %v1298_v49  ;;  %v1080_v3 = vsel %vm1058_vm3, %v1035_v31, %v1036_v37  ;;  %v1081_v60 = vsel %vm1058_vm3, %v1034_v23, %v1035_v31  ;;  %v1038_v35 = vrot.slane %v943_v26, 2  ;;  %v946_v45 = vpop.f32.mrb[39].mxu0  ;;  %v2183_v37 = vadd.f32 %v1628_v44, %v1898_v2 }
 0x132   : > { %vm1228_vm0 = vcmp.ge.f32.partialorder %v1192_v59, 0.0  ;;  %v1264_v62 = vmul.f32 0.1, %v1192_v59  ;;  %v1107_v46 = vadd.f32 %v1081_v60, %v2096_v41  ;;  %v1108_v53 = vadd.f32 %v1080_v3, %v2114_v22 }
 0x133   : > { %v1195_v19 = vadd.f32 %v2046_v16, %v1152_v52  ;;  %v1078_v58 = vsel %vm1058_vm3, %v1037_v63, %v1038_v35  ;;  %v1041_v23 = vrot.slane %v2170_v51, 2  ;;  %v2194_v2 = vadd.f32 %v774_v17, %v1886_v47 }
 0x134   : > { %v1300_v4 = vsel %vm1228_vm0, %v1192_v59, %v1264_v62  ;;  %v1150_v15 = vmul.f32 %v2034_v12, %v1107_v46  ;;  %v1151_v20 = vmul.f32 %v2034_v12, %v1108_v53  ;;  %v1110_v54 = vadd.f32 %v1078_v58, %v2104_v27 }
 0x135   : > { %1337 = vst.msk [vmem:[%s2064_s9 + $0x58] sm:$0xff] %vm1325_vm4, %v1300_v4  ;;  %vm1231_vm1 = vcmp.ge.f32.partialorder %v1195_v19, 0.0  ;;  %v1267_v41 = vmul.f32 0.1, %v1195_v19  ;;  %v1075_v22 = vsel %vm1058_vm3, %v1040_v29, %v1041_v23  ;;  %v2196_v63 = vpop.f32.mrb[40].mxu0  ;;  %v1631_v56 = vpop.f32.mrb[40].mxu1 }
 0x136   : > { %v1193_v38 = vadd.f32 %v2046_v16, %v1150_v15  ;;  %v1194_v43 = vadd.f32 %v2046_v16, %v1151_v20  ;;  %v1153_v21 = vmul.f32 %v2034_v12, %v1110_v54  ;;  %v1113_v27 = vadd.f32 %v1075_v22, %v2132_v14  ;;  %v959_v30 = vpop.f32.mrb[41].mxu0  ;;  %v787_v1 = vpop.f32.mrb[41].mxu1 }
 0x137   : > { %v1303_v13 = vsel %vm1231_vm1, %v1195_v19, %v1267_v41  ;;  %v1039_v0 = vrot.slane %v946_v45, 2  ;;  %v2203_v42 = vadd.f32 %v1631_v56, %v1910_v5  ;;  %v1044_v47 = vrot.slane %v2196_v63, 2  ;;  %v2206_v49 = vpop.f32.mrb[42].mxu0  ;;  %v1632_v59 = vpop.f32.mrb[42].mxu1 }
 0x138   : > { %1340 = vst.msk [vmem:[%s2064_s9 + $0x70] sm:$0xff] %vm1325_vm4, %v1303_v13  ;;  %vm1229_vm2 = vcmp.ge.f32.partialorder %v1193_v38, 0.0  ;;  %vm1230_vm5 = vcmp.ge.f32.partialorder %v1194_v43, 0.0  ;;  %v1265_v50 = vmul.f32 0.1, %v1193_v38  ;;  %v1196_v31 = vadd.f32 %v2046_v16, %v1153_v21  ;;  %v962_v44 = vpop.f32.mrb[43].mxu0 }
 0x139   : > { %v1266_v14 = vmul.f32 0.1, %v1194_v43  ;;  %v1156_v57 = vmul.f32 %v2034_v12, %v1113_v27  ;;  %v1076_v5 = vsel %vm1058_vm3, %v1039_v0, %v1040_v29  ;;  %v1077_v26 = vsel %vm1058_vm3, %v1038_v35, %v1039_v0  ;;  %v790_v17 = vpop.f32.mrb[43].mxu1 }
 0x13a   : > { %v1301_v51 = vsel %vm1229_vm2, %v1193_v38, %v1265_v50  ;;  %v1111_v3 = vadd.f32 %v1077_v26, %v2137_v18  ;;  %v1112_v60 = vadd.f32 %v1076_v5, %v2154_v24  ;;  %vm1232_vm6 = vcmp.ge.f32.partialorder %v1196_v31, 0.0 }
 0x13b   : > { %v1302_v52 = vsel %vm1230_vm5, %v1194_v43, %v1266_v14  ;;  %1338 = vst.msk [vmem:[%s2064_s9 + $0x60] sm:$0xff] %vm1325_vm4, %v1301_v51  ;;  %v1268_v45 = vmul.f32 0.1, %v1196_v31  ;;  %v1199_v29 = vadd.f32 %v2046_v16, %v1156_v57  ;;  %v2224_v35 = vadd.f32 %v787_v1, %v1914_v6 }
 0x13c   : > { %1339 = vst.msk [vmem:[%s2064_s9 + $0x68] sm:$0xff] %vm1325_vm4, %v1302_v52  ;;  %v1154_v62 = vmul.f32 %v2034_v12, %v1111_v3  ;;  %v1155_v46 = vmul.f32 %v2034_v12, %v1112_v60  ;;  %v1042_v18 = vrot.slane %v959_v30, 2  ;;  %v2229_v24 = vadd.f32 %v1632_v59, %v1930_v28 }
 0x13d   : > { %v1304_v53 = vsel %vm1232_vm6, %v1196_v31, %v1268_v45  ;;  %vm1235_vm7 = vcmp.ge.f32.partialorder %v1199_v29, 0.0  ;;  %v1271_v19 = vmul.f32 0.1, %v1199_v29  ;;  %v1045_v58 = vrot.slane %v2206_v49, 2  ;;  %v2232_v4 = vpop.f32.mrb[44].mxu0  ;;  %v1635_v54 = vpop.f32.mrb[44].mxu1 }
 0x13e   : > { %1341 = vst.msk [vmem:[%s2064_s9 + $0x78] sm:$0xff] %vm1325_vm4, %v1304_v53  ;;  %v1197_v6 = vadd.f32 %v2046_v16, %v1154_v62  ;;  %v1198_v15 = vadd.f32 %v2046_v16, %v1155_v46  ;;  %v1074_v20 = vsel %vm1058_vm3, %v1041_v23, %v1042_v18  ;;  %v2241_v28 = vadd.f32 %v790_v17, %v1918_v7  ;;  %v2243_v41 = vpop.f32.mrb[45].mxu0  ;;  %v803_v21 = vpop.f32.mrb[45].mxu1 }
 0x13f   : > { %v1307_v22 = vsel %vm1235_vm7, %v1199_v29, %v1271_v19  ;;  %v1114_v63 = vadd.f32 %v1074_v20, %v2141_v39  ;;  %v1071_v38 = vsel %vm1058_vm3, %v1044_v47, %v1045_v58  ;;  %v1043_v43 = vrot.slane %v962_v44, 2  ;;  %v2248_v27 = vpop.f32.mrb[46].mxu0  ;;  %v1636_v0 = vpop.f32.mrb[46].mxu1 }
 0x140   : > { %1344 = vst.msk [vmem:[%s2064_s9 + $0x90] sm:$0xff] %vm1325_vm4, %v1307_v22  ;;  %vm1233_vm8 = vcmp.ge.f32.partialorder %v1197_v6, 0.0  ;;  %vm1234_vm9 = vcmp.ge.f32.partialorder %v1198_v15, 0.0  ;;  %v1269_v7 = vmul.f32 0.1, %v1197_v6  ;;  %v1117_v30 = vadd.f32 %v1071_v38, %v2165_v40  ;;  %v978_v1 = vpop.f32.mrb[47].mxu0 }
 0x141   : > { %v1270_v23 = vmul.f32 0.1, %v1198_v15  ;;  %v1157_v56 = vmul.f32 %v2034_v12, %v1114_v63  ;;  %v1072_v39 = vsel %vm1058_vm3, %v1043_v43, %v1044_v47  ;;  %v1073_v13 = vsel %vm1058_vm3, %v1042_v18, %v1043_v43  ;;  %v806_v57 = vpop.f32.mrb[47].mxu1 }
 0x142   : > { %v1305_v49 = vsel %vm1233_vm8, %v1197_v6, %v1269_v7  ;;  %v1115_v14 = vadd.f32 %v1073_v13, %v2168_v36  ;;  %v1116_v31 = vadd.f32 %v1072_v39, %v2194_v2  ;;  %v1160_v47 = vmul.f32 %v2034_v12, %v1117_v30 }
 0x143   : > { %v1306_v50 = vsel %vm1234_vm9, %v1198_v15, %v1270_v23  ;;  %1342 = vst.msk [vmem:[%s2064_s9 + $0x80] sm:$0xff] %vm1325_vm4, %v1305_v49  ;;  %v1200_v40 = vadd.f32 %v2046_v16, %v1157_v56  ;;  %v2267_v5 = vadd.f32 %v1635_v54, %v1942_v32  ;;  %v1048_v26 = vrot.slane %v2232_v4, 2 }
 0x144   : > { %1343 = vst.msk [vmem:[%s2064_s9 + $0x88] sm:$0xff] %vm1325_vm4, %v1306_v50  ;;  %v1158_v59 = vmul.f32 %v2034_v12, %v1115_v14  ;;  %v1159_v36 = vmul.f32 %v2034_v12, %v1116_v31  ;;  %v2273_v2 = vadd.f32 %v803_v21, %v1946_v33  ;;  %v1046_v44 = vrot.slane %v2243_v41, 2 }
 0x145   : > { %vm1236_vm10 = vcmp.ge.f32.partialorder %v1200_v40, 0.0  ;;  %v1272_v51 = vmul.f32 0.1, %v1200_v40  ;;  %v1203_v52 = vadd.f32 %v2046_v16, %v1160_v47  ;;  %v2278_v3 = vadd.f32 %v1636_v0, %v1962_v61  ;;  %v2280_v32 = vpop.f32.mrb[48].mxu0  ;;  %v1639_v29 = vpop.f32.mrb[48].mxu1 }
 0x146   : > { %v1201_v60 = vadd.f32 %v2046_v16, %v1158_v59  ;;  %v1202_v17 = vadd.f32 %v2046_v16, %v1159_v36  ;;  %v1070_v33 = vsel %vm1058_vm3, %v1045_v58, %v1046_v44  ;;  %v1049_v45 = vrot.slane %v2248_v27, 2  ;;  %v2287_v62 = vpop.f32.mrb[49].mxu0  ;;  %v819_v53 = vpop.f32.mrb[49].mxu1 }
 0x147   : > { %v1308_v46 = vsel %vm1236_vm10, %v1200_v40, %v1272_v51  ;;  %vm1239_vm11 = vcmp.ge.f32.partialorder %v1203_v52, 0.0  ;;  %v1275_v18 = vmul.f32 0.1, %v1203_v52  ;;  %v1118_v61 = vadd.f32 %v1070_v33, %v2183_v37  ;;  %v2290_v19 = vpop.f32.mrb[50].mxu0  ;;  %v1640_v37 = vpop.f32.mrb[50].mxu1 }
 0x148   : > { %1345 = vst.msk [vmem:[%s2064_s9 + $0x98] sm:$0xff] %vm1325_vm4, %v1308_v46  ;;  %vm1237_vm12 = vcmp.ge.f32.partialorder %v1201_v60, 0.0  ;;  %vm1238_vm13 = vcmp.ge.f32.partialorder %v1202_v17, 0.0  ;;  %v1273_v58 = vmul.f32 0.1, %v1201_v60  ;;  %v1067_v20 = vsel %vm1058_vm3, %v1048_v26, %v1049_v45  ;;  %v994_v41 = vpop.f32.mrb[51].mxu0 }
 0x149   : > { %v1274_v4 = vmul.f32 0.1, %v1202_v17  ;;  %v1311_v6 = vsel %vm1239_vm11, %v1203_v52, %v1275_v18  ;;  %v1161_v15 = vmul.f32 %v2034_v12, %v1118_v61  ;;  %v807_v54 = vadd.f32 %v806_v57, %v1950_v34  ;;  %v822_v21 = vpop.f32.mrb[51].mxu1 }
 0x14a   : > { %1348 = vst.msk [vmem:[%s2064_s9 + $0xb0] sm:$0xff] %vm1325_vm4, %v1311_v6  ;;  %v1309_v22 = vsel %vm1237_vm12, %v1201_v60, %v1273_v58  ;;  %v1121_v38 = vadd.f32 %v1067_v20, %v2203_v42  ;;  %v1047_v43 = vrot.slane %v978_v1, 2  ;;  %v2307_v7 = vadd.f32 %v1639_v29, %v1974_v8 }
 0x14b   : > { %v1310_v63 = vsel %vm1238_vm13, %v1202_v17, %v1274_v4  ;;  %1346 = vst.msk [vmem:[%s2064_s9 + $0xa0] sm:$0xff] %vm1325_vm4, %v1309_v22  ;;  %v1204_v27 = vadd.f32 %v2046_v16, %v1161_v15  ;;  %v1052_v34 = vrot.slane %v2280_v32, 2  ;;  %v2311_v23 = vadd.f32 %v819_v53, %v1984_v10 }
 0x14c   : > { %1347 = vst.msk [vmem:[%s2064_s9 + $0xa8] sm:$0xff] %vm1325_vm4, %v1310_v63  ;;  %v1164_v56 = vmul.f32 %v2034_v12, %v1121_v38  ;;  %v1068_v42 = vsel %vm1058_vm3, %v1047_v43, %v1048_v26  ;;  %v1069_v30 = vsel %vm1058_vm3, %v1046_v44, %v1047_v43  ;;  %v1050_v39 = vrot.slane %v2287_v62, 2 }
 0x14d   : > { %vm1240_vm14 = vcmp.ge.f32.partialorder %v1204_v27, 0.0  ;;  %v1276_v13 = vmul.f32 0.1, %v1204_v27  ;;  %v1119_v8 = vadd.f32 %v1069_v30, %v2224_v35  ;;  %v1120_v0 = vadd.f32 %v1068_v42, %v2241_v28  ;;  %v1677_v1 = vpop.f32.mrb[52].mxu0 }
 0x14e   : > { %v1207_v10 = vadd.f32 %v2046_v16, %v1164_v56  ;;  %v1066_v49 = vsel %vm1058_vm3, %v1049_v45, %v1050_v39  ;;  %v2325_v50 = vadd.f32 %v1640_v37, %v1980_v9  ;;  %v1053_v14 = vrot.slane %v2290_v19, 2  ;;  %v2328_v31 = vpop.f32.mrb[53].mxu0 }
 0x14f   : > { %v1312_v57 = vsel %vm1240_vm14, %v1204_v27, %v1276_v13  ;;  %v1162_v40 = vmul.f32 %v2034_v12, %v1119_v8  ;;  %v1163_v35 = vmul.f32 %v2034_v12, %v1120_v0  ;;  %v1122_v28 = vadd.f32 %v1066_v49, %v2229_v24  ;;  %v1678_v47 = vpop.f32.mrb[54].mxu0 }
 0x150   : > { %1349 = vst.msk [vmem:[%s2064_s9 + $0xb8] sm:$0xff] %vm1325_vm4, %v1312_v57  ;;  %vm1243_vm15 = vcmp.ge.f32.partialorder %v1207_v10, 0.0  ;;  %v1279_v26 = vmul.f32 0.1, %v1207_v10  ;;  %v1063_v9 = vsel %vm1058_vm3, %v1052_v34, %v1053_v14  ;;  %v823_v59 = vadd.f32 %v822_v21, %v1988_v11  ;;  %v1010_v36 = vpop.f32.mrb[55].mxu0 }
 0x151   : > { %v1205_v44 = vadd.f32 %v2046_v16, %v1162_v40  ;;  %v1206_v51 = vadd.f32 %v2046_v16, %v1163_v35  ;;  %v1165_v52 = vmul.f32 %v2034_v12, %v1122_v28  ;;  %v1125_v24 = vadd.f32 %v1063_v9, %v2267_v5 }
 0x152   : > { %v1315_v32 = vsel %vm1243_vm15, %v1207_v10, %v1279_v26  ;;  %v1051_v60 = vrot.slane %v994_v41, 2  ;;  %v1056_v17 = vrot.slane %v1677_v1, 2  ;;  %v1054_v33 = vrot.slane %v2328_v31, 2 }
 0x153   : > { %1352 = vst.msk [vmem:[%s2064_s9 + $0xd0] sm:$0xff] %vm1325_vm4, %v1315_v32  ;;  %vm1241_vm0 = vcmp.ge.f32.partialorder %v1205_v44, 0.0  ;;  %vm1242_vm1 = vcmp.ge.f32.partialorder %v1206_v51, 0.0  ;;  %v1277_v11 = vmul.f32 0.1, %v1205_v44  ;;  %v1208_v29 = vadd.f32 %v2046_v16, %v1165_v52 }
 0x154   : > { %v1278_v45 = vmul.f32 0.1, %v1206_v51  ;;  %v1168_v62 = vmul.f32 %v2034_v12, %v1125_v24  ;;  %v1064_v5 = vsel %vm1058_vm3, %v1051_v60, %v1052_v34  ;;  %v1065_v46 = vsel %vm1058_vm3, %v1050_v39, %v1051_v60 }
 0x155   : > { %v1313_v18 = vsel %vm1241_vm0, %v1205_v44, %v1277_v11  ;;  %v1123_v53 = vadd.f32 %v1065_v46, %v2273_v2  ;;  %v1124_v19 = vadd.f32 %v1064_v5, %v807_v54  ;;  %vm1244_vm2 = vcmp.ge.f32.partialorder %v1208_v29, 0.0 }
 0x156   : > { %v1314_v61 = vsel %vm1242_vm1, %v1206_v51, %v1278_v45  ;;  %1350 = vst.msk [vmem:[%s2064_s9 + $0xc0] sm:$0xff] %vm1325_vm4, %v1313_v18  ;;  %v1280_v58 = vmul.f32 0.1, %v1208_v29  ;;  %v1211_v4 = vadd.f32 %v2046_v16, %v1168_v62  ;;  %v1062_v6 = vsel %vm1058_vm3, %v1053_v14, %v1054_v33 }
 0x157   : > { %1351 = vst.msk [vmem:[%s2064_s9 + $0xc8] sm:$0xff] %vm1325_vm4, %v1314_v61  ;;  %v1166_v15 = vmul.f32 %v2034_v12, %v1123_v53  ;;  %v1167_v20 = vmul.f32 %v2034_v12, %v1124_v19  ;;  %v1126_v2 = vadd.f32 %v1062_v6, %v2278_v3  ;;  %v1057_v37 = vrot.slane %v1678_v47, 2 }
 0x158   : > { %v1316_v54 = vsel %vm1244_vm2, %v1208_v29, %v1280_v58  ;;  %vm1247_vm5 = vcmp.ge.f32.partialorder %v1211_v4, 0.0  ;;  %v1283_v41 = vmul.f32 0.1, %v1211_v4  ;;  %v1055_v22 = vrot.slane %v1010_v36, 2 }
 0x159   : > { %1353 = vst.msk [vmem:[%s2064_s9 + $0xd8] sm:$0xff] %vm1325_vm4, %v1316_v54  ;;  %v1209_v63 = vadd.f32 %v2046_v16, %v1166_v15  ;;  %v1210_v38 = vadd.f32 %v2046_v16, %v1167_v20  ;;  %v1169_v43 = vmul.f32 %v2034_v12, %v1126_v2  ;;  %v1059_v21 = vsel %vm1058_vm3, %v1056_v17, %v1057_v37 }
 0x15a   : > { %v1319_v27 = vsel %vm1247_vm5, %v1211_v4, %v1283_v41  ;;  %v1094_v3 = vsel %vm1058_vm3, %v1057_v37, %v1022_v55  ;;  %v1129_v34 = vadd.f32 %v1059_v21, %v2307_v7  ;;  %v1060_v56 = vsel %vm1058_vm3, %v1055_v22, %v1056_v17 }
 0x15b   : > { %1356 = vst.msk [vmem:[%s2064_s9 + $0xf0] sm:$0xff] %vm1325_vm4, %v1319_v27  ;;  %vm1245_vm6 = vcmp.ge.f32.partialorder %v1209_v63, 0.0  ;;  %vm1246_vm7 = vcmp.ge.f32.partialorder %v1210_v38, 0.0  ;;  %v1281_v42 = vmul.f32 0.1, %v1209_v63  ;;  %v1212_v39 = vadd.f32 %v2046_v16, %v1169_v43 }
 0x15c   : > { %v1282_v30 = vmul.f32 0.1, %v1210_v38  ;;  %v1130_v48 = vadd.f32 %v1094_v3, %v2325_v50  ;;  %v1172_v13 = vmul.f32 %v2034_v12, %v1129_v34  ;;  %v1061_v55 = vsel %vm1058_vm3, %v1054_v33, %v1055_v22 }
 0x15d   : > { %v1317_v7 = vsel %vm1245_vm6, %v1209_v63, %v1281_v42  ;;  %v1127_v0 = vadd.f32 %v1061_v55, %v2311_v23  ;;  %v1128_v1 = vadd.f32 %v1060_v56, %v823_v59  ;;  %vm1248_vm8 = vcmp.ge.f32.partialorder %v1212_v39, 0.0 }
 0x15e   : > { %v1318_v8 = vsel %vm1246_vm7, %v1210_v38, %v1282_v30  ;;  %1354 = vst.msk [vmem:[%s2064_s9 + $0xe0] sm:$0xff] %vm1325_vm4, %v1317_v7  ;;  %v1284_v10 = vmul.f32 0.1, %v1212_v39  ;;  %v1173_v49 = vmul.f32 %v2034_v12, %v1130_v48  ;;  %v1215_v50 = vadd.f32 %v2046_v16, %v1172_v13 }
 0x15f   : > { %1355 = vst.msk [vmem:[%s2064_s9 + $0xe8] sm:$0xff] %vm1325_vm4, %v1318_v8  ;;  %v1170_v25 = vmul.f32 %v2034_v12, %v1127_v0  ;;  %v1171_v14 = vmul.f32 %v2034_v12, %v1128_v1 }
 0x160   : > { %v1320_v31 = vsel %vm1248_vm8, %v1212_v39, %v1284_v10  ;;  %v1216_v23 = vadd.f32 %v2046_v16, %v1173_v49  ;;  %vm1251_vm3 = vcmp.ge.f32.partialorder %v1215_v50, 0.0  ;;  %v1287_v57 = vmul.f32 0.1, %v1215_v50 }
 0x161   : > { %1357 = vst.msk [vmem:[%s2064_s9 + $0xf8] sm:$0xff] %vm1325_vm4, %v1320_v31  ;;  %v1213_v40 = vadd.f32 %v2046_v16, %v1170_v25  ;;  %v1214_v35 = vadd.f32 %v2046_v16, %v1171_v14 }
 0x162   : > { %vm1252_vm9 = vcmp.ge.f32.partialorder %v1216_v23, 0.0  ;;  %v1288_v28 = vmul.f32 0.1, %v1216_v23  ;;  %v1323_v47 = vsel %vm1251_vm3, %v1215_v50, %v1287_v57 }
 0x163   : > { %1360 = vst.msk [vmem:[%s2064_s9 + $0x110] sm:$0xff] %vm1325_vm4, %v1323_v47  ;;  %vm1249_vm10 = vcmp.ge.f32.partialorder %v1213_v40, 0.0  ;;  %vm1250_vm11 = vcmp.ge.f32.partialorder %v1214_v35, 0.0  ;;  %v1285_v12 = vmul.f32 0.1, %v1213_v40 }
 0x164   : > { %v1286_v26 = vmul.f32 0.1, %v1214_v35  ;;  %v1324_v9 = vsel %vm1252_vm9, %v1216_v23, %v1288_v28 }
 0x165   : > { %1361 = vst.msk [vmem:[%s2064_s9 + $0x118] sm:$0xff] %vm1325_vm4, %v1324_v9  ;;  %v1321_v59 = vsel %vm1249_vm10, %v1213_v40, %v1285_v12 }
 0x166   : > { %v1322_v36 = vsel %vm1250_vm11, %v1214_v35, %v1286_v26  ;;  %1358 = vst.msk [vmem:[%s2064_s9 + $0x100] sm:$0xff] %vm1325_vm4, %v1321_v59 }
 0x167   : > { %1359 = vst.msk [vmem:[%s2064_s9 + $0x108] sm:$0xff] %vm1325_vm4, %v1322_v36 }
 0x168 PF: > { %s14_s15 = sadd.s32 1, %s1720_s15  }
 0x169   : > { %p11_p4 = scmp.ge.s32.totalorder %s14_s15, 4  }
 0x16b   :  { %13 = sbr.rel (!%p11_p4) target bundleno = 1 (0x1), region = 68 }

// kernel: score_forward.4
= control target key start
LH: loop header
LB: loop body
LE: loop exit
PB: predicated region body
PF: predicated region fallthrough
CT: control target
= control target key end

     0   :  { %s2578_s9 = smov 0   ;;  %s4363_s0 = inlined_call_operand.vmem [shape: bf16[576,12], index: 0, kind: input, shape index: {}]   ;;  %s4364_s1 = inlined_call_operand.vmem [shape: bf16[3,12,128], index: 1, kind: input, shape index: {}]   ;;  %s4365_s2 = inlined_call_operand.vmem [shape: f32[16,128], index: 2, kind: output, shape index: {}]  }
   0x1 LB: > { %s2584_s10 = sadd.s32 4294967295, %s2560_s9   ;;  %p2119_p0 = scmp.ge.s32.totalorder %s2560_s9, 1  ;;  %s2560_s9 = sphi %s2578_s9, %s12_s9  }
   0x2   : > { %p113_p1 = scmp.lt.s32.totalorder %s2560_s9, 3 }
   0x4   : > { %p114_p2 = pnand %p2119_p0, %p113_p1 }
   0x6   : > { %117 = sbr.rel (%p114_p2) target bundleno = 426 (0x1aa), region = 28 }
   0xd   : > { %v2533_v0 = vld [vmem:[%s4364_s1 + $0x8] sm:$0x3f]   ;;  %vm336_vm0 = vcmask 1045504   ;;  %s134_s13 = smul.u32 36, %s2584_s10  ;;  %v2536_v2 = vld [vmem:[%s4364_s1 + $0x10] sm:$0x3f]   ;;  %v553_v24 = vlaneseq }
   0xe   : > { %2448 = vmatprep.subr.msk.bf16.mxu0 %vm336_vm0, %v2533_v0  ;;  %2449 = vmatprep.subr.msk.bf16.mxu1 %vm336_vm0, %v2533_v0  ;;  %v338_v1 = vsel %vm336_vm0, %v2533_v0, 0  ;;  %v2543_v3 = vld [vmem:[%s4364_s1] sm:$0x3f]   ;;  %vm281_vm1 = vcmask 97280   ;;  %v786_v7 = vsel %vm336_vm0, %v2536_v2, 0  ;;  %s1074_s22 = smul.u32 288, %s2584_s10 }
   0xf   : > { %2333 = vmatpush3.bf16.msra.mxu0 %v338_v1  ;;  %2447 = vmatpush3.bf16.msra.mxu1 %v338_v1  ;;  %p135_p3 = scmp.lt.s32.totalorder %s134_s13, 71  ;;  %v598_v9 = vsel %vm336_vm0, %v2543_v3, 0  ;;  %v2681_v25 = vshrl.u32 %v553_v24, 7  ;;  %p140_p4 = scmp.lt.s32.totalorder %s2584_s10, 1 }
  0x10   : > { %2451 = vmatprep.subr.msk.bf16.mxu0 %vm336_vm0, %v2536_v2  ;;  %2450 = vmatprep.subr.msk.bf16.mxu1 %vm336_vm0, %v2543_v3  ;;  %v2686_v27 = vstv %s1074_s22 }
  0x11   : > { %s4575_s13 = smov (!%p135_p3, %s134_s13), 71  ;;  %v1076_v26 = vadd.s32 16, %v2681_v25  ;;  %4378 = vst [vmem:[#allocation2_spill] sm:$0xff] %v2686_v27  ;;  %v1075_v28 = vadd.s32 8, %v2681_v25  ;;  %v2694_v30 = vadd.s32 %v2686_v27, %v2681_v25  ;;  %v1077_v38 = vadd.s32 24, %v2681_v25  ;;  %s4577_s10 = smov (!%p140_p4, %s2584_s10), 1 }
  0x12   : > { %s2120_s18 = sshll.u32 %s4575_s13, 2  ;;  %v1080_v41 = vadd.s32 48, %v2681_v25  ;;  %v1078_v48 = vadd.s32 32, %v2681_v25  ;;  %v1079_v57 = vadd.s32 40, %v2681_v25  ;;  %v1085_v24 = vadd.s32 88, %v2681_v25  ;;  %s2121_s23 = sshll.u32 %s4577_s10, 3 }
  0x13   : > { %s2606_s21 = scalar_lea.vmem %s4363_s0, %s2120_s18  ;;  %v2690_v29 = vadd.s32 %v2686_v27, %v1076_v26  ;;  %v2697_v31 = vadd.s32 %v2686_v27, %v1075_v28  ;;  %v1148_v33 = vsub.s32 0, %v2694_v30  ;;  %v2717_v46 = vadd.s32 %v2686_v27, %v1077_v38  ;;  %s143_s26 = scalar_lea.vmem %s4365_s2, %s2121_s23 }
  0x14   : > { %v2534_v4 = vld [vmem:[%s2606_s21] sm:$0xff]   ;;  %v2535_v5 = vld [vmem:[%s2606_s21 + $0x50] sm:$0xff]   ;;  %v2537_v6 = vld [vmem:[%s2606_s21 + $0x8] sm:$0xff]   ;;  %v2720_v47 = vadd.s32 %v2686_v27, %v1080_v41  ;;  %v2727_v52 = vadd.s32 %v2686_v27, %v1078_v48  ;;  %vm1147_vm3 = vcmp.lt.s32.totalorder %v2694_v30, 0  ;;  %v1084_v38 = vadd.s32 80, %v2681_v25 }
  0x15   : > { %2334 = vmatprep.mubr.msk.bf16.mxu0 %vm281_vm1, %v2534_v4  ;;  %2354 = vmatprep.mubr.msk.bf16.mxu1 %vm281_vm1, %v2535_v5  ;;  %v2538_v8 = vld [vmem:[%s2606_s21 + $0x58] sm:$0xff]   ;;  %v2539_v10 = vld [vmem:[%s2606_s21 + $0x10] sm:$0xff]   ;;  %v2540_v11 = vld [vmem:[%s2606_s21 + $0x60] sm:$0xff]   ;;  %v1170_v32 = vsub.s32 0, %v2690_v29  ;;  %v1159_v34 = vsub.s32 0, %v2697_v31  ;;  %v2201_v36 = vmin.u32 %v1148_v33, %v2694_v30  ;;  %v1181_v50 = vsub.s32 0, %v2717_v46 }
  0x16   : > { %2335 = vmatmul.mubr.msk.bf16.vlgmr.msra.gmra.mrb[0].mxu0 %vm281_vm1, %v2537_v6  ;;  %2355 = vmatmul.mubr.msk.bf16.vlgmr.msra.gmra.mrb[0].mxu1 %vm281_vm1, %v2538_v8  ;;  %v2541_v12 = vld [vmem:[%s2606_s21 + $0x18] sm:$0xff]   ;;  %v2542_v13 = vld [vmem:[%s2606_s21 + $0x68] sm:$0xff]   ;;  %v2544_v14 = vld [vmem:[%s2606_s21 + $0x20] sm:$0xff]   ;;  %v1214_v51 = vsub.s32 0, %v2720_v47  ;;  %v1192_v58 = vsub.s32 0, %v2727_v52  ;;  %vm1169_vm2 = vcmp.lt.s32.totalorder %v2690_v29, 0 }
  0x17   : > { %2409 = vmatpush3.bf16.msra.mxu0 %v786_v7  ;;  %2338 = vmatprep.mubr.msk.bf16.mxu0 %vm281_vm1, %v2539_v10  ;;  %v2545_v15 = vld [vmem:[%s2606_s21 + $0x70] sm:$0xff]   ;;  %v2546_v16 = vld [vmem:[%s2606_s21 + $0x28] sm:$0xff]   ;;  %v2547_v17 = vld [vmem:[%s2606_s21 + $0x78] sm:$0xff]   ;;  %v2203_v35 = vmin.u32 %v1170_v32, %v2690_v29  ;;  %v2202_v37 = vmin.u32 %v1159_v34, %v2697_v31  ;;  %v2710_v42 = vmul.u32.u64.low 3817748708, %v2201_v36  ;;  %v2711_v43 = vmul.u32.u64.high 3817748708, %v2201_v36, %v2710_v42 }
  0x18   : > { %2371 = vmatpush3.bf16.msra.mxu1 %v598_v9  ;;  %2358 = vmatprep.mubr.msk.bf16.mxu1 %vm281_vm1, %v2540_v11  ;;  %v2548_v18 = vld [vmem:[%s2606_s21 + $0x30] sm:$0xff]   ;;  %v2549_v19 = vld [vmem:[%s2606_s21 + $0x80] sm:$0xff]   ;;  %v2550_v20 = vld [vmem:[%s2606_s21 + $0x38] sm:$0xff]   ;;  %v2204_v56 = vmin.u32 %v1181_v50, %v2717_v46  ;;  %v2207_v61 = vmin.u32 %v1214_v51, %v2720_v47  ;;  %v2205_v1 = vmin.u32 %v1192_v58, %v2727_v52  ;;  %vm1158_vm4 = vcmp.lt.s32.totalorder %v2697_v31, 0 }
  0x19   : > { %v2551_v21 = vld [vmem:[%s2606_s21 + $0x88] sm:$0xff]   ;;  %v2552_v22 = vld [vmem:[%s2606_s21 + $0x40] sm:$0xff]   ;;  %v2706_v39 = vmul.u32.u64.low 3817748708, %v2203_v35  ;;  %v2707_v40 = vmul.u32.u64.high 3817748708, %v2203_v35, %v2706_v39  ;;  %v2713_v44 = vmul.u32.u64.low 3817748708, %v2202_v37  ;;  %v2714_v45 = vmul.u32.u64.high 3817748708, %v2202_v37, %v2713_v44 }
  0x1a   : > { %v2553_v23 = vld [vmem:[%s2606_s21 + $0x48] sm:$0xff]   ;;  %v1153_v53 = vshrl.u32 %v2711_v43, 4  ;;  %v2735_v63 = vmul.u32.u64.low 3817748708, %v2204_v56  ;;  %v2736_v0 = vmul.u32.u64.high 3817748708, %v2204_v56, %v2735_v63  ;;  %vm1180_vm13 = vcmp.lt.s32.totalorder %v2717_v46, 0 }
  0x1b   : > { %v1175_v49 = vshrl.u32 %v2707_v40, 4  ;;  %v1164_v54 = vshrl.u32 %v2714_v45, 4  ;;  %vm1213_vm0 = vcmp.lt.s32.totalorder %v2720_v47, 0 }
  0x1c   : > { %v1154_v59 = vmul.u32 18, %v1153_v53  ;;  %v2792_v53 = vadd.s32 %v2686_v27, %v1084_v38 }
  0x1d   : > { %v1176_v55 = vmul.u32 18, %v1175_v49  ;;  %v1165_v60 = vmul.u32 18, %v1164_v54 }
  0x1e   : > { %2339 = vmatmul.mubr.msk.bf16.gmra.mrb[4].mxu0 %vm281_vm1, %v2541_v12  ;;  %2359 = vmatmul.mubr.msk.bf16.gmra.mrb[4].mxu1 %vm281_vm1, %v2542_v13  ;;  %v1155_v2 = vsub.s32 %v2201_v36, %v1154_v59 }
  0x1f   : > { %2342 = vmatprep.mubr.msk.bf16.mxu0 %vm281_vm1, %v2544_v14  ;;  %2362 = vmatprep.mubr.msk.bf16.mxu1 %vm281_vm1, %v2545_v15  ;;  %v1177_v62 = vsub.s32 %v2203_v35, %v1176_v55  ;;  %v1166_v3 = vsub.s32 %v2202_v37, %v1165_v60 }
  0x26   : > { %2343 = vmatmul.mubr.msk.bf16.gmra.mrb[8].mxu0 %vm281_vm1, %v2546_v16  ;;  %2363 = vmatmul.mubr.msk.bf16.gmra.mrb[8].mxu1 %vm281_vm1, %v2547_v17 }
  0x27   : > { %2346 = vmatprep.mubr.msk.bf16.mxu0 %vm281_vm1, %v2548_v18  ;;  %2366 = vmatprep.mubr.msk.bf16.mxu1 %vm281_vm1, %v2549_v19 }
  0x2e   : > { %2347 = vmatmul.mubr.msk.bf16.gmra.mrb[12].mxu0 %vm281_vm1, %v2550_v20  ;;  %2367 = vmatmul.mubr.msk.bf16.gmra.mrb[12].mxu1 %vm281_vm1, %v2551_v21 }
  0x2f   : > { %2350 = vmatprep.mubr.msk.bf16.mxu0 %vm281_vm1, %v2552_v22  ;;  %2372 = vmatprep.mubr.msk.bf16.mxu1 %vm281_vm1, %v2534_v4 }
  0x36   : > { %2351 = vmatmul.mubr.msk.bf16.gmra.mrb[16].mxu0 %vm281_vm1, %v2553_v23  ;;  %2373 = vmatmul.mubr.msk.bf16.vlgmr.msra.gmra.mrb[16].mxu1 %vm281_vm1, %v2537_v6 }
  0x37   : > { %2410 = vmatprep.mubr.msk.bf16.mxu0 %vm281_vm1, %v2534_v4  ;;  %2376 = vmatprep.mubr.msk.bf16.mxu1 %vm281_vm1, %v2539_v10  ;;  %v2740_v4 = vadd.s32 %v2686_v27, %v1079_v57 }
  0x3e   : > { %2411 = vmatmul.mubr.msk.bf16.vlgmr.msra.gmra.mrb[20].mxu0 %vm281_vm1, %v2537_v6  ;;  %2377 = vmatmul.mubr.msk.bf16.gmra.mrb[20].mxu1 %vm281_vm1, %v2541_v12  ;;  %v2742_v6 = vmul.u32.u64.low 3817748708, %v2207_v61  ;;  %v2743_v7 = vmul.u32.u64.high 3817748708, %v2207_v61, %v2742_v6 }
  0x3f   : > { %2414 = vmatprep.mubr.msk.bf16.mxu0 %vm281_vm1, %v2539_v10  ;;  %2380 = vmatprep.mubr.msk.bf16.mxu1 %vm281_vm1, %v2544_v14  ;;  %v1156_v10 = vsub.s32 0, %v1155_v2 }
  0x46   : > { %2415 = vmatmul.mubr.msk.bf16.gmra.mrb[24].mxu0 %vm281_vm1, %v2541_v12  ;;  %2381 = vmatmul.mubr.msk.bf16.gmra.mrb[24].mxu1 %vm281_vm1, %v2546_v16  ;;  %v1167_v12 = vsub.s32 0, %v1166_v3 }
  0x47   : > { %2418 = vmatprep.mubr.msk.bf16.mxu0 %vm281_vm1, %v2544_v14  ;;  %2384 = vmatprep.mubr.msk.bf16.mxu1 %vm281_vm1, %v2548_v18 }
  0x4e   : > { %2419 = vmatmul.mubr.msk.bf16.gmra.mrb[28].mxu0 %vm281_vm1, %v2546_v16  ;;  %2385 = vmatmul.mubr.msk.bf16.gmra.mrb[28].mxu1 %vm281_vm1, %v2550_v20 }
  0x4f   : > { %2422 = vmatprep.mubr.msk.bf16.mxu0 %vm281_vm1, %v2548_v18  ;;  %2388 = vmatprep.mubr.msk.bf16.mxu1 %vm281_vm1, %v2552_v22  ;;  %v1168_v18 = vsel %vm1158_vm4, %v1167_v12, %v1166_v3 }
  0x50   : > { %vm1544_vm9 = vcmp.ne.s32.totalorder %v1168_v18, 0  ;;  %vm1580_vm11 = vcmp.lt.s32.totalorder %v1168_v18, 0  ;;  %v1652_v42 = vadd.s32 18, %v1168_v18 }
  0x51   : > { %vm2778_vm14 = vmand %vm1580_vm11, %vm1544_vm9 }
  0x52   : > { %v1688_v55 = vsel %vm2778_vm14, %v1652_v42, %v1168_v18 }
  0x53   : > { %vm2808_vm9 = vcmp.lt.s32.totalorder %v1688_v55, 16 }
  0x56   : > { %2423 = vmatmul.mubr.msk.bf16.gmra.mrb[32].mxu0 %vm281_vm1, %v2550_v20  ;;  %2389 = vmatmul.mubr.msk.bf16.gmra.mrb[32].mxu1 %vm281_vm1, %v2553_v23  ;;  %v1219_v20 = vshrl.u32 %v2743_v7, 4 }
  0x57   : > { %2426 = vmatprep.mubr.msk.bf16.mxu0 %vm281_vm1, %v2552_v22  ;;  %2392 = vmatprep.mubr.msk.bf16.mxu1 %vm281_vm1, %v2535_v5 }
  0x58   : > { %v1220_v26 = vmul.u32 18, %v1219_v20 }
  0x5a   : > { %v1221_v36 = vsub.s32 %v2207_v61, %v1220_v26  ;;  %v1258_v61 = vsub.s32 0, %v2792_v53 }
  0x5c   : > { %v1222_v44 = vsub.s32 0, %v1221_v36 }
  0x5e   : > { %2427 = vmatmul.mubr.msk.bf16.gmra.mrb[36].mxu0 %vm281_vm1, %v2553_v23  ;;  %2393 = vmatmul.mubr.msk.bf16.gmra.mrb[36].mxu1 %vm281_vm1, %v2538_v8  ;;  %v1223_v58 = vsel %vm1213_vm0, %v1222_v44, %v1221_v36  ;;  %vm1202_vm0 = vcmp.lt.s32.totalorder %v2740_v4, 0 }
  0x5f   : > { %2430 = vmatprep.mubr.msk.bf16.mxu0 %vm281_vm1, %v2535_v5  ;;  %2396 = vmatprep.mubr.msk.bf16.mxu1 %vm281_vm1, %v2540_v11  ;;  %v1178_v5 = vsub.s32 0, %v1177_v62  ;;  %vm1549_vm11 = vcmp.ne.s32.totalorder %v1223_v58, 0 }
  0x61   : > { %v1179_v14 = vsel %vm1169_vm2, %v1178_v5, %v1177_v62  ;;  %vm1759_vm2 = vcmp.lt.s32.totalorder %v2694_v30, 576 }
  0x62   : > { %vm1545_vm5 = vcmp.ne.s32.totalorder %v1179_v14, 0  ;;  %vm1581_vm6 = vcmp.lt.s32.totalorder %v1179_v14, 0 }
  0x63   : > { %vm2757_vm8 = vmand %vm1581_vm6, %vm1545_vm5 }
  0x66   : > { %2431 = vmatmul.mubr.msk.bf16.gmra.mrb[40].mxu0 %vm281_vm1, %v2538_v8  ;;  %2397 = vmatmul.mubr.msk.bf16.gmra.mrb[40].mxu1 %vm281_vm1, %v2542_v13  ;;  %v2746_v8 = vmul.u32.u64.low 3817748708, %v2205_v1  ;;  %v2747_v9 = vmul.u32.u64.high 3817748708, %v2205_v1, %v2746_v8 }
  0x67   : > { %2434 = vmatprep.mubr.msk.bf16.mxu0 %vm281_vm1, %v2540_v11  ;;  %2400 = vmatprep.mubr.msk.bf16.mxu1 %vm281_vm1, %v2545_v15  ;;  %v1186_v11 = vshrl.u32 %v2736_v0, 4  ;;  %v1082_v0 = vadd.s32 64, %v2681_v25  ;;  %v4368_v8 = vmov 0.0  }
  0x68   : > { %v1197_v23 = vshrl.u32 %v2747_v9, 4 }
  0x69   : > { %v1187_v16 = vmul.u32 18, %v1186_v11  ;;  %v2826_v7 = vadd.s32 %v2686_v27, %v1082_v0 }
  0x6a   : > { %v1198_v32 = vmul.u32 18, %v1197_v23 }
  0x6b   : > { %v1188_v22 = vsub.s32 %v2204_v56, %v1187_v16 }
  0x6c   : > { %v1199_v45 = vsub.s32 %v2205_v1, %v1198_v32  ;;  %v1083_v1 = vadd.s32 72, %v2681_v25 }
  0x6d   : > { %v1189_v41 = vsub.s32 0, %v1188_v22 }
  0x6e   : > { %2435 = vmatmul.mubr.msk.bf16.gmra.mrb[44].mxu0 %vm281_vm1, %v2542_v13  ;;  %2401 = vmatmul.mubr.msk.bf16.gmra.mrb[44].mxu1 %vm281_vm1, %v2547_v17  ;;  %v1203_v13 = vsub.s32 0, %v2740_v4  ;;  %v1200_v59 = vsub.s32 0, %v1199_v45 }
  0x6f   : > { %2438 = vmatprep.mubr.msk.bf16.mxu0 %vm281_vm1, %v2545_v15  ;;  %2404 = vmatprep.mubr.msk.bf16.mxu1 %vm281_vm1, %v2549_v19  ;;  %v1157_v15 = vsel %vm1147_vm3, %v1156_v10, %v1155_v2  ;;  %v1190_v54 = vsel %vm1180_vm13, %v1189_v41, %v1188_v22  ;;  %vm1760_vm3 = vcmp.lt.s32.totalorder %v2697_v31, 576  ;;  %v1657_v10 = vadd.s32 18, %v1223_v58 }
  0x70   : > { %vm1543_vm7 = vcmp.ne.s32.totalorder %v1157_v15, 0  ;;  %vm1579_vm10 = vcmp.lt.s32.totalorder %v1157_v15, 0  ;;  %v1651_v35 = vadd.s32 18, %v1157_v15  ;;  %vm1546_vm5 = vcmp.ne.s32.totalorder %v1190_v54, 0  ;;  %vm2835_vm14 = vmand %vm2808_vm9, %vm1760_vm3 }
  0x71   : > { %vm2772_vm12 = vmand %vm1579_vm10, %vm1543_vm7  ;;  %vm1582_vm6 = vcmp.lt.s32.totalorder %v1190_v54, 0  ;;  %vm1191_vm7 = vcmp.lt.s32.totalorder %v2727_v52, 0  ;;  %v1654_v63 = vadd.s32 18, %v1190_v54  ;;  %v2850_v31 = vadd.s32 %v2686_v27, %v1083_v1 }
  0x72   : > { %v1687_v51 = vsel %vm2772_vm12, %v1651_v35, %v1157_v15  ;;  %vm1585_vm12 = vcmp.lt.s32.totalorder %v1223_v58, 0  ;;  %vm2819_vm13 = vmand %vm1582_vm6, %vm1546_vm5  ;;  %v2823_v5 = vsel %vm1191_vm7, %v1200_v59, %v1199_v45  ;;  %vm1762_vm3 = vcmp.lt.s32.totalorder %v2717_v46, 576 }
  0x73   : > { %vm1723_vm4 = vcmp.lt.s32.totalorder %v1687_v51, 16  ;;  %v1690_v16 = vsel %vm2819_vm13, %v1654_v63, %v1190_v54  ;;  %v1247_v20 = vsub.s32 0, %v2850_v31  ;;  %v2870_v26 = vadd.s32 18, %v2823_v5 }
  0x74   : > { %vm1795_vm10 = vmand %vm1723_vm4, %vm1759_vm2  ;;  %vm1583_vm2 = vcmp.lt.s32.totalorder %v2823_v5, 0  ;;  %vm2875_vm4 = vcmp.lt.s32.totalorder %v1690_v16, 16  ;;  %vm1765_vm5 = vcmp.lt.s32.totalorder %v2720_v47, 576  ;;  %vm1257_vm9 = vcmp.lt.s32.totalorder %v2792_v53, 0 }
  0x75   : > { %v2840_v12 = vsel %vm1795_vm10, 1.0, %v4368_v8  ;;  %v1086_v59 = vadd.s32 96, %v2681_v25  ;;  %v1087_v63 = vadd.s32 104, %v2681_v25  ;;  %vm1764_vm13 = vcmp.lt.s32.totalorder %v2740_v4, 576 }
  0x76   : > { %2439 = vmatmul.mubr.msk.bf16.gmra.mrb[48].mxu0 %vm281_vm1, %v2547_v17  ;;  %2405 = vmatmul.mubr.msk.bf16.gmra.mrb[48].mxu1 %vm281_vm1, %v2551_v21  ;;  %v1081_v17 = vadd.s32 56, %v2681_v25 }
  0x77   : > { %2442 = vmatprep.mubr.msk.bf16.mxu0 %vm281_vm1, %v2549_v19  ;;  %v2206_v19 = vmin.u32 %v1203_v13, %v2740_v4 }
  0x78   : > { %v2762_v28 = vadd.s32 %v2686_v27, %v1081_v17  ;;  %v1236_v17 = vsub.s32 0, %v2826_v7 }
  0x79   : > { %v2764_v33 = vmul.u32.u64.low 3817748708, %v2206_v19  ;;  %v2765_v34 = vmul.u32.u64.high 3817748708, %v2206_v19, %v2764_v33 }
  0x7a   : > { %v1225_v37 = vsub.s32 0, %v2762_v28  ;;  %v2209_v23 = vmin.u32 %v1236_v17, %v2826_v7  ;;  %v2210_v33 = vmin.u32 %v1247_v20, %v2850_v31  ;;  %vm1224_vm7 = vcmp.lt.s32.totalorder %v2762_v28, 0 }
  0x7b   : > { %v1208_v48 = vshrl.u32 %v2765_v34, 4  ;;  %v1088_v34 = vadd.s32 112, %v2681_v25 }
  0x7c   : > { %v2208_v49 = vmin.u32 %v1225_v37, %v2762_v28  ;;  %v2888_v37 = vmul.u32.u64.low 3817748708, %v2209_v23  ;;  %v2889_v38 = vmul.u32.u64.high 3817748708, %v2209_v23, %v2888_v37 }
  0x7d   : > { %v1209_v60 = vmul.u32 18, %v1208_v48  ;;  %v2903_v44 = vmul.u32.u64.low 3817748708, %v2210_v33  ;;  %v2904_v45 = vmul.u32.u64.high 3817748708, %v2210_v33, %v2903_v44  ;;  %v2913_v51 = vadd.s32 %v2686_v27, %v1088_v34 }
  0x7e   : > { %2443 = vmatmul.mubr.msk.bf16.gmra.mrb[52].mxu0 %vm281_vm1, %v2551_v21  ;;  %v1653_v21 = vadd.s32 18, %v1179_v14  ;;  %vm1761_vm1 = vcmp.lt.s32.totalorder %v2690_v29, 576  ;;  %v2799_v56 = vmul.u32.u64.low 3817748708, %v2208_v49  ;;  %v2800_v57 = vmul.u32.u64.high 3817748708, %v2208_v49, %v2799_v56 }
  0x7f   : > { %v2211_v29 = vmin.u32 %v1258_v61, %v2792_v53  ;;  %v1210_v6 = vsub.s32 %v2206_v19, %v1209_v60  ;;  %v1241_v54 = vshrl.u32 %v2889_v38, 4  ;;  %v1252_v62 = vshrl.u32 %v2904_v45, 4 }
  0x80   : > { %v1689_v39 = vsel %vm2757_vm8, %v1653_v21, %v1179_v14  ;;  %v1230_v2 = vshrl.u32 %v2800_v57, 4  ;;  %v2862_v21 = vsel %vm2835_vm14, 1.0, %v4368_v8  ;;  %v1089_v34 = vadd.s32 120, %v2681_v25 }
  0x81   : > { %vm2784_vm15 = vcmp.lt.s32.totalorder %v1689_v39, 16  ;;  %v2846_v14 = vmul.u32.u64.low 3817748708, %v2211_v29  ;;  %v2847_v15 = vmul.u32.u64.high 3817748708, %v2211_v29, %v2846_v14  ;;  %v1211_v18 = vsub.s32 0, %v1210_v6 }
  0x82   : > { %vm1797_vm8 = vmand %vm2784_vm15, %vm1761_vm1  ;;  %v1231_v11 = vmul.u32 18, %v1230_v2  ;;  %vm1547_vm1 = vcmp.ne.s32.totalorder %v2823_v5, 0  ;;  %v2892_v39 = vadd.s32 %v2686_v27, %v1085_v24  ;;  %v1242_v61 = vmul.u32 18, %v1241_v54 }
  0x83   : > { %v2829_v30 = vsel %vm1797_vm8, 1.0, %v4368_v8  ;;  %vm2842_vm15 = vmand %vm1585_vm12, %vm1549_vm11  ;;  %v1263_v32 = vshrl.u32 %v2847_v15, 4  ;;  %v2896_v40 = vsel %vm1202_vm0, %v1211_v18, %v1210_v6  ;;  %vm1763_vm12 = vcmp.lt.s32.totalorder %v2727_v52, 576 }
  0x84   : > { %v1232_v19 = vsub.s32 %v2208_v49, %v1231_v11  ;;  %v1693_v22 = vsel %vm2842_vm15, %v1657_v10, %v1223_v58  ;;  %vm2884_vm6 = vmand %vm1583_vm2, %vm1547_vm1  ;;  %v1269_v48 = vsub.s32 0, %v2892_v39  ;;  %vm1548_vm10 = vcmp.ne.s32.totalorder %v2896_v40, 0 }
  0x85   : > { %v1264_v42 = vmul.u32 18, %v1263_v32  ;;  %vm2899_vm8 = vcmp.lt.s32.totalorder %v1693_v22, 16  ;;  %v1691_v49 = vsel %vm2884_vm6, %v2870_v26, %v2823_v5  ;;  %vm1584_vm11 = vcmp.lt.s32.totalorder %v2896_v40, 0  ;;  %vm2959_vm2 = vmand %vm2875_vm4, %vm1762_vm3 }
  0x86   : > { %v1233_v41 = vsub.s32 0, %v1232_v19  ;;  %v2212_v55 = vmin.u32 %v1269_v48, %v2892_v39  ;;  %v1302_v58 = vsub.s32 0, %v2913_v51  ;;  %v1656_v60 = vadd.s32 18, %v2896_v40  ;;  %vm2942_vm14 = vmand %vm1584_vm11, %vm1548_vm10 }
  0x87   : > { %v1265_v50 = vsub.s32 %v2211_v29, %v1264_v42  ;;  %vm1235_vm1 = vcmp.lt.s32.totalorder %v2826_v7, 0  ;;  %v1243_v5 = vsub.s32 %v2209_v23, %v1242_v61  ;;  %v1253_v6 = vmul.u32 18, %v1252_v62 }
  0x88   : > { %v2921_v56 = vsel %vm1224_vm7, %v1233_v41, %v1232_v19  ;;  %v2934_v1 = vmul.u32.u64.low 3817748708, %v2212_v55  ;;  %v2935_v2 = vmul.u32.u64.high 3817748708, %v2212_v55, %v2934_v1  ;;  %v2215_v29 = vmin.u32 %v1302_v58, %v2913_v51 }
  0x89   : > { %v1266_v57 = vsub.s32 0, %v1265_v50  ;;  %vm1550_vm15 = vcmp.ne.s32.totalorder %v2921_v56, 0  ;;  %vm1586_vm0 = vcmp.lt.s32.totalorder %v2921_v56, 0  ;;  %v2953_v11 = vadd.s32 %v2686_v27, %v1086_v59 }
  0x8a   : > { %v2949_v9 = vmul.u32.u64.low 3817748708, %v2215_v29  ;;  %v2950_v10 = vmul.u32.u64.high 3817748708, %v2215_v29, %v2949_v9  ;;  %v1244_v14 = vsub.s32 0, %v1243_v5  ;;  %v2966_v15 = vadd.s32 %v2686_v27, %v1087_v63  ;;  %vm2985_vm4 = vmand %vm1586_vm0, %vm1550_vm15 }
  0x8b   : > { %v2932_v0 = vsel %vm1257_vm9, %v1266_v57, %v1265_v50  ;;  %vm2972_vm9 = vmand %vm2899_vm8, %vm1765_vm5  ;;  %v1692_v16 = vsel %vm2942_vm14, %v1656_v60, %v2896_v40  ;;  %vm1246_vm3 = vcmp.lt.s32.totalorder %v2850_v31, 0  ;;  %v1254_v17 = vsub.s32 %v2210_v33, %v1253_v6 }
  0x8c   : > { %vm1553_vm6 = vcmp.ne.s32.totalorder %v2932_v0, 0  ;;  %vm1589_vm7 = vcmp.lt.s32.totalorder %v2932_v0, 0  ;;  %v1274_v18 = vshrl.u32 %v2935_v2, 4  ;;  %v1658_v19 = vadd.s32 18, %v2921_v56 }
  0x8d   : > { %v1661_v20 = vadd.s32 18, %v2932_v0  ;;  %v1280_v22 = vsub.s32 0, %v2953_v11  ;;  %v1291_v23 = vsub.s32 0, %v2966_v15  ;;  %v2996_v24 = vsel %vm2959_vm2, 1.0, %v4368_v8  ;;  %vm3002_vm5 = vmand %vm1589_vm7, %vm1553_vm6 }
  0x8e   : > { %v1245_v32 = vsel %vm1235_vm1, %v1244_v14, %v1243_v5  ;;  %v1255_v33 = vsub.s32 0, %v1254_v17  ;;  %vm1727_vm8 = vcmp.lt.s32.totalorder %v1691_v49, 16  ;;  %v1275_v35 = vmul.u32 18, %v1274_v18 }
  0x8f   : > { %v1307_v36 = vshrl.u32 %v2950_v10, 4  ;;  %v2213_v37 = vmin.u32 %v1280_v22, %v2953_v11  ;;  %v3014_v38 = vsel %vm2972_vm9, 1.0, %v4368_v8  ;;  %vm1728_vm10 = vcmp.lt.s32.totalorder %v1692_v16, 16  ;;  %vm3029_vm0 = vmand %vm1727_vm8, %vm1763_vm12 }
  0x90   : > { %v1256_v40 = vsel %vm1246_vm3, %v1255_v33, %v1254_v17  ;;  %vm1268_vm11 = vcmp.lt.s32.totalorder %v2892_v39, 0  ;;  %v1694_v41 = vsel %vm2985_vm4, %v1658_v19, %v2921_v56  ;;  %vm1766_vm14 = vcmp.lt.s32.totalorder %v2762_v28, 576  ;;  %vm1800_vm6 = vmand %vm1728_vm10, %vm1764_vm13 }
  0x91   : > { %v1697_v42 = vsel %vm3002_vm5, %v1661_v20, %v2932_v0  ;;  %vm1551_vm15 = vcmp.ne.s32.totalorder %v1245_v32, 0  ;;  %v2214_v43 = vmin.u32 %v1291_v23, %v2966_v15  ;;  %vm1769_vm1 = vcmp.lt.s32.totalorder %v2792_v53, 576 }
  0x92   : > { %vm1587_vm2 = vcmp.lt.s32.totalorder %v1245_v32, 0  ;;  %v1276_v45 = vsub.s32 %v2212_v55, %v1275_v35  ;;  %v1308_v48 = vmul.u32 18, %v1307_v36  ;;  %v3035_v49 = vadd.s32 %v2686_v27, %v1089_v34 }
  0x93   : > { %vm1552_vm7 = vcmp.ne.s32.totalorder %v1256_v40, 0  ;;  %vm1588_vm9 = vcmp.lt.s32.totalorder %v1256_v40, 0  ;;  %v3039_v50 = vmul.u32.u64.low 3817748708, %v2213_v37  ;;  %v3040_v54 = vmul.u32.u64.high 3817748708, %v2213_v37, %v3039_v50  ;;  %vm3044_vm12 = vmand %vm1587_vm2, %vm1551_vm15 }
  0x94   : > { %v1659_v52 = vadd.s32 18, %v1245_v32  ;;  %v1277_v56 = vsub.s32 0, %v1276_v45  ;;  %v1309_v57 = vsub.s32 %v2215_v29, %v1308_v48  ;;  %v1092_v58 = vadd.s32 144, %v2681_v25  ;;  %vm3060_vm13 = vmand %vm1588_vm9, %vm1552_vm7 }
  0x95   : > { %v1660_v59 = vadd.s32 18, %v1256_v40  ;;  %v3048_v60 = vmul.u32.u64.low 3817748708, %v2214_v43  ;;  %v3049_v61 = vmul.u32.u64.high 3817748708, %v2214_v43, %v3048_v60  ;;  %v1313_v4 = vsub.s32 0, %v3035_v49 }
  0x96   : > { %v3055_v62 = vsel %vm3029_vm0, 1.0, %v4368_v8  ;;  %v3058_v63 = vsel %vm1800_vm6, 1.0, %v4368_v8  ;;  %vm1767_vm3 = vcmp.lt.s32.totalorder %v2826_v7, 576  ;;  %vm1768_vm4 = vcmp.lt.s32.totalorder %v2850_v31, 576 }
  0x97   : > { %vm3066_vm5 = vcmp.lt.s32.totalorder %v1694_v41, 16  ;;  %v1278_v2 = vsel %vm1268_vm11, %v1277_v56, %v1276_v45  ;;  %v1310_v29 = vsub.s32 0, %v1309_v57  ;;  %v1285_v3 = vshrl.u32 %v3040_v54, 4 }
  0x98   : > { %vm3073_vm8 = vcmp.lt.s32.totalorder %v1697_v42, 16  ;;  %vm1301_vm10 = vcmp.lt.s32.totalorder %v2913_v51, 0  ;;  %v2216_v6 = vmin.u32 %v1313_v4, %v3035_v49  ;;  %v3080_v9 = vadd.s32 %v2686_v27, %v1092_v58  ;;  %vm3099_vm2 = vmand %vm3066_vm5, %vm1766_vm14 }
  0x99   : > { %v1695_v10 = vsel %vm3044_vm12, %v1659_v52, %v1245_v32  ;;  %v1696_v13 = vsel %vm3060_vm13, %v1660_v59, %v1256_v40  ;;  %vm1279_vm11 = vcmp.lt.s32.totalorder %v2953_v11, 0  ;;  %v1090_v14 = vadd.s32 128, %v2681_v25  ;;  %vm3116_vm14 = vmand %vm3073_vm8, %vm1769_vm1 }
  0x9a   : > { %vm1554_vm15 = vcmp.ne.s32.totalorder %v1278_v2, 0  ;;  %vm1590_vm0 = vcmp.lt.s32.totalorder %v1278_v2, 0  ;;  %v1286_v46 = vmul.u32 18, %v1285_v3  ;;  %v1296_v16 = vshrl.u32 %v3049_v61, 4 }
  0x9b   : > { %v3089_v17 = vsel %vm1301_vm10, %v1310_v29, %v1309_v57  ;;  %v3091_v18 = vmul.u32.u64.low 3817748708, %v2216_v6  ;;  %v3092_v47 = vmul.u32.u64.high 3817748708, %v2216_v6, %v3091_v18  ;;  %v1346_v19 = vsub.s32 0, %v3080_v9  ;;  %vm3127_vm12 = vmand %vm1590_vm0, %vm1554_vm15 }
  0x9c   : > { %vm3103_vm6 = vcmp.lt.s32.totalorder %v1695_v10, 16  ;;  %vm3107_vm7 = vcmp.lt.s32.totalorder %v1696_v13, 16  ;;  %vm1770_vm9 = vcmp.lt.s32.totalorder %v2892_v39, 576  ;;  %v1287_v26 = vsub.s32 %v2213_v37, %v1286_v46 }
  0x9d   : > { %v1297_v32 = vmul.u32 18, %v1296_v16  ;;  %v1662_v33 = vadd.s32 18, %v1278_v2  ;;  %v2219_v34 = vmin.u32 %v1346_v19, %v3080_v9  ;;  %v1091_v35 = vadd.s32 136, %v2681_v25  ;;  %vm1803_vm5 = vmand %vm3103_vm6, %vm1767_vm3 }
  0x9e   : > { %v3123_v36 = vadd.s32 %v2686_v27, %v1090_v14  ;;  %vm1557_vm13 = vcmp.ne.s32.totalorder %v3089_v17, 0  ;;  %vm1593_vm1 = vcmp.lt.s32.totalorder %v3089_v17, 0  ;;  %v1288_v53 = vsub.s32 0, %v1287_v26  ;;  %vm1804_vm8 = vmand %vm3107_vm7, %vm1768_vm4 }
  0x9f   : > { %v1298_v40 = vsub.s32 %v2214_v43, %v1297_v32  ;;  %v1318_v41 = vshrl.u32 %v3092_v47, 4  ;;  %v3138_v42 = vmul.u32.u64.low 3817748708, %v2219_v34  ;;  %v3139_v44 = vmul.u32.u64.high 3817748708, %v2219_v34, %v3138_v42  ;;  %vm3170_vm4 = vmand %vm1593_vm1, %vm1557_vm13 }
  0xa0   : > { %v3142_v45 = vadd.s32 %v2686_v27, %v1091_v35  ;;  %v3147_v48 = vsel %vm3099_vm2, 1.0, %v4368_v8  ;;  %vm1290_vm3 = vcmp.lt.s32.totalorder %v2966_v15, 0  ;;  %v1324_v43 = vsub.s32 0, %v3123_v36 }
  0xa1   : > { %v1299_v7 = vsub.s32 0, %v1298_v40  ;;  %v3158_v50 = vsel %vm3116_vm14, 1.0, %v4368_v8  ;;  %v1698_v54 = vsel %vm3127_vm12, %v1662_v33, %v1278_v2  ;;  %v1665_v52 = vadd.s32 18, %v3089_v17 }
  0xa2   : > { %v1319_v56 = vmul.u32 18, %v1318_v41  ;;  %v3164_v31 = vsel %vm1803_vm5, 1.0, %v4368_v8  ;;  %v1289_v58 = vsel %vm1279_vm11, %v1288_v53, %v1287_v26  ;;  %v2217_v55 = vmin.u32 %v1324_v43, %v3123_v36 }
  0xa3   : > { %v1335_v59 = vsub.s32 0, %v3142_v45  ;;  %v3179_v60 = vsel %vm1804_vm8, 1.0, %v4368_v8  ;;  %v1300_v61 = vsel %vm1290_vm3, %v1299_v7, %v1298_v40  ;;  %vm1312_vm10 = vcmp.lt.s32.totalorder %v3035_v49, 0 }
  0xa4   : > { %v1093_v4 = vadd.s32 152, %v2681_v25  ;;  %vm1734_vm15 = vcmp.lt.s32.totalorder %v1698_v54, 16  ;;  %v1320_v0 = vsub.s32 %v2216_v6, %v1319_v56  ;;  %v1351_v1 = vshrl.u32 %v3139_v44, 4 }
  0xa5   : > { %v2218_v2 = vmin.u32 %v1335_v59, %v3142_v45  ;;  %v1701_v29 = vsel %vm3170_vm4, %v1665_v52, %v3089_v17  ;;  %vm1555_vm11 = vcmp.ne.s32.totalorder %v1289_v58, 0  ;;  %vm1773_vm0 = vcmp.lt.s32.totalorder %v2913_v51, 576  ;;  %vm3194_vm7 = vmand %vm1734_vm15, %vm1770_vm9 }
  0xa6   : > { %v3188_v3 = vmul.u32.u64.low 3817748708, %v2217_v55  ;;  %v3189_v5 = vmul.u32.u64.high 3817748708, %v2217_v55, %v3188_v3  ;;  %vm1556_vm2 = vcmp.ne.s32.totalorder %v1300_v61, 0  ;;  %vm1591_vm6 = vcmp.lt.s32.totalorder %v1289_v58, 0 }
  0xa7   : > { %v1321_v10 = vsub.s32 0, %v1320_v0  ;;  %v1352_v13 = vmul.u32 18, %v1351_v1  ;;  %vm1592_vm14 = vcmp.lt.s32.totalorder %v1300_v61, 0  ;;  %vm1771_vm12 = vcmp.lt.s32.totalorder %v2953_v11, 576  ;;  %vm3210_vm9 = vmand %vm1591_vm6, %vm1555_vm11 }
  0xa8   : > { %v3199_v14 = vmul.u32.u64.low 3817748708, %v2218_v2  ;;  %v3200_v46 = vmul.u32.u64.high 3817748708, %v2218_v2, %v3199_v14  ;;  %v3203_v16 = vadd.s32 %v2686_v27, %v1093_v4  ;;  %v1663_v17 = vadd.s32 18, %v1289_v58  ;;  %vm3222_vm8 = vmand %vm1592_vm14, %vm1556_vm2 }
  0xa9   : > { %vm1772_vm13 = vcmp.lt.s32.totalorder %v2966_v15, 576  ;;  %v1322_v18 = vsel %vm1312_vm10, %v1321_v10, %v1320_v0  ;;  %v1353_v39 = vsub.s32 %v2219_v34, %v1352_v13  ;;  %v1096_v47 = vadd.s32 176, %v2681_v25 }
  0xaa   : > { %v1664_v20 = vadd.s32 18, %v1300_v61  ;;  %vm1558_vm1 = vcmp.ne.s32.totalorder %v1322_v18, 0  ;;  %vm1594_vm5 = vcmp.lt.s32.totalorder %v1322_v18, 0  ;;  %v1329_v22 = vshrl.u32 %v3189_v5, 4 }
  0xab   : > { %v3218_v23 = vsel %vm3194_vm7, 1.0, %v4368_v8  ;;  %vm1345_vm3 = vcmp.lt.s32.totalorder %v3080_v9, 0  ;;  %v1354_v32 = vsub.s32 0, %v1353_v39  ;;  %v1357_v28 = vsub.s32 0, %v3203_v16  ;;  %vm3239_vm10 = vmand %vm1594_vm5, %vm1558_vm1 }
  0xac   : > { %v1666_v33 = vadd.s32 18, %v1322_v18  ;;  %v1330_v34 = vmul.u32 18, %v1329_v22  ;;  %v1340_v35 = vshrl.u32 %v3200_v46, 4  ;;  %v3230_v37 = vadd.s32 %v2686_v27, %v1096_v47 }
  0xad   : > { %vm3232_vm4 = vcmp.lt.s32.totalorder %v1701_v29, 16  ;;  %v1699_v40 = vsel %vm3210_vm9, %v1663_v17, %v1289_v58  ;;  %vm1774_vm15 = vcmp.lt.s32.totalorder %v3035_v49, 576  ;;  %vm1323_vm11 = vcmp.lt.s32.totalorder %v3123_v36, 0 }
  0xae   : > { %v2220_v42 = vmin.u32 %v1357_v28, %v3203_v16  ;;  %v1700_v44 = vsel %vm3222_vm8, %v1664_v20, %v1300_v61  ;;  %v1355_v7 = vsel %vm1345_vm3, %v1354_v32, %v1353_v39  ;;  %v1331_v43 = vsub.s32 %v2217_v55, %v1330_v34  ;;  %vm3265_vm9 = vmand %vm3232_vm4, %vm1773_vm0 }
  0xaf   : > { %v1094_v54 = vadd.s32 160, %v2681_v25  ;;  %vm1334_vm2 = vcmp.lt.s32.totalorder %v3142_v45, 0  ;;  %v1341_v52 = vmul.u32 18, %v1340_v35  ;;  %vm1735_vm6 = vcmp.lt.s32.totalorder %v1699_v40, 16 }
  0xb0   : > { %v3250_v56 = vmul.u32.u64.low 3817748708, %v2220_v42  ;;  %v3251_v57 = vmul.u32.u64.high 3817748708, %v2220_v42, %v3250_v56  ;;  %v1702_v58 = vsel %vm3239_vm10, %v1666_v33, %v1322_v18  ;;  %v1332_v59 = vsub.s32 0, %v1331_v43  ;;  %vm3277_vm5 = vmand %vm1735_vm6, %vm1771_vm12 }
  0xb1   : > { %v1390_v4 = vsub.s32 0, %v3230_v37  ;;  %vm3256_vm7 = vcmp.lt.s32.totalorder %v1700_v44, 16  ;;  %vm1561_vm14 = vcmp.ne.s32.totalorder %v1355_v7, 0  ;;  %v1342_v55 = vsub.s32 %v2218_v2, %v1341_v52 }
  0xb2   : > { %v1095_v61 = vadd.s32 168, %v2681_v25  ;;  %vm1597_vm1 = vcmp.lt.s32.totalorder %v1355_v7, 0  ;;  %v1333_v29 = vsel %vm1323_vm11, %v1332_v59, %v1331_v43  ;;  %v3273_v5 = vadd.s32 %v2686_v27, %v1094_v54  ;;  %vm3289_vm4 = vmand %vm3256_vm7, %vm1772_vm13 }
  0xb3   : > { %v2223_v3 = vmin.u32 %v1390_v4, %v3230_v37  ;;  %vm3281_vm8 = vcmp.lt.s32.totalorder %v1702_v58, 16  ;;  %v1343_v10 = vsub.s32 0, %v1342_v55  ;;  %vm1559_vm0 = vcmp.ne.s32.totalorder %v1333_v29, 0  ;;  %vm3299_vm10 = vmand %vm1597_vm1, %vm1561_vm14 }
  0xb4   : > { %vm1595_vm3 = vcmp.lt.s32.totalorder %v1333_v29, 0  ;;  %v1669_v11 = vadd.s32 18, %v1355_v7  ;;  %v1362_v6 = vshrl.u32 %v3251_v57, 4  ;;  %vm555_vm12 = vcmp.lt.s32.totalorder %v2681_v25, 7  ;;  %vm1810_vm14 = vmand %vm3281_vm8, %vm1774_vm15 }
  0xb5   : > { %v3294_v14 = vmul.u32.u64.low 3817748708, %v2223_v3  ;;  %v3295_v46 = vmul.u32.u64.high 3817748708, %v2223_v3, %v3294_v14  ;;  %v3305_v15 = vsel %vm1334_vm2, %v1343_v10, %v1342_v55  ;;  %v1667_v18 = vadd.s32 18, %v1333_v29  ;;  %vm3321_vm2 = vmand %vm1595_vm3, %vm1559_vm0 }
  0xb6   : > { %v3308_v39 = vadd.s32 %v2686_v27, %v1095_v61  ;;  %v1368_v47 = vsub.s32 0, %v3273_v5  ;;  %v3314_v19 = vsel %vm3265_vm9, 1.0, %v4368_v8  ;;  %vm1777_vm13 = vcmp.lt.s32.totalorder %v3080_v9, 576 }
  0xb7   : > { %4455 = vst [vmem:[#allocation3_spill] sm:$0xff] %v3314_v19  ;;  %vm1560_vm11 = vcmp.ne.s32.totalorder %v3305_v15, 0  ;;  %vm1596_vm6 = vcmp.lt.s32.totalorder %v3305_v15, 0  ;;  %v3328_v22 = vsel %vm3277_vm5, 1.0, %v4368_v8  ;;  %vm1775_vm7 = vcmp.lt.s32.totalorder %v3123_v36, 576 }
  0xb8   : > { %4458 = vst [vmem:[#allocation4_spill] sm:$0xff] %v3328_v22  ;;  %v1363_v26 = vmul.u32 18, %v1362_v6  ;;  %v3332_v32 = vmin.u32 %v1368_v47, %v3273_v5  ;;  %v1705_v28 = vsel %vm3299_vm10, %v1669_v11, %v1355_v7  ;;  %v1668_v33 = vadd.s32 18, %v3305_v15  ;;  %vm3348_vm9 = vmand %vm1596_vm6, %vm1560_vm11 }
  0xb9   : > { %v1395_v34 = vshrl.u32 %v3295_v46, 4  ;;  %v1379_v35 = vsub.s32 0, %v3308_v39  ;;  %v3346_v53 = vsel %vm3289_vm4, 1.0, %v4368_v8  ;;  %v1703_v49 = vsel %vm3321_vm2, %v1667_v18, %v1333_v29 }
  0xba   : > { %4459 = vst [vmem:[#allocation5_spill] sm:$0xff] %v3346_v53  ;;  %vm1356_vm15 = vcmp.lt.s32.totalorder %v3203_v16, 0  ;;  %v1364_v41 = vsub.s32 %v2220_v42, %v1363_v26  ;;  %v3356_v7 = vmul.u32.u64.low 3817748708, %v3332_v32  ;;  %v3357_v43 = vmul.u32.u64.high 3817748708, %v3332_v32, %v3356_v7 }
  0xbb   : > { %v1396_v44 = vmul.u32 18, %v1395_v34  ;;  %v3360_v54 = vmin.u32 %v1379_v35, %v3308_v39  ;;  %v3363_v56 = vsel %vm1810_vm14, 1.0, %v4368_v8  ;;  %vm3365_vm1 = vcmp.lt.s32.totalorder %v1705_v28, 16 }
  0xbc   : > { %4462 = vst [vmem:[#allocation6_spill] sm:$0xff] %v3363_v56  ;;  %v1365_v58 = vsub.s32 0, %v1364_v41  ;;  %v1097_v59 = vadd.s32 184, %v2681_v25  ;;  %v1704_v0 = vsel %vm3348_vm9, %v1668_v33, %v3305_v15  ;;  %vm3375_vm5 = vcmp.lt.s32.totalorder %v1703_v49, 16  ;;  %vm1813_vm3 = vmand %vm3365_vm1, %vm1777_vm13 }
  0xbd   : > { %v3380_v61 = vmul.u32.u64.low 3817748708, %v3360_v54  ;;  %v3381_v1 = vmul.u32.u64.high 3817748708, %v3360_v54, %v3380_v61  ;;  %v1397_v11 = vsub.s32 %v2223_v3, %v1396_v44  ;;  %vm3406_vm4 = vmand %vm3375_vm5, %vm1775_vm7  ;;  %v1373_v9 = vshrl.u32 %v3357_v43, 4 }
  0xbe   : > { %v3387_v13 = vsel %vm1356_vm15, %v1365_v58, %v1364_v41  ;;  %v3441_v7 = vsel %vm1813_vm3, 1.0, %v4368_v8  ;;  %vm1776_vm13 = vcmp.lt.s32.totalorder %v3142_v45, 576  ;;  %vm1389_vm11 = vcmp.lt.s32.totalorder %v3230_v37, 0 }
  0xbf   : > { %vm1562_vm8 = vcmp.ne.s32.totalorder %v3387_v13, 0  ;;  %vm1598_vm0 = vcmp.lt.s32.totalorder %v3387_v13, 0  ;;  %v1670_v3 = vadd.s32 18, %v3387_v13  ;;  %v1384_v34 = vshrl.u32 %v3381_v1, 4  ;;  %4473 = vst [vmem:[#allocation9_spill] sm:$0xff] %v3441_v7 }
  0xc0   : > { %vm3430_vm10 = vmand %vm1598_vm0, %vm1562_vm8  ;;  %v1398_v41 = vsub.s32 0, %v1397_v11  ;;  %vm3449_vm6 = vcmp.lt.s32.totalorder %v1704_v0, 16  ;;  %vm1778_vm2 = vcmp.lt.s32.totalorder %v3203_v16, 576  ;;  %vm1367_vm7 = vcmp.lt.s32.totalorder %v3273_v5, 0 }
  0xc1   : > { %v1374_v58 = vmul.u32 18, %v1373_v9  ;;  %vm1378_vm14 = vcmp.lt.s32.totalorder %v3308_v39, 0  ;;  %v3459_v61 = vsel %vm3406_vm4, 1.0, %v4368_v8  ;;  %v1706_v0 = vsel %vm3430_vm10, %v1670_v3, %v3387_v13  ;;  %vm3535_vm0 = vmand %vm3449_vm6, %vm1776_vm13 }
  0xc2   : > { %4477 = vst [vmem:[#allocation11_spill] sm:$0xff] %v3459_v61  ;;  %v1385_v1 = vmul.u32 18, %v1384_v34  ;;  %vm3511_vm9 = vcmp.lt.s32.totalorder %v1706_v0, 16 }
  0xc3   : > { %vm3547_vm3 = vmand %vm3511_vm9, %vm1778_vm2  ;;  %vm1781_vm2 = vcmp.lt.s32.totalorder %v3230_v37, 576  ;;  %vm1780_vm9 = vcmp.lt.s32.totalorder %v3308_v39, 576 }
  0xc4   : > { %v1386_v13 = vsub.s32 %v3360_v54, %v1385_v1 }
  0xe9   : > { %v2336_v52 = vpop.f32.mrb[0].mxu0  ;;  %v2356_v4 = vpop.f32.mrb[0].mxu1 }
  0xea   : > { %v3370_v42 = vpop.f32.mrb[1].mxu0  ;;  %v519_v29 = vrot.slane %v2336_v52, 1  ;;  %v539_v51 = vrot.slane %v2356_v4, 1  ;;  %v3383_v10 = vpop.f32.mrb[1].mxu1 }
  0xeb   : > { %v2337_v2 = vpop.f32.mrb[2].mxu0  ;;  %v4366_v46 = vrot.slane %v3383_v10, 1  ;;  %v2357_v17 = vpop.f32.mrb[2].mxu1  ;;  %v4367_v15 = vrot.slane %v3370_v42, 1 }
  0xec   : > { %v520_v6 = vrot.slane %v2337_v2, 1  ;;  %v377_v14 = vpop.f32.mrb[3].mxu0  ;;  %v540_v47 = vrot.slane %v2357_v17, 1  ;;  %v457_v20 = vpop.f32.mrb[3].mxu1 }
  0xed   : > { %v518_v18 = vrot.slane %v377_v14, 1  ;;  %v538_v26 = vrot.slane %v457_v20, 1  ;;  %v1375_v20 = vsub.s32 %v3332_v32, %v1374_v58 }
  0xee   : > { %v3400_v28 = vsel %vm555_vm12, %v519_v29, %v520_v6  ;;  %v3424_v36 = vsel %vm555_vm12, %v539_v51, %v540_v47 }
  0xef   : > { %v3416_v35 = vsel %vm555_vm12, %v4367_v15, %v518_v18  ;;  %v3420_v40 = vsel %vm555_vm12, %v518_v18, %v519_v29  ;;  %4469 = vst [vmem:[#allocation7_spill] sm:$0xff] %v3424_v36  ;;  %v3438_v44 = vsel %vm555_vm12, %v4366_v46, %v538_v26  ;;  %v3445_v43 = vsel %vm555_vm12, %v538_v26, %v539_v51 }
  0xf0   : > { %4472 = vst [vmem:[#allocation8_spill] sm:$0xff] %v3438_v44  ;;  %4474 = vst [vmem:[#allocation10_spill] sm:$0xff] %v3445_v43  ;;  %v3465_v29 = vadd.s32 %v2686_v27, %v1097_v59  ;;  %v3469_v18 = vsel %vm1389_vm11, %v1398_v41, %v1397_v11 }
  0xf1   : > { %v2340_v52 = vpop.f32.mrb[4].mxu0  ;;  %v2360_v55 = vpop.f32.mrb[4].mxu1  ;;  %vm1565_vm15 = vcmp.ne.s32.totalorder %v3469_v18, 0  ;;  %vm1601_vm1 = vcmp.lt.s32.totalorder %v3469_v18, 0 }
  0xf2   : > { %v390_v4 = vpop.f32.mrb[5].mxu0  ;;  %v543_v14 = vrot.slane %v2360_v55, 1  ;;  %v470_v17 = vpop.f32.mrb[5].mxu1  ;;  %v523_v26 = vrot.slane %v2340_v52, 1  ;;  %v1376_v55 = vsub.s32 0, %v1375_v20  ;;  %v1401_v41 = vsub.s32 0, %v3465_v29  ;;  %vm3561_vm13 = vmand %vm1601_vm1, %vm1565_vm15 }
  0xf3   : > { %v521_v2 = vrot.slane %v390_v4, 1  ;;  %v2341_v51 = vpop.f32.mrb[6].mxu0  ;;  %v541_v46 = vrot.slane %v470_v17, 1  ;;  %v2361_v49 = vpop.f32.mrb[6].mxu1 }
  0xf4   : > { %v524_v33 = vrot.slane %v2341_v51, 1  ;;  %v393_v9 = vpop.f32.mrb[7].mxu0  ;;  %v544_v59 = vrot.slane %v2361_v49, 1  ;;  %v473_v34 = vpop.f32.mrb[7].mxu1  ;;  %v3500_v58 = vsel %vm1367_vm7, %v1376_v55, %v1375_v20  ;;  %v1100_v51 = vadd.s32 208, %v2681_v25 }
  0xf5   : > { %v522_v3 = vrot.slane %v393_v9, 1  ;;  %v3475_v4 = vsel %vm555_vm12, %v520_v6, %v521_v2  ;;  %v542_v15 = vrot.slane %v473_v34, 1  ;;  %v3483_v32 = vsel %vm555_vm12, %v540_v47, %v541_v46 }
  0xf6   : > { %v3479_v11 = vsel %vm555_vm12, %v523_v26, %v524_v33  ;;  %4478 = vst [vmem:[#allocation12_spill] sm:$0xff] %v3483_v32  ;;  %v3496_v52 = vsel %vm555_vm12, %v543_v14, %v544_v59  ;;  %v3518_v20 = vadd.s32 18, %v3469_v18  ;;  %vm1563_vm5 = vcmp.ne.s32.totalorder %v3500_v58, 0 }
  0xf7   : > { %v3488_v54 = vsel %vm555_vm12, %v521_v2, %v522_v3  ;;  %v3492_v6 = vsel %vm555_vm12, %v522_v3, %v523_v26  ;;  %4479 = vst [vmem:[#allocation13_spill] sm:$0xff] %v3496_v52  ;;  %v3504_v47 = vsel %vm555_vm12, %v541_v46, %v542_v15  ;;  %v3508_v1 = vsel %vm555_vm12, %v542_v15, %v543_v14 }
  0xf8   : > { %4480 = vst [vmem:[#allocation14_spill] sm:$0xff] %v3504_v47  ;;  %4481 = vst [vmem:[#allocation15_spill] sm:$0xff] %v3508_v1  ;;  %v1387_v2 = vsub.s32 0, %v1386_v13  ;;  %vm1599_vm8 = vcmp.lt.s32.totalorder %v3500_v58, 0  ;;  %v3527_v0 = vadd.s32 18, %v3500_v58  ;;  %v3566_v26 = vadd.s32 %v2686_v27, %v1100_v51 }
  0xf9   : > { %v2344_v17 = vpop.f32.mrb[8].mxu0  ;;  %v2364_v9 = vpop.f32.mrb[8].mxu1  ;;  %vm3580_vm11 = vmand %vm1599_vm8, %vm1563_vm5  ;;  %v1709_v56 = vsel %vm3561_vm13, %v3518_v20, %v3469_v18  ;;  %vm1400_vm7 = vcmp.lt.s32.totalorder %v3465_v29, 0  ;;  %vm1001_vm8 = vcmp.lt.s32.totalorder %v2681_v25, 6 }
  0xfa   : > { %v406_v46 = vpop.f32.mrb[9].mxu0  ;;  %v3522_v15 = vsel %vm1378_vm14, %v1387_v2, %v1386_v13  ;;  %v527_v14 = vrot.slane %v2344_v17, 1  ;;  %v547_v34 = vrot.slane %v2364_v9, 1  ;;  %v486_v55 = vpop.f32.mrb[9].mxu1  ;;  %v3540_v2 = vmin.u32 %v1401_v41, %v3465_v29 }
  0xfb   : > { %v525_v49 = vrot.slane %v406_v46, 1  ;;  %v3529_v3 = vpop.f32.mrb[10].mxu0  ;;  %v545_v17 = vrot.slane %v486_v55, 1  ;;  %v2365_v46 = vpop.f32.mrb[10].mxu1  ;;  %vm1564_vm4 = vcmp.ne.s32.totalorder %v3522_v15, 0  ;;  %vm1600_vm10 = vcmp.lt.s32.totalorder %v3522_v15, 0 }
  0xfc   : > { %v528_v8 = vrot.slane %v3529_v3, 1  ;;  %v409_v1 = vpop.f32.mrb[11].mxu0  ;;  %v548_v41 = vrot.slane %v2365_v46, 1  ;;  %v489_v9 = vpop.f32.mrb[11].mxu1  ;;  %v1672_v51 = vadd.s32 18, %v3522_v15  ;;  %vm3602_vm6 = vmand %vm1600_vm10, %vm1564_vm4  ;;  %vm1779_vm14 = vcmp.lt.s32.totalorder %v3273_v5, 576 }
  0xfd   : > { %v526_v57 = vrot.slane %v409_v1, 1  ;;  %v3555_v3 = vsel %vm555_vm12, %v524_v33, %v525_v49  ;;  %v546_v55 = vrot.slane %v489_v9, 1  ;;  %v3574_v33 = vsel %vm555_vm12, %v544_v59, %v545_v17 }
  0xfe   : > { %v3570_v1 = vsel %vm555_vm12, %v527_v14, %v528_v8  ;;  %4490 = vst [vmem:[#allocation16_spill] sm:$0xff] %v3574_v33  ;;  %v4493_v59 = vmov 0.0   ;;  %v3609_v52 = vsel %vm555_vm12, %v547_v34, %v548_v41  ;;  %v1708_v16 = vsel %vm3602_vm6, %v1672_v51, %v3522_v15 }
  0xff   : > { %v3587_v9 = vsel %vm555_vm12, %v525_v49, %v526_v57  ;;  %v3591_v47 = vsel %vm555_vm12, %v526_v57, %v527_v14  ;;  %v3596_v33 = vsel %vm3535_vm0, 1.0, %v4493_v59  ;;  %v1098_v49 = vadd.s32 192, %v2681_v25  ;;  %4497 = vst [vmem:[#allocation18_spill] sm:$0xff] %v3609_v52 }
 0x100   : > { %4494 = vst [vmem:[#allocation17_spill] sm:$0xff] %v3596_v33  ;;  %v3613_v14 = vsel %vm555_vm12, %v545_v17, %v546_v55  ;;  %v3616_v13 = vmul.u32.u64.low 3817748708, %v3540_v2  ;;  %v3617_v57 = vmul.u32.u64.high 3817748708, %v3540_v2, %v3616_v13  ;;  %v3622_v7 = vsel %vm3547_vm3, 1.0, %v4493_v59 }
 0x101   : > { %4498 = vst [vmem:[#allocation19_spill] sm:$0xff] %v3613_v14  ;;  %v2348_v33 = vpop.f32.mrb[12].mxu0  ;;  %4499 = vst [vmem:[#allocation20_spill] sm:$0xff] %v3622_v7  ;;  %v1707_v17 = vsel %vm3580_vm11, %v3527_v0, %v3500_v58  ;;  %v1434_v13 = vsub.s32 0, %v3566_v26  ;;  %v3635_v45 = vpop.f32.mrb[12].mxu1  ;;  %v3643_v18 = vsel %vm555_vm12, %v546_v55, %v547_v34  ;;  %v1099_v58 = vadd.s32 200, %v2681_v25 }
 0x102   : > { %v531_v14 = vrot.slane %v2348_v33, 1  ;;  %4500 = vst [vmem:[#allocation21_spill] sm:$0xff] %v3635_v45  ;;  %v422_v52 = vpop.f32.mrb[13].mxu0  ;;  %4501 = vst [vmem:[#allocation22_spill] sm:$0xff] %v3643_v18  ;;  %v502_v46 = vpop.f32.mrb[13].mxu1  ;;  %v3652_v61 = vadd.s32 %v2686_v27, %v1098_v49  ;;  %v1406_v55 = vshrl.u32 %v3617_v57, 4 }
 0x103   : > { %v529_v0 = vrot.slane %v422_v52, 1  ;;  %v2349_v33 = vpop.f32.mrb[14].mxu0  ;;  %v3649_v7 = vmin.u32 %v1434_v13, %v3566_v26  ;;  %v549_v15 = vrot.slane %v502_v46, 1  ;;  %v2369_v43 = vpop.f32.mrb[14].mxu1  ;;  %v3656_v18 = vadd.s32 %v2686_v27, %v1099_v58 }
 0x104   : > { %v532_v51 = vrot.slane %v2349_v33, 1  ;;  %v425_v34 = vpop.f32.mrb[15].mxu0  ;;  %v552_v52 = vrot.slane %v2369_v43, 1  ;;  %v3658_v32 = vpop.f32.mrb[15].mxu1  ;;  %v1101_v49 = vadd.s32 216, %v2681_v25  ;;  %v1407_v57 = vmul.u32 18, %v1406_v55 }
 0x105   : > { %v530_v20 = vrot.slane %v425_v34, 1  ;;  %4502 = vst [vmem:[#allocation23_spill] sm:$0xff] %v3658_v32  ;;  %v3662_v13 = vsel %vm555_vm12, %v528_v8, %v529_v0  ;;  %v3672_v58 = vsel %vm555_vm12, %v548_v41, %v549_v15  ;;  %vm3686_vm15 = vcmp.lt.s32.totalorder %v1709_v56, 16 }
 0x106   : > { %v3668_v33 = vsel %vm555_vm12, %v531_v14, %v532_v51  ;;  %4503 = vst [vmem:[#allocation24_spill] sm:$0xff] %v3672_v58  ;;  %v3683_v34 = vmul.u32.u64.low 3817748708, %v3649_v7  ;;  %v3684_v46 = vmul.u32.u64.high 3817748708, %v3649_v7, %v3683_v34  ;;  %v1408_v55 = vsub.s32 %v3540_v2, %v1407_v57  ;;  %vm3734_vm0 = vmand %vm3686_vm15, %vm1781_vm2 }
 0x107   : > { %v3676_v43 = vsel %vm555_vm12, %v529_v0, %v530_v20  ;;  %v3680_v8 = vsel %vm555_vm12, %v530_v20, %v531_v14  ;;  %v1412_v41 = vsub.s32 0, %v3652_v61  ;;  %v1423_v58 = vsub.s32 0, %v3656_v18 }
 0x108   : > { %vm3693_vm1 = vcmp.lt.s32.totalorder %v1707_v17, 16  ;;  %vm3697_vm5 = vcmp.lt.s32.totalorder %v1708_v16, 16  ;;  %v4510_v56 = vrot.slane %v3635_v45, 1  ;;  %v4512_v2 = vrot.slane %v3658_v32, 1 }
 0x109   : > { %v2352_v0 = vpop.f32.mrb[16].mxu0  ;;  %v2374_v34 = vpop.f32.mrb[16].mxu1  ;;  %v1409_v36 = vsub.s32 0, %v1408_v55  ;;  %v3714_v16 = vmin.u32 %v1412_v41, %v3652_v61  ;;  %v3717_v19 = vmin.u32 %v1423_v58, %v3656_v18  ;;  %vm3757_vm3 = vmand %vm3693_vm1, %vm1779_vm14  ;;  %v3795_v14 = vsel %vm3734_vm0, 1.0, %v4493_v59 }
 0x10a   : > { %v3705_v20 = vsel %vm555_vm12, %v4510_v56, %v552_v52  ;;  %v3711_v57 = vsel %vm555_vm12, %v549_v15, %v4512_v2  ;;  %v535_v17 = vrot.slane %v2352_v0, 1  ;;  %v438_v22 = vpop.f32.mrb[17].mxu0  ;;  %v3720_v45 = vadd.f32 %v2374_v34, %v3400_v28  ;;  %vm3776_vm10 = vmand %vm3697_vm5, %vm1780_vm9 }
 0x10b   : > { %4511 = vst [vmem:[#allocation25_spill] sm:$0xff] %v3705_v20  ;;  %4513 = vst [vmem:[#allocation26_spill] sm:$0xff] %v3711_v57  ;;  %v533_v56 = vrot.slane %v438_v22, 1  ;;  %v634_v20 = vpop.f32.mrb[17].mxu1  ;;  %v2353_v32 = vpop.f32.mrb[18].mxu0  ;;  %v1439_v15 = vshrl.u32 %v3684_v46, 4  ;;  %v3725_v0 = vadd.s32 %v2686_v27, %v1101_v49  ;;  %v1410_v28 = vsel %vm1400_vm7, %v1409_v36, %v1408_v55 }
 0x10c   : > { %v3728_v2 = vadd.f32 %v634_v20, %v3416_v35  ;;  %v536_v41 = vrot.slane %v2353_v32, 1  ;;  %v2375_v57 = vpop.f32.mrb[18].mxu1  ;;  %v441_v58 = vpop.f32.mrb[19].mxu0  ;;  %v4517_v49 = vrot.slane %v3370_v42, 1  ;;  %vm1566_vm4 = vcmp.ne.s32.totalorder %v1410_v28, 0 }
 0x10d   : > { %4514 = vst [vmem:[#allocation27_spill] sm:$0xff] %v3725_v0  ;;  %v3747_v32 = vadd.f32 %v2375_v57, %v3475_v4  ;;  %v534_v46 = vrot.slane %v441_v58, 1  ;;  %v637_v37 = vpop.f32.mrb[19].mxu1  ;;  %v3751_v44 = vsel %vm555_vm12, %v532_v51, %v533_v56  ;;  %vm1602_vm13 = vcmp.lt.s32.totalorder %v1410_v28, 0 }
 0x10e   : > { %v3744_v35 = vsel %vm555_vm12, %v552_v52, %v4517_v49  ;;  %v638_v42 = vadd.f32 %v637_v37, %v3420_v40  ;;  %v3764_v4 = vsel %vm555_vm12, %v535_v17, %v536_v41  ;;  %v4521_v52 = vrot.slane %v3383_v10, 1  ;;  %vm3788_vm11 = vmand %vm1602_vm13, %vm1566_vm4 }
 0x10f   : > { %4518 = vst [vmem:[#allocation28_spill] sm:$0xff] %v3744_v35  ;;  %v3782_v53 = vsel %vm555_vm12, %v533_v56, %v534_v46  ;;  %v3786_v10 = vsel %vm555_vm12, %v534_v46, %v535_v17  ;;  %v1674_v39 = vadd.s32 18, %v1410_v28  ;;  %v1440_v55 = vmul.u32 18, %v1439_v15 }
 0x110   : > { %v3770_v51 = vsel %vm555_vm12, %v536_v41, %v4521_v52  ;;  %vm1782_vm6 = vcmp.lt.s32.totalorder %v3465_v29, 576  ;;  %v3799_v20 = vmul.u32.u64.low 3817748708, %v3714_v16  ;;  %v3800_v57 = vmul.u32.u64.high 3817748708, %v3714_v16, %v3799_v20 }
 0x111   : > { %v2412_v34 = vpop.f32.mrb[20].mxu0  ;;  %v1710_v17 = vsel %vm3788_vm11, %v1674_v39, %v1410_v28  ;;  %v1441_v56 = vsub.s32 %v3649_v7, %v1440_v55  ;;  %v3806_v41 = vmul.u32.u64.low 3817748708, %v3717_v19  ;;  %v3807_v15 = vmul.u32.u64.high 3817748708, %v3717_v19, %v3806_v41  ;;  %v2378_v58 = vpop.f32.mrb[20].mxu1 }
 0x112   : > { %v3809_v22 = vpop.f32.mrb[21].mxu0  ;;  %v3814_v49 = vsel %vm3757_vm3, 1.0, %v4493_v59  ;;  %v3819_v46 = vsel %vm3776_vm10, 1.0, %v4493_v59  ;;  %vm1433_vm2 = vcmp.lt.s32.totalorder %v3566_v26, 0  ;;  %v1445_v7 = vsub.s32 0, %v3725_v0  ;;  %v650_v52 = vpop.f32.mrb[21].mxu1 }
 0x113   : > { %4526 = vst [vmem:[#allocation29_spill] sm:$0xff] %v3809_v22  ;;  %4527 = vst [vmem:[#allocation30_spill] sm:$0xff] %v3819_v46  ;;  %v3824_v28 = vadd.f32 %v2378_v58, %v3479_v11  ;;  %v967_v37 = vrot.slane %v2412_v34, 2  ;;  %v2413_v40 = vpop.f32.mrb[22].mxu0  ;;  %vm3826_vm7 = vcmp.lt.s32.totalorder %v1710_v17, 16  ;;  %v1442_v36 = vsub.s32 0, %v1441_v56 }
 0x114   : > { %vm1785_vm14 = vcmp.lt.s32.totalorder %v3566_v26, 576  ;;  %v3832_v5 = vadd.f32 %v650_v52, %v3488_v54  ;;  %v2379_v55 = vpop.f32.mrb[22].mxu1  ;;  %v968_v20 = vrot.slane %v2413_v40, 2  ;;  %v825_v41 = vpop.f32.mrb[23].mxu0  ;;  %v1417_v27 = vshrl.u32 %v3800_v57, 4  ;;  %vm1818_vm9 = vmand %vm3826_vm7, %vm1782_vm6 }
 0x115   : > { %v3836_v11 = vadd.s32 240, %v2681_v25  ;;  %v4374_v34 = vrot.slane %v3809_v22, 2  ;;  %v3840_v17 = vadd.f32 %v2379_v55, %v3555_v3  ;;  %v653_v58 = vpop.f32.mrb[23].mxu1  ;;  %v966_v35 = vrot.slane %v825_v41, 2 }
 0x116   : > { %v1443_v46 = vsel %vm1433_vm2, %v1442_v36, %v1441_v56  ;;  %v1034_v54 = vsel %vm1001_vm8, %v967_v37, %v968_v20  ;;  %v654_v52 = vadd.f32 %v653_v58, %v3492_v6  ;;  %v1418_v36 = vmul.u32 18, %v1417_v27 }
 0x117   : > { %4530 = vst [vmem:[#allocation31_spill] sm:$0xff] %v3836_v11  ;;  %vm1569_vm15 = vcmp.ne.s32.totalorder %v1443_v46, 0  ;;  %vm1605_vm1 = vcmp.lt.s32.totalorder %v1443_v46, 0  ;;  %v1040_v3 = vadd.f32 %v1034_v54, %v3720_v45  ;;  %v1035_v57 = vsel %vm1001_vm8, %v966_v35, %v967_v37 }
 0x118   : > { %v1036_v56 = vsel %vm1001_vm8, %v4374_v34, %v966_v35  ;;  %vm3858_vm5 = vmand %vm1605_vm1, %vm1569_vm15  ;;  %v1677_v29 = vadd.s32 18, %v1443_v46  ;;  %v1039_v39 = vadd.f32 %v1035_v57, %v638_v42  ;;  %v3864_v55 = vmin.u32 %v1445_v7, %v3725_v0 }
 0x119   : > { %v1038_v6 = vadd.f32 %v1036_v56, %v3728_v2  ;;  %v1905_v45 = vmul.f32 %v2829_v30, %v1040_v3  ;;  %v2416_v37 = vpop.f32.mrb[24].mxu0  ;;  %v3868_v41 = vsel %vm1818_vm9, 1.0, %v4493_v59  ;;  %v1428_v58 = vshrl.u32 %v3807_v15, 4  ;;  %v2382_v42 = vpop.f32.mrb[24].mxu1 }
 0x11a   : > { %v1713_v35 = vsel %vm3858_vm5, %v1677_v29, %v1443_v46  ;;  %v1904_v2 = vmul.f32 %v2862_v21, %v1039_v39  ;;  %v971_v27 = vrot.slane %v2416_v37, 2  ;;  %v838_v57 = vpop.f32.mrb[25].mxu0  ;;  %v3880_v56 = vadd.f32 %v2382_v42, %v3570_v1  ;;  %v666_v34 = vpop.f32.mrb[25].mxu1 }
 0x11b   : > { %v1903_v54 = vmul.f32 %v2840_v12, %v1038_v6  ;;  %vm3875_vm0 = vcmp.lt.s32.totalorder %v1713_v35, 16  ;;  %v1982_v30 = vmul.f32 %v1905_v45, %v1040_v3  ;;  %v969_v40 = vrot.slane %v838_v57, 2  ;;  %v2417_v46 = vpop.f32.mrb[26].mxu0  ;;  %v2383_v35 = vpop.f32.mrb[26].mxu1 }
 0x11c   : > { %v3883_v15 = vsub.s32 %v3714_v16, %v1418_v36  ;;  %v1981_v21 = vmul.f32 %v1904_v2, %v1039_v39  ;;  %v3886_v37 = vadd.f32 %v666_v34, %v3587_v9  ;;  %v841_v22 = vpop.f32.mrb[27].mxu0  ;;  %v3891_v1 = vadd.f32 %v2383_v35, %v3662_v13  ;;  %v669_v57 = vpop.f32.mrb[27].mxu1  ;;  %vm1821_vm3 = vmand %vm3875_vm0, %vm1785_vm14 }
 0x11d   : > { %v1939_v12 = vadd.f32 %v1904_v2, %v1903_v54  ;;  %v1980_v29 = vmul.f32 %v1903_v54, %v1038_v6  ;;  %v1033_v3 = vsel %vm1001_vm8, %v968_v20, %v969_v40  ;;  %v972_v42 = vrot.slane %v2417_v46, 2 }
 0x11e   : > { %v970_v11 = vrot.slane %v841_v22, 2  ;;  %v1041_v16 = vadd.f32 %v1033_v3, %v3747_v32  ;;  %v3895_v6 = vadd.f32 %v669_v57, %v3591_v47  ;;  %v1429_v20 = vmul.u32 18, %v1428_v58 }
 0x11f   : > { %v2016_v0 = vadd.f32 %v1981_v21, %v1980_v29  ;;  %v1940_v36 = vadd.f32 %v1939_v12, %v1905_v45  ;;  %v1030_v9 = vsel %vm1001_vm8, %v971_v27, %v972_v42  ;;  %v3911_v54 = vsel %vm1821_vm3, 1.0, %v4493_v59 }
 0x120   : > { %v1031_v13 = vsel %vm1001_vm8, %v970_v11, %v971_v27  ;;  %v1032_v22 = vsel %vm1001_vm8, %v969_v40, %v970_v11  ;;  %v1906_v32 = vmul.f32 %v2996_v24, %v1041_v16  ;;  %v1044_v47 = vadd.f32 %v1030_v9, %v3824_v28 }
 0x121   : > { %v2017_v34 = vadd.f32 %v2016_v0, %v1982_v30  ;;  %v1042_v26 = vadd.f32 %v1032_v22, %v3832_v5  ;;  %v1043_v39 = vadd.f32 %v1031_v13, %v654_v52  ;;  %v2420_v45 = vpop.f32.mrb[28].mxu0  ;;  %v2386_v58 = vpop.f32.mrb[28].mxu1  ;;  %v1420_v0 = vsub.s32 0, %v3883_v15 }
 0x122   : > { %v3914_v2 = vmul.u32.u64.low 3817748708, %v3864_v55  ;;  %v3915_v7 = vmul.u32.u64.high 3817748708, %v3864_v55, %v3914_v2  ;;  %v1941_v27 = vadd.f32 %v1940_v36, %v1906_v32  ;;  %v1983_v46 = vmul.f32 %v1906_v32, %v1041_v16  ;;  %v854_v24 = vpop.f32.mrb[29].mxu0  ;;  %v682_v30 = vpop.f32.mrb[29].mxu1 }
 0x123   : > { %v1907_v11 = vmul.f32 %v3055_v62, %v1042_v26  ;;  %v1909_v28 = vmul.f32 %v3014_v38, %v1044_v47  ;;  %v1908_v5 = vmul.f32 %v3058_v63, %v1043_v39  ;;  %v3922_v52 = vadd.f32 %v2386_v58, %v3668_v33  ;;  %v2421_v12 = vpop.f32.mrb[30].mxu0  ;;  %v2387_v57 = vpop.f32.mrb[30].mxu1 }
 0x124   : > { %v973_v40 = vrot.slane %v854_v24, 2  ;;  %v2018_v29 = vadd.f32 %v2017_v34, %v1983_v46  ;;  %v975_v3 = vrot.slane %v2420_v45, 2  ;;  %v857_v62 = vpop.f32.mrb[31].mxu0  ;;  %vm1411_vm4 = vcmp.lt.s32.totalorder %v3652_v61, 0  ;;  %v685_v33 = vpop.f32.mrb[31].mxu1 }
 0x125   : > { %v1942_v21 = vadd.f32 %v1941_v27, %v1907_v11  ;;  %v1984_v35 = vmul.f32 %v1907_v11, %v1042_v26  ;;  %v1985_v16 = vmul.f32 %v1908_v5, %v1043_v39  ;;  %v3926_v36 = vadd.f32 %v682_v30, %v3676_v43 }
 0x126   : > { %v1029_v38 = vsel %vm1001_vm8, %v972_v42, %v973_v40  ;;  %v3931_v63 = vadd.f32 %v2387_v57, %v3751_v44  ;;  %v976_v32 = vrot.slane %v2421_v12, 2  ;;  %vm1422_vm10 = vcmp.lt.s32.totalorder %v3656_v18, 0 }
 0x127   : > { %v1943_v9 = vadd.f32 %v1942_v21, %v1908_v5  ;;  %v2019_v13 = vadd.f32 %v2018_v29, %v1984_v35  ;;  %v1045_v22 = vadd.f32 %v1029_v38, %v3840_v17  ;;  %v1986_v34 = vmul.f32 %v1909_v28, %v1044_v47 }
 0x128   : > { %v686_v26 = vadd.f32 %v685_v33, %v3680_v8  ;;  %v974_v39 = vrot.slane %v857_v62, 2  ;;  %v1430_v43 = vsub.s32 %v3717_v19, %v1429_v20  ;;  %v1026_v44 = vsel %vm1001_vm8, %v975_v3, %v976_v32 }
 0x129   : > { %v2020_v45 = vadd.f32 %v2019_v13, %v1985_v16  ;;  %v1910_v42 = vmul.f32 %v3147_v48, %v1045_v22  ;;  %v1944_v2 = vadd.f32 %v1943_v9, %v1909_v28  ;;  %v1048_v27 = vadd.f32 %v1026_v44, %v3880_v56  ;;  %v2424_v46 = vpop.f32.mrb[32].mxu0  ;;  %v2390_v58 = vpop.f32.mrb[32].mxu1 }
 0x12a   : > { %v1027_v17 = vsel %vm1001_vm8, %v974_v39, %v975_v3  ;;  %v1028_v47 = vsel %vm1001_vm8, %v973_v40, %v974_v39  ;;  %v1450_v8 = vshrl.u32 %v3915_v7, 4  ;;  %v870_v24 = vpop.f32.mrb[33].mxu0  ;;  %v3950_v5 = vadd.f32 %v2390_v58, %v3764_v4  ;;  %v698_v30 = vpop.f32.mrb[33].mxu1 }
 0x12b   : > { %v1945_v11 = vadd.f32 %v1944_v2, %v1910_v42  ;;  %v1987_v19 = vmul.f32 %v1910_v42, %v1045_v22  ;;  %v2021_v20 = vadd.f32 %v2020_v45, %v1986_v34  ;;  %v1046_v48 = vadd.f32 %v1028_v47, %v3886_v37  ;;  %v2425_v12 = vpop.f32.mrb[34].mxu0  ;;  %v2391_v37 = vpop.f32.mrb[34].mxu1 }
 0x12c   : > { %v1913_v28 = vmul.f32 %v3158_v50, %v1048_v27  ;;  %v1047_v56 = vadd.f32 %v1027_v17, %v3895_v6  ;;  %v1431_v40 = vsub.s32 0, %v1430_v43  ;;  %v3954_v35 = vadd.f32 %v698_v30, %v3782_v53  ;;  %v873_v57 = vpop.f32.mrb[35].mxu0  ;;  %v701_v16 = vpop.f32.mrb[35].mxu1 }
 0x12d   : > { %v2022_v29 = vadd.f32 %v2021_v20, %v1987_v19  ;;  %v1911_v21 = vmul.f32 %v3164_v31, %v1046_v48  ;;  %v977_v3 = vrot.slane %v870_v24, 2  ;;  %v979_v50 = vrot.slane %v2424_v46, 2  ;;  %v4536_v20 = vld [vmem:[#allocation7_spill] sm:$0xff] }
 0x12e   : > { %v1912_v62 = vmul.f32 %v3179_v60, %v1047_v56  ;;  %v3958_v6 = vadd.f32 %v2391_v37, %v3770_v51  ;;  %v980_v4 = vrot.slane %v2425_v12, 2  ;;  %v702_v31 = vadd.f32 %v701_v16, %v3786_v10 }
 0x12f   : > { %v1946_v38 = vadd.f32 %v1945_v11, %v1911_v21  ;;  %v1988_v33 = vmul.f32 %v1911_v21, %v1046_v48  ;;  %v1025_v9 = vsel %vm1001_vm8, %v976_v32, %v977_v3  ;;  %v978_v22 = vrot.slane %v873_v57, 2  ;;  %v4539_v21 = vld [vmem:[#allocation8_spill] sm:$0xff] }
 0x130   : > { %v1049_v53 = vadd.f32 %v1025_v9, %v3891_v1  ;;  %v1022_v13 = vsel %vm1001_vm8, %v979_v50, %v980_v4  ;;  %v3971_v60 = vsel %vm1411_vm4, %v1420_v0, %v3883_v15  ;;  %v1989_v34 = vmul.f32 %v1912_v62, %v1047_v56  ;;  %v4540_v57 = vld [vmem:[#allocation12_spill] sm:$0xff] }
 0x131   : > { %v1947_v51 = vadd.f32 %v1946_v38, %v1912_v62  ;;  %v2023_v39 = vadd.f32 %v2022_v29, %v1988_v33  ;;  %v1052_v32 = vadd.f32 %v1022_v13, %v3922_v52  ;;  %v1023_v1 = vsel %vm1001_vm8, %v978_v22, %v979_v50  ;;  %v2428_v42 = vpop.f32.mrb[36].mxu0  ;;  %v2394_v47 = vpop.f32.mrb[36].mxu1  ;;  %v4538_v29 = vld [vmem:[#allocation5_spill] sm:$0xff]  ;;  %v4541_v13 = vld [vmem:[#allocation10_spill] sm:$0xff] }
 0x132   : > { %v1914_v10 = vmul.f32 %v3218_v23, %v1049_v53  ;;  %v1024_v45 = vsel %vm1001_vm8, %v977_v3, %v978_v22  ;;  %v3981_v2 = vsel %vm1422_vm10, %v1431_v40, %v1430_v43  ;;  %v1990_v15 = vmul.f32 %v1913_v28, %v1048_v27  ;;  %v886_v52 = vpop.f32.mrb[37].mxu0  ;;  %v4535_v23 = vld [vmem:[#allocation3_spill] sm:$0xff]  ;;  %v714_v58 = vpop.f32.mrb[37].mxu1  ;;  %v4537_v43 = vld [vmem:[#allocation4_spill] sm:$0xff] }
 0x133   : > { %v2024_v0 = vadd.f32 %v2023_v39, %v1989_v34  ;;  %v1948_v44 = vadd.f32 %v1947_v51, %v1913_v28  ;;  %v1050_v17 = vadd.f32 %v1024_v45, %v3926_v36  ;;  %v1917_v11 = vmul.f32 %v4535_v23, %v1052_v32  ;;  %v2429_v24 = vpop.f32.mrb[38].mxu0  ;;  %v2395_v40 = vpop.f32.mrb[38].mxu1 }
 0x134   : > { %v1991_v46 = vmul.f32 %v1914_v10, %v1049_v53  ;;  %v1051_v19 = vadd.f32 %v1023_v1, %v686_v26  ;;  %v3986_v48 = vadd.f32 %v2394_v47, %v4536_v20  ;;  %v983_v27 = vrot.slane %v2428_v42, 2  ;;  %v889_v28 = vpop.f32.mrb[39].mxu0  ;;  %v717_v62 = vpop.f32.mrb[39].mxu1 }
 0x135   : > { %v1949_v56 = vadd.f32 %v1948_v44, %v1914_v10  ;;  %v2025_v30 = vadd.f32 %v2024_v0, %v1990_v15  ;;  %v1915_v12 = vmul.f32 %v4537_v43, %v1050_v17  ;;  %v3991_v3 = vadd.f32 %v714_v58, %v4539_v21  ;;  %v4544_v58 = vld [vmem:[#allocation13_spill] sm:$0xff] }
 0x136   : > { %v1916_v36 = vmul.f32 %v4538_v29, %v1051_v19  ;;  %v981_v37 = vrot.slane %v886_v52, 2  ;;  %v3994_v26 = vadd.f32 %v2395_v40, %v4540_v57  ;;  %v984_v33 = vrot.slane %v2429_v24, 2 }
 0x137   : > { %v2026_v50 = vadd.f32 %v2025_v30, %v1991_v46  ;;  %v1950_v16 = vadd.f32 %v1949_v56, %v1915_v12  ;;  %v1992_v38 = vmul.f32 %v1915_v12, %v1050_v17  ;;  %v3999_v22 = vadd.f32 %v717_v62, %v4541_v13  ;;  %v4542_v17 = vld [vmem:[#allocation6_spill] sm:$0xff]  ;;  %v4545_v12 = vld [vmem:[#allocation11_spill] sm:$0xff] }
 0x138   : > { %v1993_v9 = vmul.f32 %v1916_v36, %v1051_v19  ;;  %v1021_v53 = vsel %vm1001_vm8, %v980_v4, %v981_v37  ;;  %v982_v51 = vrot.slane %v889_v28, 2  ;;  %v1018_v1 = vsel %vm1001_vm8, %v983_v27, %v984_v33  ;;  %v4543_v19 = vld [vmem:[#allocation9_spill] sm:$0xff] }
 0x139   : > { %v1951_v34 = vadd.f32 %v1950_v16, %v1916_v36  ;;  %v2027_v39 = vadd.f32 %v2026_v50, %v1992_v38  ;;  %v1053_v10 = vadd.f32 %v1021_v53, %v3931_v63  ;;  %v1994_v45 = vmul.f32 %v1917_v11, %v1052_v32  ;;  %v2432_v0 = vpop.f32.mrb[40].mxu0  ;;  %v2398_v63 = vpop.f32.mrb[40].mxu1  ;;  %v4547_v36 = vld [vmem:[#allocation14_spill] sm:$0xff]  ;;  %v4548_v38 = vld [vmem:[#allocation16_spill] sm:$0xff] }
 0x13a   : > { %v1056_v42 = vadd.f32 %v1018_v1, %v3950_v5  ;;  %v1019_v15 = vsel %vm1001_vm8, %v982_v51, %v983_v27  ;;  %v1020_v4 = vsel %vm1001_vm8, %v981_v37, %v982_v51  ;;  %v902_v23 = vpop.f32.mrb[41].mxu0  ;;  %v4013_v5 = vadd.f32 %v2398_v63, %v4544_v58  ;;  %v730_v24 = vpop.f32.mrb[41].mxu1 }
 0x13b   : > { %v2028_v44 = vadd.f32 %v2027_v39, %v1993_v9  ;;  %v1918_v47 = vmul.f32 %v4542_v17, %v1053_v10  ;;  %v1952_v52 = vadd.f32 %v1951_v34, %v1917_v11  ;;  %v1054_v46 = vadd.f32 %v1020_v4, %v3954_v35  ;;  %v4015_v56 = vpop.f32.mrb[42].mxu0  ;;  %v2399_v27 = vpop.f32.mrb[42].mxu1  ;;  %v4549_v34 = vld [vmem:[#allocation15_spill] sm:$0xff] }
 0x13c   : > { %v1921_v20 = vmul.f32 %v4543_v19, %v1056_v42  ;;  %v1055_v32 = vadd.f32 %v1019_v15, %v702_v31  ;;  %vm1567_vm13 = vcmp.ne.s32.totalorder %v3971_v60, 0  ;;  %vm1603_vm11 = vcmp.lt.s32.totalorder %v3971_v60, 0  ;;  %v905_v40 = vpop.f32.mrb[43].mxu0  ;;  %v4546_v31 = vld [vmem:[#allocation17_spill] sm:$0xff]  ;;  %v733_v57 = vpop.f32.mrb[43].mxu1 }
 0x13d   : > { %v1953_v30 = vadd.f32 %v1952_v52, %v1918_v47  ;;  %v1995_v43 = vmul.f32 %v1918_v47, %v1053_v10  ;;  %v2029_v11 = vadd.f32 %v2028_v44, %v1994_v45  ;;  %v1919_v35 = vmul.f32 %v4545_v12, %v1054_v46  ;;  %v4550_v47 = vld [vmem:[#allocation20_spill] sm:$0xff]  ;;  %vm4067_vm9 = vmand %vm1603_vm11, %vm1567_vm13 }
 0x13e   : > { %vm1568_vm6 = vcmp.ne.s32.totalorder %v3981_v2, 0  ;;  %v1920_v28 = vmul.f32 %v4546_v31, %v1055_v32  ;;  %v987_v29 = vrot.slane %v2432_v0, 2  ;;  %v4023_v21 = vadd.f32 %v730_v24, %v4547_v36  ;;  %v4552_v31 = vld [vmem:[#allocation19_spill] sm:$0xff] }
 0x13f   : > { %v985_v37 = vrot.slane %v902_v23, 2  ;;  %v2030_v62 = vadd.f32 %v2029_v11, %v1995_v43  ;;  %v1954_v50 = vadd.f32 %v1953_v30, %v1919_v35  ;;  %v1996_v16 = vmul.f32 %v1919_v35, %v1054_v46 }
 0x140   : > { %v4026_v9 = vadd.f32 %v2399_v27, %v4548_v38  ;;  %v1997_v53 = vmul.f32 %v1920_v28, %v1055_v32  ;;  %v988_v51 = vrot.slane %v4015_v56, 2  ;;  %v4032_v39 = vadd.f32 %v733_v57, %v4549_v34  ;;  %v4551_v32 = vld [vmem:[#allocation18_spill] sm:$0xff] }
 0x141   : > { %v1017_v13 = vsel %vm1001_vm8, %v984_v33, %v985_v37  ;;  %v1955_v10 = vadd.f32 %v1954_v50, %v1920_v28  ;;  %v2031_v1 = vadd.f32 %v2030_v62, %v1996_v16  ;;  %v986_v15 = vrot.slane %v905_v40, 2  ;;  %v2436_v44 = vpop.f32.mrb[44].mxu0  ;;  %v2402_v23 = vpop.f32.mrb[44].mxu1  ;;  %v4553_v62 = vld [vmem:[#allocation24_spill] sm:$0xff] }
 0x142   : > { %v1057_v45 = vadd.f32 %v1017_v13, %v3958_v6  ;;  %v1998_v4 = vmul.f32 %v1921_v20, %v1056_v42  ;;  %v1014_v0 = vsel %vm1001_vm8, %v987_v29, %v988_v51  ;;  %vm1604_vm2 = vcmp.lt.s32.totalorder %v3981_v2, 0  ;;  %v918_v19 = vpop.f32.mrb[45].mxu0  ;;  %v746_v24 = vpop.f32.mrb[45].mxu1  ;;  %v4557_v13 = vld [vmem:[#allocation22_spill] sm:$0xff] }
 0x143   : > { %v1675_v17 = vadd.s32 18, %v3971_v60  ;;  %v2032_v33 = vadd.f32 %v2031_v1, %v1997_v53  ;;  %v1956_v46 = vadd.f32 %v1955_v10, %v1921_v20  ;;  %v1060_v63 = vadd.f32 %v1014_v0, %v3986_v48  ;;  %v4049_v56 = vpop.f32.mrb[46].mxu0  ;;  %v2403_v12 = vpop.f32.mrb[46].mxu1  ;;  %vm4082_vm15 = vmand %vm1604_vm2, %vm1568_vm6 }
 0x144   : > { %v1922_v52 = vmul.f32 %v4550_v47, %v1057_v45  ;;  %vm1783_vm7 = vcmp.lt.s32.totalorder %v3652_v61, 576  ;;  %v1015_v6 = vsel %vm1001_vm8, %v986_v15, %v987_v29  ;;  %v1016_v42 = vsel %vm1001_vm8, %v985_v37, %v986_v15  ;;  %v921_v35 = vpop.f32.mrb[47].mxu0  ;;  %v749_v36 = vpop.f32.mrb[47].mxu1 }
 0x145   : > { %v4047_v58 = vadd.f32 %v2402_v23, %v4551_v32  ;;  %v1676_v20 = vadd.s32 18, %v3981_v2  ;;  %vm1784_vm14 = vcmp.lt.s32.totalorder %v3656_v18, 576  ;;  %v2033_v43 = vadd.f32 %v2032_v33, %v1998_v4 }
 0x146   : > { %v1957_v48 = vadd.f32 %v1956_v46, %v1922_v52  ;;  %v1999_v30 = vmul.f32 %v1922_v52, %v1057_v45  ;;  %v1925_v11 = vmul.f32 %v3795_v14, %v1060_v63  ;;  %v1058_v27 = vadd.f32 %v1016_v42, %v3991_v3 }
 0x147   : > { %v1059_v40 = vadd.f32 %v1015_v6, %v3999_v22  ;;  %v4057_v28 = vadd.f32 %v746_v24, %v4552_v31  ;;  %v989_v29 = vrot.slane %v918_v19, 2  ;;  %v991_v57 = vrot.slane %v2436_v44, 2  ;;  %v4556_v22 = vld [vmem:[#allocation30_spill] sm:$0xff] }
 0x148   : > { %v2034_v37 = vadd.f32 %v2033_v43, %v1999_v30  ;;  %v4060_v50 = vadd.f32 %v2403_v12, %v4553_v62  ;;  %v992_v16 = vrot.slane %v4049_v56, 2  ;;  %v1923_v3 = vmul.f32 %v3814_v49, %v1058_v27 }
 0x149   : > { %v1924_v38 = vmul.f32 %v4556_v22, %v1059_v40  ;;  %v1013_v53 = vsel %vm1001_vm8, %v988_v51, %v989_v29  ;;  %v4076_v34 = vadd.f32 %v749_v36, %v4557_v13  ;;  %v2002_v1 = vmul.f32 %v1925_v11, %v1060_v63  ;;  %v4093_v33 = vpop.f32.mrb[48].mxu0  ;;  %v2406_v63 = vpop.f32.mrb[48].mxu1 }
 0x14a   : > { %v1061_v45 = vadd.f32 %v1013_v53, %v3994_v26  ;;  %v1010_v49 = vsel %vm1001_vm8, %v991_v57, %v992_v16  ;;  %v990_v15 = vrot.slane %v921_v35, 2  ;;  %v1958_v4 = vadd.f32 %v1957_v48, %v1923_v3  ;;  %v762_v6 = vpop.f32.mrb[49].mxu1  ;;  %v4562_v35 = vld [vmem:[#allocation26_spill] sm:$0xff] }
 0x14b   : > { %v2000_v51 = vmul.f32 %v1923_v3, %v1058_v27  ;;  %v1064_v0 = vadd.f32 %v1010_v49, %v4013_v5  ;;  %v1711_v44 = vsel %vm4067_vm9, %v1675_v17, %v3971_v60  ;;  %v1712_v46 = vsel %vm4082_vm15, %v1676_v20, %v3981_v2  ;;  %v4103_v5 = vpop.f32.mrb[49].mxu0  ;;  %v2407_v2 = vpop.f32.mrb[50].mxu1 }
 0x14c   : > { %v1926_v47 = vmul.f32 %v3868_v41, %v1061_v45  ;;  %v1011_v52 = vsel %vm1001_vm8, %v990_v15, %v991_v57  ;;  %v1012_v26 = vsel %vm1001_vm8, %v989_v29, %v990_v15  ;;  %v1959_v23 = vadd.f32 %v1958_v4, %v1924_v38  ;;  %v4560_v41 = vld [vmem:[#allocation27_spill] sm:$0xff]  ;;  %v4107_v42 = vpop.f32.mrb[50].mxu0  ;;  %v765_v12 = vpop.f32.mrb[51].mxu1  ;;  %v4563_v57 = vld [vmem:[#allocation28_spill] sm:$0xff]  ;;  %v4566_v4 = vld [vmem:[#allocation21_spill] sm:$0xff] }
 0x14d   : > { %v2001_v19 = vmul.f32 %v1924_v38, %v1059_v40  ;;  %v2035_v60 = vadd.f32 %v2034_v37, %v2000_v51  ;;  %v1062_v17 = vadd.f32 %v1012_v26, %v4023_v21  ;;  %vm1444_vm1 = vcmp.lt.s32.totalorder %v4560_v41, 0  ;;  %v937_v56 = vpop.f32.mrb[51].mxu0  ;;  %v4561_v21 = vld [vmem:[#allocation25_spill] sm:$0xff] }
 0x14e   : > { %v1929_v32 = vmul.f32 %v3911_v54, %v1064_v0  ;;  %v1063_v24 = vadd.f32 %v1011_v52, %v4032_v39  ;;  %vm1747_vm5 = vcmp.lt.s32.totalorder %v1711_v44, 16  ;;  %vm1748_vm0 = vcmp.lt.s32.totalorder %v1712_v46, 16  ;;  %v4568_v44 = vld [vmem:[#allocation23_spill] sm:$0xff] }
 0x14f   : > { %v2036_v20 = vadd.f32 %v2035_v60, %v2001_v19  ;;  %v1960_v48 = vadd.f32 %v1959_v23, %v1925_v11  ;;  %v2003_v30 = vmul.f32 %v1926_v47, %v1061_v45  ;;  %vm1819_vm3 = vmand %vm1747_vm5, %vm1783_vm7  ;;  %v4114_v43 = vadd.f32 %v2406_v63, %v4561_v21  ;;  %v4564_v45 = vld [vmem:[#allocation31_spill] sm:$0xff] }
 0x150   : > { %vm1820_vm4 = vmand %vm1748_vm0, %vm1784_vm14  ;;  %v2261_v54 = vsel %vm1819_vm3, 1.0, %v4493_v59  ;;  %v995_v39 = vrot.slane %v4093_v33, 2  ;;  %v4121_v27 = vadd.f32 %v762_v6, %v4562_v35  ;;  %v993_v11 = vrot.slane %v4103_v5, 2 }
 0x151   : > { %v1961_v40 = vadd.f32 %v1960_v48, %v1926_v47  ;;  %v2037_v31 = vadd.f32 %v2036_v20, %v2002_v1  ;;  %v2262_v61 = vsel %vm1820_vm4, 1.0, %v4493_v59  ;;  %v1927_v29 = vmul.f32 %v2261_v54, %v1062_v17  ;;  %v4133_v53 = vpop.f32.mrb[52].mxu0 }
 0x152   : > { %v1928_v36 = vmul.f32 %v2262_v61, %v1063_v24  ;;  %v1009_v37 = vsel %vm1001_vm8, %v992_v16, %v993_v11  ;;  %v1451_v18 = vmul.u32 18, %v1450_v8  ;;  %v4130_v62 = vadd.f32 %v2407_v2, %v4563_v57  ;;  %v4565_v16 = vld [vmem:[#allocation2_spill] sm:$0xff]  ;;  %v4141_v7 = vpop.f32.mrb[53].mxu0 }
 0x153   : > { %v2038_v14 = vadd.f32 %v2037_v31, %v2003_v30  ;;  %v1962_v3 = vadd.f32 %v1961_v40, %v1927_v29  ;;  %v2004_v22 = vmul.f32 %v1927_v29, %v1062_v17  ;;  %v1065_v38 = vadd.f32 %v1009_v37, %v4026_v9  ;;  %v2445_v52 = vpop.f32.mrb[54].mxu0 }
 0x154   : > { %v2005_v13 = vmul.f32 %v1928_v36, %v1063_v24  ;;  %v1452_v10 = vsub.s32 %v3864_v55, %v1451_v18  ;;  %v996_v1 = vrot.slane %v4107_v42, 2  ;;  %v4139_v49 = vadd.s32 %v4565_v16, %v4564_v45  ;;  %v4153_v63 = vpop.f32.mrb[55].mxu0 }
 0x155   : > { %v1963_v8 = vadd.f32 %v1962_v3, %v1928_v36  ;;  %v2039_v15 = vadd.f32 %v2038_v14, %v2004_v22  ;;  %v4567_v51 = vrot.slane %v4566_v4, 1  ;;  %v4569_v33 = vrot.slane %v4568_v44, 1 }
 0x156   : > { %v994_v47 = vrot.slane %v937_v56, 2  ;;  %v1453_v55 = vsub.s32 0, %v1452_v10  ;;  %vm1786_vm10 = vcmp.lt.s32.totalorder %v4560_v41, 576  ;;  %v1006_v26 = vsel %vm1001_vm8, %v995_v39, %v996_v1 }
 0x157   : > { %v557_v9 = vsel %vm555_vm12, %v4569_v33, %v4567_v51  ;;  %v1478_v46 = vsub.s32 0, %v4139_v49  ;;  %v2006_v5 = vmul.f32 %v1929_v32, %v1064_v0  ;;  %v2040_v23 = vadd.f32 %v2039_v15, %v2005_v13 }
 0x158   : > { %v1964_v19 = vadd.f32 %v1963_v8, %v1929_v32  ;;  %v4156_v60 = vadd.f32 %v1006_v26, %v4047_v58  ;;  %v1454_v17 = vsel %vm1444_vm1, %v1453_v55, %v1452_v10  ;;  %v4161_v42 = vadd.f32 %v765_v12, %v557_v9  ;;  %v4570_v9 = vld [vmem:[#allocation29_spill] sm:$0xff] }
 0x159   : > { %v2231_v6 = vmin.u32 %v1478_v46, %v4139_v49  ;;  %v1007_v24 = vsel %vm1001_vm8, %v994_v47, %v995_v39  ;;  %vm1570_vm12 = vcmp.ne.s32.totalorder %v1454_v17, 0  ;;  %vm1606_vm13 = vcmp.lt.s32.totalorder %v1454_v17, 0 }
 0x15a   : > { %v1678_v2 = vadd.s32 18, %v1454_v17  ;;  %v2041_v56 = vadd.f32 %v2040_v23, %v2006_v5  ;;  %vm1642_vm11 = vmand %vm1606_vm13, %vm1570_vm12  ;;  %v1008_v58 = vsel %vm1001_vm8, %v993_v11, %v994_v47  ;;  %v4171_v20 = vadd.f32 %v1007_v24, %v4076_v34 }
 0x15b   : > { %v4165_v0 = vmul.u32.u64.low 3817748708, %v2231_v6  ;;  %v4166_v32 = vmul.u32.u64.high 3817748708, %v2231_v6, %v4165_v0  ;;  %v4174_v30 = vadd.f32 %v1008_v58, %v4057_v28  ;;  %v1102_v21 = vadd.s32 224, %v2681_v25 }
 0x15c   : > { %v1714_v48 = vsel %vm1642_vm11, %v1678_v2, %v1454_v17  ;;  %v1103_v12 = vadd.s32 232, %v2681_v25  ;;  %v997_v54 = vrot.slane %v4141_v7, 2  ;;  %v1105_v39 = vadd.s32 248, %v2681_v25 }
 0x15d   : > { %vm1750_vm6 = vcmp.lt.s32.totalorder %v1714_v48, 16  ;;  %v4183_v35 = vadd.s32 %v4565_v16, %v1102_v21  ;;  %v1483_v11 = vshrl.u32 %v4166_v32, 4  ;;  %v1000_v37 = vrot.slane %v2445_v52, 2 }
 0x15e   : > { %vm1822_vm2 = vmand %vm1750_vm6, %vm1786_vm10  ;;  %v4186_v34 = vadd.s32 %v4565_v16, %v1103_v12  ;;  %v1005_v40 = vsel %vm1001_vm8, %v996_v1, %v997_v54  ;;  %v4195_v31 = vadd.s32 %v4565_v16, %v1105_v39  ;;  %v1108_v18 = vadd.s32 272, %v2681_v25 }
 0x15f   : > { %v2264_v28 = vsel %vm1822_vm2, 1.0, %v4493_v59  ;;  %v1456_v61 = vsub.s32 0, %v4183_v35  ;;  %v1484_v29 = vmul.u32 18, %v1483_v11  ;;  %v4204_v22 = vadd.f32 %v1005_v40, %v4060_v50 }
 0x160   : > { %v1930_v41 = vmul.f32 %v2264_v28, %v1065_v38  ;;  %v1467_v36 = vsub.s32 0, %v4186_v34  ;;  %vm1477_vm7 = vcmp.lt.s32.totalorder %v4139_v49, 0  ;;  %v1489_v1 = vsub.s32 0, %v4195_v31 }
 0x161   : > { %v2229_v3 = vmin.u32 %v1456_v61, %v4183_v35  ;;  %v1485_v13 = vsub.s32 %v2231_v6, %v1484_v29  ;;  %v999_v4 = vrot.slane %v4133_v53, 2  ;;  %v4571_v47 = vrot.slane %v4570_v9, 2 }
 0x162   : > { %v4200_v57 = vadd.f32 %v1964_v19, %v1930_v41  ;;  %v2007_v14 = vmul.f32 %v1930_v41, %v1065_v38  ;;  %v2230_v10 = vmin.u32 %v1467_v36, %v4186_v34  ;;  %v2232_v50 = vmin.u32 %v1489_v1, %v4195_v31 }
 0x163   : > { %v4211_v8 = vmul.u32.u64.low 3817748708, %v2229_v3  ;;  %v4212_v15 = vmul.u32.u64.high 3817748708, %v2229_v3, %v4211_v8  ;;  %v1486_v38 = vsub.s32 0, %v1485_v13  ;;  %v1002_v33 = vsel %vm1001_vm8, %v999_v4, %v1000_v37 }
 0x164   : > { %v4209_v45 = vadd.f32 %v2041_v56, %v2007_v14  ;;  %v4215_v51 = vmul.u32.u64.low 3817748708, %v2230_v10  ;;  %v4216_v44 = vmul.u32.u64.high 3817748708, %v2230_v10, %v4215_v51  ;;  %v1037_v52 = vsel %vm1001_vm8, %v1000_v37, %v4571_v47 }
 0x165   : > { %v1109_v55 = vadd.s32 280, %v2681_v25  ;;  %v4227_v26 = vadd.s32 %v4565_v16, %v1108_v18  ;;  %v1487_v53 = vsel %vm1477_vm7, %v1486_v38, %v1485_v13  ;;  %v4233_v23 = vadd.f32 %v1002_v33, %v4114_v43 }
 0x166   : > { %v4229_v46 = vmul.u32.u64.low 3817748708, %v2232_v50  ;;  %v4230_v5 = vmul.u32.u64.high 3817748708, %v2232_v50, %v4229_v46  ;;  %vm1573_vm14 = vcmp.ne.s32.totalorder %v1487_v53, 0  ;;  %vm1609_vm9 = vcmp.lt.s32.totalorder %v1487_v53, 0 }
 0x167   : > { %v1681_v19 = vadd.s32 18, %v1487_v53  ;;  %v1461_v17 = vshrl.u32 %v4212_v15, 4  ;;  %vm1645_vm15 = vmand %vm1609_vm9, %vm1573_vm14  ;;  %vm1789_vm1 = vcmp.lt.s32.totalorder %v4139_v49, 576  ;;  %v1472_v6 = vshrl.u32 %v4216_v44, 4 }
 0x168   : > { %v4239_v24 = vadd.f32 %v1037_v52, %v4130_v62  ;;  %v4242_v2 = vadd.s32 %v4565_v16, %v1109_v55  ;;  %vm1455_vm5 = vcmp.lt.s32.totalorder %v4183_v35, 0  ;;  %v1522_v0 = vsub.s32 0, %v4227_v26 }
 0x169   : > { %v1717_v56 = vsel %vm1645_vm15, %v1681_v19, %v1487_v53  ;;  %v1462_v43 = vmul.u32 18, %v1461_v17  ;;  %vm1466_vm3 = vcmp.lt.s32.totalorder %v4186_v34, 0  ;;  %v1473_v32 = vmul.u32 18, %v1472_v6 }
 0x16a   : > { %vm1753_vm0 = vcmp.lt.s32.totalorder %v1717_v56, 16  ;;  %v1494_v58 = vshrl.u32 %v4230_v5, 4  ;;  %vm1787_vm4 = vcmp.lt.s32.totalorder %v4183_v35, 576  ;;  %v2235_v62 = vmin.u32 %v1522_v0, %v4227_v26 }
 0x16b   : > { %v1463_v48 = vsub.s32 %v2229_v3, %v1462_v43  ;;  %v1533_v21 = vsub.s32 0, %v4242_v2  ;;  %vm1825_vm10 = vmand %vm1753_vm0, %vm1789_vm1  ;;  %v1474_v12 = vsub.s32 %v2230_v10, %v1473_v32  ;;  %vm1788_vm12 = vcmp.lt.s32.totalorder %v4186_v34, 576 }
 0x16c   : > { %v1495_v39 = vmul.u32 18, %v1494_v58  ;;  %v998_v28 = vrot.slane %v4153_v63, 2  ;;  %vm1488_vm13 = vcmp.lt.s32.totalorder %v4195_v31, 0  ;;  %vm1790_vm11 = vcmp.lt.s32.totalorder %v4195_v31, 576 }
 0x16d   : > { %v1464_v11 = vsub.s32 0, %v1463_v48  ;;  %v4256_v40 = vmul.u32.u64.low 3817748708, %v2235_v62  ;;  %v4257_v41 = vmul.u32.u64.high 3817748708, %v2235_v62, %v4256_v40  ;;  %v1475_v61 = vsub.s32 0, %v1474_v12 }
 0x16e   : > { %v1496_v29 = vsub.s32 %v2232_v50, %v1495_v39  ;;  %v2236_v36 = vmin.u32 %v1533_v21, %v4242_v2  ;;  %v1003_v49 = vsel %vm1001_vm8, %v998_v28, %v999_v4  ;;  %v2267_v37 = vsel %vm1825_vm10, 1.0, %v4493_v59 }
 0x16f   : > { %v1465_v63 = vsel %vm1455_vm5, %v1464_v11, %v1463_v48  ;;  %v1004_v18 = vsel %vm1001_vm8, %v997_v54, %v998_v28  ;;  %v4271_v14 = vadd.f32 %v1003_v49, %v4161_v42  ;;  %v1476_v3 = vsel %vm1466_vm3, %v1475_v61, %v1474_v12 }
 0x170   : > { %vm1571_vm6 = vcmp.ne.s32.totalorder %v1465_v63, 0  ;;  %vm1607_vm2 = vcmp.lt.s32.totalorder %v1465_v63, 0  ;;  %v1679_v13 = vadd.s32 18, %v1465_v63  ;;  %vm1572_vm7 = vcmp.ne.s32.totalorder %v1476_v3, 0 }
 0x171   : > { %vm1608_vm14 = vcmp.lt.s32.totalorder %v1476_v3, 0  ;;  %vm1643_vm9 = vmand %vm1607_vm2, %vm1571_vm6  ;;  %v1680_v10 = vadd.s32 18, %v1476_v3  ;;  %v1497_v1 = vsub.s32 0, %v1496_v29  ;;  %v1527_v7 = vshrl.u32 %v4257_v41, 4 }
 0x172   : > { %vm1644_vm15 = vmand %vm1608_vm14, %vm1572_vm7  ;;  %v1715_v8 = vsel %vm1643_vm9, %v1679_v13, %v1465_v63  ;;  %v4276_v15 = vmul.u32.u64.low 3817748708, %v2236_v36  ;;  %v4277_v54 = vmul.u32.u64.high 3817748708, %v2236_v36, %v4276_v15  ;;  %v4282_v38 = vadd.f32 %v1004_v18, %v4121_v27 }
 0x173   : > { %v1716_v42 = vsel %vm1644_vm15, %v1680_v10, %v1476_v3  ;;  %vm1751_vm8 = vcmp.lt.s32.totalorder %v1715_v8, 16  ;;  %v1498_v4 = vsel %vm1488_vm13, %v1497_v1, %v1496_v29  ;;  %v1528_v50 = vmul.u32 18, %v1527_v7 }
 0x174   : > { %vm1752_vm1 = vcmp.lt.s32.totalorder %v1716_v42, 16  ;;  %vm1823_vm5 = vmand %vm1751_vm8, %vm1787_vm4  ;;  %vm1574_vm0 = vcmp.ne.s32.totalorder %v1498_v4, 0  ;;  %vm1610_vm3 = vcmp.lt.s32.totalorder %v1498_v4, 0  ;;  %v1682_v51 = vadd.s32 18, %v1498_v4 }
 0x175   : > { %vm1824_vm10 = vmand %vm1752_vm1, %vm1788_vm12  ;;  %v2265_v44 = vsel %vm1823_vm5, 1.0, %v4493_v59  ;;  %v1106_v33 = vadd.s32 256, %v2681_v25  ;;  %v1107_v9 = vadd.s32 264, %v2681_v25  ;;  %v1933_v27 = vmul.f32 %v2267_v37, %v4156_v60 }
 0x176   : > { %v2266_v47 = vsel %vm1824_vm10, 1.0, %v4493_v59  ;;  %v1931_v35 = vmul.f32 %v2265_v44, %v4174_v30  ;;  %vm1646_vm4 = vmand %vm1610_vm3, %vm1574_vm0  ;;  %v1538_v52 = vshrl.u32 %v4277_v54, 4  ;;  %v1529_v53 = vsub.s32 %v2235_v62, %v1528_v50 }
 0x177   : > { %v1932_v55 = vmul.f32 %v2266_v47, %v4171_v20  ;;  %v1718_v34 = vsel %vm1646_vm4, %v1682_v51, %v1498_v4  ;;  %v4297_v46 = vadd.s32 %v4565_v16, %v1106_v33  ;;  %v4305_v6 = vadd.s32 %v4565_v16, %v1107_v9 }
 0x178   : > { %v1966_v5 = vadd.f32 %v4200_v57, %v1931_v35  ;;  %v2008_v25 = vmul.f32 %v1931_v35, %v4174_v30  ;;  %vm1754_vm12 = vcmp.lt.s32.totalorder %v1718_v34, 16  ;;  %v1539_v19 = vmul.u32 18, %v1538_v52 }
 0x179   : > { %v2009_v17 = vmul.f32 %v1932_v55, %v4171_v20  ;;  %vm1826_vm13 = vmand %vm1754_vm12, %vm1790_vm11  ;;  %vm1521_vm6 = vcmp.lt.s32.totalorder %v4227_v26, 0  ;;  %v1530_v30 = vsub.s32 0, %v1529_v53  ;;  %v1500_v58 = vsub.s32 0, %v4297_v46 }
 0x17a   : > { %v1967_v56 = vadd.f32 %v1966_v5, %v1932_v55  ;;  %v2043_v43 = vadd.f32 %v4209_v45, %v2008_v25  ;;  %v2268_v0 = vsel %vm1826_vm13, 1.0, %v4493_v59  ;;  %v1540_v32 = vsub.s32 %v2236_v36, %v1539_v19 }
 0x17b   : > { %v1934_v57 = vmul.f32 %v2268_v0, %v4204_v22  ;;  %v2010_v20 = vmul.f32 %v1933_v27, %v4156_v60  ;;  %vm1532_vm11 = vcmp.lt.s32.totalorder %v4242_v2, 0  ;;  %v2233_v45 = vmin.u32 %v1500_v58, %v4297_v46 }
 0x17c   : > { %v2044_v31 = vadd.f32 %v2043_v43, %v2009_v17  ;;  %v1968_v48 = vadd.f32 %v1967_v56, %v1933_v27  ;;  %v1541_v62 = vsub.s32 0, %v1540_v32  ;;  %v1511_v39 = vsub.s32 0, %v4305_v6 }
 0x17d   : > { %v2011_v16 = vmul.f32 %v1934_v57, %v4204_v22  ;;  %v1531_v28 = vsel %vm1521_vm6, %v1530_v30, %v1529_v53  ;;  %v4319_v41 = vmul.u32.u64.low 3817748708, %v2233_v45  ;;  %v4320_v61 = vmul.u32.u64.high 3817748708, %v2233_v45, %v4319_v41 }
 0x17e   : > { %v1969_v21 = vadd.f32 %v1968_v48, %v1934_v57  ;;  %v2045_v12 = vadd.f32 %v2044_v31, %v2010_v20  ;;  %v1542_v40 = vsel %vm1532_vm11, %v1541_v62, %v1540_v32  ;;  %v2234_v60 = vmin.u32 %v1511_v39, %v4305_v6 }
 0x17f   : > { %vm1577_vm2 = vcmp.ne.s32.totalorder %v1531_v28, 0  ;;  %vm1613_vm7 = vcmp.lt.s32.totalorder %v1531_v28, 0  ;;  %vm1578_vm14 = vcmp.ne.s32.totalorder %v1542_v40, 0  ;;  %vm1614_vm9 = vcmp.lt.s32.totalorder %v1542_v40, 0 }
 0x180   : > { %v4317_v11 = vadd.f32 %v2045_v12, %v2011_v16  ;;  %v4323_v22 = vmul.u32.u64.low 3817748708, %v2234_v60  ;;  %v4324_v29 = vmul.u32.u64.high 3817748708, %v2234_v60, %v4323_v22  ;;  %v1505_v36 = vshrl.u32 %v4320_v61, 4  ;;  %vm4327_vm15 = vmand %vm1613_vm7, %vm1577_vm2 }
 0x181   : > { %v1685_v37 = vadd.s32 18, %v1531_v28  ;;  %v1686_v63 = vadd.s32 18, %v1542_v40  ;;  %vm1650_vm8 = vmand %vm1614_vm9, %vm1578_vm14  ;;  %vm1499_vm1 = vcmp.lt.s32.totalorder %v4297_v46, 0  ;;  %vm1793_vm5 = vcmp.lt.s32.totalorder %v4227_v26, 576 }
 0x182   : > { %v1506_v18 = vmul.u32 18, %v1505_v36  ;;  %v1516_v3 = vshrl.u32 %v4324_v29, 4  ;;  %vm1794_vm0 = vcmp.lt.s32.totalorder %v4242_v2, 576  ;;  %vm1510_vm4 = vcmp.lt.s32.totalorder %v4305_v6, 0 }
 0x183   : > { %v1721_v10 = vsel %vm4327_vm15, %v1685_v37, %v1531_v28  ;;  %v1722_v1 = vsel %vm1650_vm8, %v1686_v63, %v1542_v40  ;;  %vm1791_vm2 = vcmp.lt.s32.totalorder %v4297_v46, 576 }
 0x184   : > { %v1507_v13 = vsub.s32 %v2233_v45, %v1506_v18  ;;  %v1517_v8 = vmul.u32 18, %v1516_v3  ;;  %vm1757_vm3 = vcmp.lt.s32.totalorder %v1721_v10, 16  ;;  %vm1758_vm10 = vcmp.lt.s32.totalorder %v1722_v1, 16 }
 0x185   : > { %vm1829_vm11 = vmand %vm1757_vm3, %vm1793_vm5  ;;  %vm2059_vm3 = vcmask 1041408  }
 0x186   : > { %v1508_v7 = vsub.s32 0, %v1507_v13  ;;  %v1518_v15 = vsub.s32 %v2234_v60, %v1517_v8  ;;  %vm1830_vm7 = vmand %vm1758_vm10, %vm1794_vm0  ;;  %v2271_v33 = vsel %vm1829_vm11, 1.0, %v4493_v59  ;;  %vm2057_vm0 = vcmask 1040384  }
 0x187   : > { %v2272_v2 = vsel %vm1830_vm7, 1.0, %v4493_v59  ;;  %v1937_v35 = vmul.f32 %v2271_v33, %v4233_v23 }
 0x188   : > { %v1509_v54 = vsel %vm1499_vm1, %v1508_v7, %v1507_v13  ;;  %v1519_v42 = vsub.s32 0, %v1518_v15  ;;  %vm1792_vm1 = vcmp.lt.s32.totalorder %v4305_v6, 576  ;;  %v1938_v53 = vmul.f32 %v2272_v2, %v4239_v24 }
 0x189   : > { %vm1575_vm12 = vcmp.ne.s32.totalorder %v1509_v54, 0  ;;  %vm1611_vm13 = vcmp.lt.s32.totalorder %v1509_v54, 0  ;;  %v1683_v4 = vadd.s32 18, %v1509_v54  ;;  %v2014_v19 = vmul.f32 %v1937_v35, %v4233_v23 }
 0x18a   : > { %vm1647_vm6 = vmand %vm1611_vm13, %vm1575_vm12  ;;  %v1520_v51 = vsel %vm1510_vm4, %v1519_v42, %v1518_v15  ;;  %v2015_v6 = vmul.f32 %v1938_v53, %v4239_v24 }
 0x18b   : > { %v1719_v44 = vsel %vm1647_vm6, %v1683_v4, %v1509_v54  ;;  %vm1576_vm14 = vcmp.ne.s32.totalorder %v1520_v51, 0  ;;  %vm1612_vm9 = vcmp.lt.s32.totalorder %v1520_v51, 0  ;;  %v1684_v26 = vadd.s32 18, %v1520_v51 }
 0x18c   : > { %vm1755_vm15 = vcmp.lt.s32.totalorder %v1719_v44, 16  ;;  %vm1648_vm8 = vmand %vm1612_vm9, %vm1576_vm14 }
 0x18d   : > { %v1720_v50 = vsel %vm1648_vm8, %v1684_v26, %v1520_v51  ;;  %vm1827_vm12 = vmand %vm1755_vm15, %vm1791_vm2 }
 0x18e   : > { %vm1756_vm13 = vcmp.lt.s32.totalorder %v1720_v50, 16  ;;  %v2269_v9 = vsel %vm1827_vm12, 1.0, %v4493_v59 }
 0x18f   : > { %vm1828_vm5 = vmand %vm1756_vm13, %vm1792_vm1  ;;  %v1935_v27 = vmul.f32 %v2269_v9, %v4282_v38 }
 0x190   : > { %v2270_v47 = vsel %vm1828_vm5, 1.0, %v4493_v59 }
 0x191   : > { %v1936_v52 = vmul.f32 %v2270_v47, %v4271_v14  ;;  %v1970_v55 = vadd.f32 %v1969_v21, %v1935_v27  ;;  %v2012_v34 = vmul.f32 %v1935_v27, %v4282_v38 }
 0x193   : > { %v1971_v46 = vadd.f32 %v1970_v55, %v1936_v52  ;;  %v2013_v5 = vmul.f32 %v1936_v52, %v4271_v14  ;;  %v2047_v25 = vadd.f32 %v4317_v11, %v2012_v34 }
 0x195   : > { %v1972_v17 = vadd.f32 %v1971_v46, %v1937_v35  ;;  %v2048_v59 = vadd.f32 %v2047_v25, %v2013_v5 }
 0x197   : > { %v1973_v56 = vadd.f32 %v1972_v17, %v1938_v53  ;;  %v2049_v43 = vadd.f32 %v2048_v59, %v2014_v19 }
 0x199   : > { %v1974_v0 = vrot.slane %v1973_v56, 4  ;;  %v2050_v32 = vadd.f32 %v2049_v43, %v2015_v6 }
 0x19b   : > { %v1975_v38 = vadd.f32 %v1974_v0, %v1973_v56  ;;  %v2051_v57 = vrot.slane %v2050_v32, 4 }
 0x19d   : > { %v1976_v30 = vrot.slane %v1975_v38, 2  ;;  %v2052_v58 = vadd.f32 %v2051_v57, %v2050_v32 }
 0x19f   : > { %v1977_v20 = vadd.f32 %v1976_v30, %v1975_v38  ;;  %v2053_v14 = vrot.slane %v2052_v58, 2 }
 0x1a1   : > { %v1978_v31 = vrot.slane %v1977_v20, 1  ;;  %v2054_v48 = vadd.f32 %v2053_v14, %v2052_v58 }
 0x1a3   : > { %v2055_v23 = vrot.slane %v2054_v48, 1  ;;  %v1979_v62 = vadd.f32 %v1978_v31, %v1977_v20 }
 0x1a5   : > { %v2056_v16 = vadd.f32 %v2055_v23, %v2054_v48 }
 0x1a7   : > { %v2058_v24 = vsel %vm2057_vm0, %v1979_v62, %v2056_v16 }
 0x1a8   : > { %v2060_v45 = vsel %vm2059_vm3, %v2058_v24, 0.0 }
 0x1a9   : > { %2061 = vst [vmem:[%s143_s26] sm:$0xff] %v2060_v45 }
 0x1aa PF: > { %s12_s9 = sadd.s32 1, %s2560_s9  }
 0x1ab   : > { %p9_p5 = scmp.ge.s32.totalorder %s12_s9, 4  }
 0x1ad   :  { %11 = sbr.rel (!%p9_p5) target bundleno = 1 (0x1), region = 60 }

// kernel: score_forward.7
= control target key start
LH: loop header
LB: loop body
LE: loop exit
PB: predicated region body
PF: predicated region fallthrough
CT: control target
= control target key end

     0   :  { %s2035_s15 = smov 0   ;;  %s2741_s0 = inlined_call_operand.vmem [shape: bf16[576,12], index: 0, kind: input, shape index: {}]   ;;  %s2742_s1 = inlined_call_operand.vmem [shape: bf16[3,12,128], index: 1, kind: input, shape index: {}]   ;;  %s2743_s2 = inlined_call_operand.vmem [shape: f32[1,128], index: 2, kind: input, shape index: {}]   ;;  %s2744_s3 = inlined_call_operand.vmem [shape: f32[1,128], index: 3, kind: input, shape index: {}]   ;;  %s2745_s4 = inlined_call_operand.vmem [shape: f32[576,1], index: 4, kind: output, shape index: {}]  }
   0x1 LB: > { %s1526_s16 = sadd.s32 4294967295, %s2008_s15   ;;  %p1530_p0 = scmp.ge.s32.totalorder %s2008_s15, 1  ;;  %s2008_s15 = sphi %s2035_s15, %s14_s15  }
   0x2   : > { %p163_p1 = scmp.lt.s32.totalorder %s2008_s15, 3 }
   0x4   : > { %p164_p2 = pnand %p1530_p0, %p163_p1 }
   0x5   : > { %v1837_v0 = vld [vmem:[%s2742_s1 + $0x8] sm:$0x3f] (!%p164_p2)   ;;  %vm393_vm0 = vcmask (!%p164_p2), 1045504   ;;  %s189_s19 = smul.u32 (!%p164_p2), 36, %s1526_s16  ;;  %v1840_v2 = vld [vmem:[%s2742_s1 + $0x10] sm:$0x3f] (!%p164_p2)   ;;  %v610_v24 = vlaneseq (!%p164_p2) }
   0x6   : > { %167 = sbr.rel (%p164_p2) target bundleno = 391 (0x187), region = 36  ;;  %1825 = vmatprep.subr.msk.bf16.mxu0 (!%p164_p2), %vm393_vm0, %v1837_v0  ;;  %1826 = vmatprep.subr.msk.bf16.mxu1 (!%p164_p2), %vm393_vm0, %v1837_v0  ;;  %v395_v1 = vsel (!%p164_p2), %vm393_vm0, %v1837_v0, 0  ;;  %v1847_v3 = vld [vmem:[%s2742_s1] sm:$0x3f] (!%p164_p2)   ;;  %vm338_vm1 = vcmask (!%p164_p2), 97280   ;;  %v843_v7 = vsel (!%p164_p2), %vm393_vm0, %v1840_v2, 0 }
   0x7   : > { %1710 = vmatpush3.bf16.msra.mxu0 (!%p164_p2), %v395_v1  ;;  %1824 = vmatpush3.bf16.msra.mxu1 (!%p164_p2), %v395_v1  ;;  %p190_p3 = scmp.lt.s32.totalorder (!%p164_p2), %s189_s19, 71  ;;  %v655_v9 = vsel (!%p164_p2), %vm393_vm0, %v1847_v3, 0  ;;  %v2139_v25 = vshrl.u32 (!%p164_p2), %v610_v24, 7  ;;  %vm1433_vm4 = vcmask (!%p164_p2), 7168  }
   0x8   : > { %1828 = vmatprep.subr.msk.bf16.mxu0 (!%p164_p2), %vm393_vm0, %v1840_v2  ;;  %1827 = vmatprep.subr.msk.bf16.mxu1 (!%p164_p2), %vm393_vm0, %v1847_v3 }
   0x9   : > { %vm612_vm2 = vcmp.lt.s32.totalorder (!%p164_p2), %v2139_v25, 7  ;;  %vm1058_vm3 = vcmp.lt.s32.totalorder (!%p164_p2), %v2139_v25, 6 }
   0xd   : > { %s2747_s19 = smov (!%p190_p3, %s189_s19), 71 }
   0xe   : > { %s1531_s24 = sshll.u32 %s2747_s19, 2  ;;  %s1532_s6 = sshll.u32 %s2747_s19, 3 }
   0xf   : > { %s2063_s27 = scalar_lea.vmem %s2741_s0, %s1531_s24  ;;  %s2431_s9 = scalar_lea.vmem %s2745_s4, %s1532_s6 }
  0x10   : > { %v1838_v4 = vld [vmem:[%s2063_s27] sm:$0xff]   ;;  %v1839_v5 = vld [vmem:[%s2063_s27 + $0x50] sm:$0xff]   ;;  %v1841_v6 = vld [vmem:[%s2063_s27 + $0x8] sm:$0xff]  }
  0x11   : > { %1711 = vmatprep.mubr.msk.bf16.mxu0 %vm338_vm1, %v1838_v4  ;;  %1731 = vmatprep.mubr.msk.bf16.mxu1 %vm338_vm1, %v1839_v5  ;;  %v1842_v8 = vld [vmem:[%s2063_s27 + $0x58] sm:$0xff]   ;;  %v1843_v10 = vld [vmem:[%s2063_s27 + $0x10] sm:$0xff]   ;;  %v1844_v11 = vld [vmem:[%s2063_s27 + $0x60] sm:$0xff]  }
  0x12   : > { %1712 = vmatmul.mubr.msk.bf16.vlgmr.msra.gmra.mrb[0].mxu0 %vm338_vm1, %v1841_v6  ;;  %1732 = vmatmul.mubr.msk.bf16.vlgmr.msra.gmra.mrb[0].mxu1 %vm338_vm1, %v1842_v8  ;;  %v1845_v12 = vld [vmem:[%s2063_s27 + $0x18] sm:$0xff]   ;;  %v1846_v13 = vld [vmem:[%s2063_s27 + $0x68] sm:$0xff]   ;;  %v1848_v14 = vld [vmem:[%s2063_s27 + $0x20] sm:$0xff]  }
  0x13   : > { %1786 = vmatpush3.bf16.msra.mxu0 %v843_v7  ;;  %1715 = vmatprep.mubr.msk.bf16.mxu0 %vm338_vm1, %v1843_v10  ;;  %v1849_v15 = vld [vmem:[%s2063_s27 + $0x70] sm:$0xff]   ;;  %v1850_v16 = vld [vmem:[%s2063_s27 + $0x28] sm:$0xff]   ;;  %v1851_v17 = vld [vmem:[%s2063_s27 + $0x78] sm:$0xff]  }
  0x14   : > { %1748 = vmatpush3.bf16.msra.mxu1 %v655_v9  ;;  %1735 = vmatprep.mubr.msk.bf16.mxu1 %vm338_vm1, %v1844_v11  ;;  %v1852_v18 = vld [vmem:[%s2063_s27 + $0x30] sm:$0xff]   ;;  %v1853_v19 = vld [vmem:[%s2063_s27 + $0x80] sm:$0xff]   ;;  %v1854_v20 = vld [vmem:[%s2063_s27 + $0x38] sm:$0xff]  }
  0x15   : > { %v1855_v21 = vld [vmem:[%s2063_s27 + $0x88] sm:$0xff]   ;;  %v1856_v22 = vld [vmem:[%s2063_s27 + $0x40] sm:$0xff]  }
  0x16   : > { %v1857_v23 = vld [vmem:[%s2063_s27 + $0x48] sm:$0xff]  }
  0x1a   : > { %1716 = vmatmul.mubr.msk.bf16.gmra.mrb[4].mxu0 %vm338_vm1, %v1845_v12  ;;  %1736 = vmatmul.mubr.msk.bf16.gmra.mrb[4].mxu1 %vm338_vm1, %v1846_v13 }
  0x1b   : > { %1719 = vmatprep.mubr.msk.bf16.mxu0 %vm338_vm1, %v1848_v14  ;;  %1739 = vmatprep.mubr.msk.bf16.mxu1 %vm338_vm1, %v1849_v15 }
  0x22   : > { %1720 = vmatmul.mubr.msk.bf16.gmra.mrb[8].mxu0 %vm338_vm1, %v1850_v16  ;;  %1740 = vmatmul.mubr.msk.bf16.gmra.mrb[8].mxu1 %vm338_vm1, %v1851_v17 }
  0x23   : > { %1723 = vmatprep.mubr.msk.bf16.mxu0 %vm338_vm1, %v1852_v18  ;;  %1743 = vmatprep.mubr.msk.bf16.mxu1 %vm338_vm1, %v1853_v19 }
  0x2a   : > { %1724 = vmatmul.mubr.msk.bf16.gmra.mrb[12].mxu0 %vm338_vm1, %v1854_v20  ;;  %1744 = vmatmul.mubr.msk.bf16.gmra.mrb[12].mxu1 %vm338_vm1, %v1855_v21 }
  0x2b   : > { %1727 = vmatprep.mubr.msk.bf16.mxu0 %vm338_vm1, %v1856_v22  ;;  %1749 = vmatprep.mubr.msk.bf16.mxu1 %vm338_vm1, %v1838_v4 }
  0x32   : > { %1728 = vmatmul.mubr.msk.bf16.gmra.mrb[16].mxu0 %vm338_vm1, %v1857_v23  ;;  %1750 = vmatmul.mubr.msk.bf16.vlgmr.msra.gmra.mrb[16].mxu1 %vm338_vm1, %v1841_v6 }
  0x33   : > { %1787 = vmatprep.mubr.msk.bf16.mxu0 %vm338_vm1, %v1838_v4  ;;  %1753 = vmatprep.mubr.msk.bf16.mxu1 %vm338_vm1, %v1843_v10 }
  0x3a   : > { %1788 = vmatmul.mubr.msk.bf16.vlgmr.msra.gmra.mrb[20].mxu0 %vm338_vm1, %v1841_v6  ;;  %1754 = vmatmul.mubr.msk.bf16.gmra.mrb[20].mxu1 %vm338_vm1, %v1845_v12 }
  0x3b   : > { %1791 = vmatprep.mubr.msk.bf16.mxu0 %vm338_vm1, %v1843_v10  ;;  %1757 = vmatprep.mubr.msk.bf16.mxu1 %vm338_vm1, %v1848_v14 }
  0x42   : > { %1792 = vmatmul.mubr.msk.bf16.gmra.mrb[24].mxu0 %vm338_vm1, %v1845_v12  ;;  %1758 = vmatmul.mubr.msk.bf16.gmra.mrb[24].mxu1 %vm338_vm1, %v1850_v16 }
  0x43   : > { %1795 = vmatprep.mubr.msk.bf16.mxu0 %vm338_vm1, %v1848_v14  ;;  %1761 = vmatprep.mubr.msk.bf16.mxu1 %vm338_vm1, %v1852_v18 }
  0x4a   : > { %1796 = vmatmul.mubr.msk.bf16.gmra.mrb[28].mxu0 %vm338_vm1, %v1850_v16  ;;  %1762 = vmatmul.mubr.msk.bf16.gmra.mrb[28].mxu1 %vm338_vm1, %v1854_v20 }
  0x4b   : > { %1799 = vmatprep.mubr.msk.bf16.mxu0 %vm338_vm1, %v1852_v18  ;;  %1765 = vmatprep.mubr.msk.bf16.mxu1 %vm338_vm1, %v1856_v22 }
  0x52   : > { %1800 = vmatmul.mubr.msk.bf16.gmra.mrb[32].mxu0 %vm338_vm1, %v1854_v20  ;;  %1766 = vmatmul.mubr.msk.bf16.gmra.mrb[32].mxu1 %vm338_vm1, %v1857_v23 }
  0x53   : > { %1803 = vmatprep.mubr.msk.bf16.mxu0 %vm338_vm1, %v1856_v22  ;;  %1769 = vmatprep.mubr.msk.bf16.mxu1 %vm338_vm1, %v1839_v5 }
  0x5a   : > { %1804 = vmatmul.mubr.msk.bf16.gmra.mrb[36].mxu0 %vm338_vm1, %v1857_v23  ;;  %1770 = vmatmul.mubr.msk.bf16.gmra.mrb[36].mxu1 %vm338_vm1, %v1842_v8 }
  0x5b   : > { %1807 = vmatprep.mubr.msk.bf16.mxu0 %vm338_vm1, %v1839_v5  ;;  %1773 = vmatprep.mubr.msk.bf16.mxu1 %vm338_vm1, %v1844_v11 }
  0x62   : > { %1808 = vmatmul.mubr.msk.bf16.gmra.mrb[40].mxu0 %vm338_vm1, %v1842_v8  ;;  %1774 = vmatmul.mubr.msk.bf16.gmra.mrb[40].mxu1 %vm338_vm1, %v1846_v13 }
  0x63   : > { %1811 = vmatprep.mubr.msk.bf16.mxu0 %vm338_vm1, %v1844_v11  ;;  %1777 = vmatprep.mubr.msk.bf16.mxu1 %vm338_vm1, %v1849_v15 }
  0x6a   : > { %1812 = vmatmul.mubr.msk.bf16.gmra.mrb[44].mxu0 %vm338_vm1, %v1846_v13  ;;  %1778 = vmatmul.mubr.msk.bf16.gmra.mrb[44].mxu1 %vm338_vm1, %v1851_v17 }
  0x6b   : > { %1815 = vmatprep.mubr.msk.bf16.mxu0 %vm338_vm1, %v1849_v15  ;;  %1781 = vmatprep.mubr.msk.bf16.mxu1 %vm338_vm1, %v1853_v19 }
  0x72   : > { %1816 = vmatmul.mubr.msk.bf16.gmra.mrb[48].mxu0 %vm338_vm1, %v1851_v17  ;;  %1782 = vmatmul.mubr.msk.bf16.gmra.mrb[48].mxu1 %vm338_vm1, %v1855_v21 }
  0x73   : > { %1819 = vmatprep.mubr.msk.bf16.mxu0 %vm338_vm1, %v1853_v19 }
  0x7a   : > { %1820 = vmatmul.mubr.msk.bf16.gmra.mrb[52].mxu0 %vm338_vm1, %v1855_v21 }
  0xe5   : > { %v1713_v26 = vpop.f32.mrb[0].mxu0  ;;  %v1733_v28 = vpop.f32.mrb[0].mxu1 }
  0xe6   : > { %v2141_v27 = vpop.f32.mrb[1].mxu0  ;;  %v596_v30 = vrot.slane %v1733_v28, 1  ;;  %v2143_v31 = vpop.f32.mrb[1].mxu1  ;;  %v576_v32 = vrot.slane %v1713_v26, 1 }
  0xe7   : > { %v1714_v29 = vpop.f32.mrb[2].mxu0  ;;  %v594_v35 = vrot.slane %v2143_v31, 1  ;;  %v1734_v36 = vpop.f32.mrb[2].mxu1  ;;  %v574_v37 = vrot.slane %v2141_v27, 1 }
  0xe8   : > { %v577_v33 = vrot.slane %v1714_v29, 1  ;;  %v434_v34 = vpop.f32.mrb[3].mxu0  ;;  %v597_v39 = vrot.slane %v1734_v36, 1  ;;  %v514_v40 = vpop.f32.mrb[3].mxu1 }
  0xe9   : > { %v575_v38 = vrot.slane %v434_v34, 1  ;;  %v595_v41 = vrot.slane %v514_v40, 1 }
  0xea   : > { %v2150_v42 = vsel %vm612_vm2, %v576_v32, %v577_v33  ;;  %v2164_v45 = vsel %vm612_vm2, %v596_v30, %v597_v39 }
  0xeb   : > { %v2156_v43 = vsel %vm612_vm2, %v574_v37, %v575_v38  ;;  %v2160_v44 = vsel %vm612_vm2, %v575_v38, %v576_v32  ;;  %v2170_v46 = vsel %vm612_vm2, %v594_v35, %v595_v41  ;;  %v2174_v47 = vsel %vm612_vm2, %v595_v41, %v596_v30 }
  0xed   : > { %v1717_v48 = vpop.f32.mrb[4].mxu0  ;;  %v1737_v49 = vpop.f32.mrb[4].mxu1 }
  0xee   : > { %v447_v50 = vpop.f32.mrb[5].mxu0  ;;  %v600_v51 = vrot.slane %v1737_v49, 1  ;;  %v527_v53 = vpop.f32.mrb[5].mxu1  ;;  %v580_v55 = vrot.slane %v1717_v48, 1 }
  0xef   : > { %v578_v52 = vrot.slane %v447_v50, 1  ;;  %v1718_v54 = vpop.f32.mrb[6].mxu0  ;;  %v598_v56 = vrot.slane %v527_v53, 1  ;;  %v1738_v59 = vpop.f32.mrb[6].mxu1 }
  0xf0   : > { %v581_v57 = vrot.slane %v1718_v54, 1  ;;  %v450_v58 = vpop.f32.mrb[7].mxu0  ;;  %v601_v61 = vrot.slane %v1738_v59, 1  ;;  %v530_v62 = vpop.f32.mrb[7].mxu1 }
  0xf1   : > { %v579_v60 = vrot.slane %v450_v58, 1  ;;  %v2178_v63 = vsel %vm612_vm2, %v577_v33, %v578_v52  ;;  %v599_v0 = vrot.slane %v530_v62, 1  ;;  %v2186_v2 = vsel %vm612_vm2, %v597_v39, %v598_v56 }
  0xf2   : > { %v2182_v1 = vsel %vm612_vm2, %v580_v55, %v581_v57  ;;  %v2198_v5 = vsel %vm612_vm2, %v600_v51, %v601_v61 }
  0xf3   : > { %v2190_v3 = vsel %vm612_vm2, %v578_v52, %v579_v60  ;;  %v2194_v4 = vsel %vm612_vm2, %v579_v60, %v580_v55  ;;  %v2202_v6 = vsel %vm612_vm2, %v598_v56, %v599_v0  ;;  %v2206_v7 = vsel %vm612_vm2, %v599_v0, %v600_v51 }
  0xf5   : > { %v1721_v8 = vpop.f32.mrb[8].mxu0  ;;  %v1741_v9 = vpop.f32.mrb[8].mxu1 }
  0xf6   : > { %v463_v10 = vpop.f32.mrb[9].mxu0  ;;  %v604_v11 = vrot.slane %v1741_v9, 1  ;;  %v543_v13 = vpop.f32.mrb[9].mxu1  ;;  %v584_v15 = vrot.slane %v1721_v8, 1 }
  0xf7   : > { %v582_v12 = vrot.slane %v463_v10, 1  ;;  %v1722_v14 = vpop.f32.mrb[10].mxu0  ;;  %v602_v16 = vrot.slane %v543_v13, 1  ;;  %v1742_v19 = vpop.f32.mrb[10].mxu1 }
  0xf8   : > { %v585_v17 = vrot.slane %v1722_v14, 1  ;;  %v466_v18 = vpop.f32.mrb[11].mxu0  ;;  %v605_v21 = vrot.slane %v1742_v19, 1  ;;  %v546_v22 = vpop.f32.mrb[11].mxu1 }
  0xf9   : > { %v583_v20 = vrot.slane %v466_v18, 1  ;;  %v2210_v23 = vsel %vm612_vm2, %v581_v57, %v582_v12  ;;  %v603_v24 = vrot.slane %v546_v22, 1  ;;  %v2218_v28 = vsel %vm612_vm2, %v601_v61, %v602_v16 }
  0xfa   : > { %v2214_v26 = vsel %vm612_vm2, %v584_v15, %v585_v17  ;;  %v2230_v32 = vsel %vm612_vm2, %v604_v11, %v605_v21 }
  0xfb   : > { %v2222_v29 = vsel %vm612_vm2, %v582_v12, %v583_v20  ;;  %v2226_v30 = vsel %vm612_vm2, %v583_v20, %v584_v15  ;;  %v2234_v33 = vsel %vm612_vm2, %v602_v16, %v603_v24  ;;  %v2238_v34 = vsel %vm612_vm2, %v603_v24, %v604_v11 }
  0xfd   : > { %v1725_v36 = vpop.f32.mrb[12].mxu0  ;;  %v1745_v38 = vpop.f32.mrb[12].mxu1 }
  0xfe   : > { %v479_v39 = vpop.f32.mrb[13].mxu0  ;;  %v608_v40 = vrot.slane %v1745_v38, 1  ;;  %v559_v48 = vpop.f32.mrb[13].mxu1  ;;  %v588_v50 = vrot.slane %v1725_v36, 1 }
  0xff   : > { %v586_v41 = vrot.slane %v479_v39, 1  ;;  %v1726_v49 = vpop.f32.mrb[14].mxu0  ;;  %v606_v51 = vrot.slane %v559_v48, 1  ;;  %v1746_v53 = vpop.f32.mrb[14].mxu1 }
 0x100   : > { %v589_v52 = vrot.slane %v1726_v49, 1  ;;  %v482_v54 = vpop.f32.mrb[15].mxu0  ;;  %v609_v55 = vrot.slane %v1746_v53, 1  ;;  %v562_v57 = vpop.f32.mrb[15].mxu1 }
 0x101   : > { %v587_v56 = vrot.slane %v482_v54, 1  ;;  %v2242_v58 = vsel %vm612_vm2, %v585_v17, %v586_v41  ;;  %v607_v59 = vrot.slane %v562_v57, 1  ;;  %v2250_v61 = vsel %vm612_vm2, %v605_v21, %v606_v51 }
 0x102   : > { %v2246_v60 = vsel %vm612_vm2, %v588_v50, %v589_v52  ;;  %v2262_v8 = vsel %vm612_vm2, %v608_v40, %v609_v55  ;;  %v2268_v9 = vsel %vm612_vm2, %v609_v55, %v574_v37 }
 0x103   : > { %v2254_v62 = vsel %vm612_vm2, %v586_v41, %v587_v56  ;;  %v2258_v0 = vsel %vm612_vm2, %v587_v56, %v588_v50  ;;  %v2272_v10 = vsel %vm612_vm2, %v606_v51, %v607_v59  ;;  %v2276_v11 = vsel %vm612_vm2, %v607_v59, %v608_v40 }
 0x105   : > { %v1729_v12 = vpop.f32.mrb[16].mxu0  ;;  %v1751_v13 = vpop.f32.mrb[16].mxu1 }
 0x106   : > { %v495_v14 = vpop.f32.mrb[17].mxu0  ;;  %v700_v15 = vadd.f32 %v1751_v13, %v2150_v42  ;;  %v691_v17 = vpop.f32.mrb[17].mxu1  ;;  %v592_v18 = vrot.slane %v1729_v12, 1  ;;  %v2318_v12 = vld [vmem:[%s2743_s2] ss:$0 sm:$0xff] }
 0x107   : > { %v590_v16 = vrot.slane %v495_v14, 1  ;;  %v1730_v27 = vpop.f32.mrb[18].mxu0  ;;  %v692_v37 = vadd.f32 %v691_v17, %v2156_v43  ;;  %v1752_v20 = vpop.f32.mrb[18].mxu1 }
 0x108   : > { %v593_v19 = vrot.slane %v1730_v27, 1  ;;  %v498_v21 = vpop.f32.mrb[19].mxu0  ;;  %v703_v22 = vadd.f32 %v1752_v20, %v2178_v63  ;;  %v694_v36 = vpop.f32.mrb[19].mxu1 }
 0x109   : > { %v591_v24 = vrot.slane %v498_v21, 1  ;;  %v2283_v38 = vsel %vm612_vm2, %v589_v52, %v590_v16  ;;  %v695_v39 = vadd.f32 %v694_v36, %v2160_v44 }
 0x10a   : > { %v2288_v42 = vsel %vm612_vm2, %v592_v18, %v593_v19  ;;  %v2294_v43 = vsel %vm612_vm2, %v593_v19, %v594_v35 }
 0x10b   : > { %v2298_v63 = vsel %vm612_vm2, %v590_v16, %v591_v24  ;;  %v2302_v40 = vsel %vm612_vm2, %v591_v24, %v592_v18  ;;  %v2330_v16 = vld [vmem:[%s2744_s3] ss:$0 sm:$0xff] }
 0x10d   : > { %v1789_v41 = vpop.f32.mrb[20].mxu0  ;;  %v1755_v44 = vpop.f32.mrb[20].mxu1 }
 0x10e   : > { %v2304_v48 = vpop.f32.mrb[21].mxu0  ;;  %v716_v49 = vadd.f32 %v1755_v44, %v2182_v1  ;;  %v707_v50 = vpop.f32.mrb[21].mxu1  ;;  %v1024_v35 = vrot.slane %v1789_v41, 2 }
 0x10f   : > { %v1790_v31 = vpop.f32.mrb[22].mxu0  ;;  %v708_v51 = vadd.f32 %v707_v50, %v2190_v3  ;;  %v1756_v52 = vpop.f32.mrb[22].mxu1  ;;  %v1022_v55 = vrot.slane %v2304_v48, 2 }
 0x110   : > { %v1025_v53 = vrot.slane %v1790_v31, 2  ;;  %v882_v54 = vpop.f32.mrb[23].mxu0  ;;  %v2311_v56 = vadd.f32 %v1756_v52, %v2210_v23  ;;  %v710_v57 = vpop.f32.mrb[23].mxu1 }
 0x111   : > { %v1023_v59 = vrot.slane %v882_v54, 2  ;;  %v711_v3 = vadd.f32 %v710_v57, %v2194_v4 }
 0x112   : > { %v1091_v1 = vsel %vm1058_vm3, %v1024_v35, %v1025_v53 }
 0x113   : > { %v1097_v13 = vadd.f32 %v1091_v1, %v700_v15  ;;  %v1092_v14 = vsel %vm1058_vm3, %v1023_v59, %v1024_v35  ;;  %v1093_v23 = vsel %vm1058_vm3, %v1022_v55, %v1023_v59 }
 0x114   : > { %v1095_v17 = vadd.f32 %v1093_v23, %v692_v37  ;;  %v1096_v27 = vadd.f32 %v1092_v14, %v695_v39 }
 0x115   : > { %v1140_v18 = vmul.f32 %v2318_v12, %v1097_v13  ;;  %v1793_v19 = vpop.f32.mrb[24].mxu0  ;;  %v1759_v20 = vpop.f32.mrb[24].mxu1 }
 0x116   : > { %v1138_v4 = vmul.f32 %v2318_v12, %v1095_v17  ;;  %v1139_v15 = vmul.f32 %v2318_v12, %v1096_v27  ;;  %v895_v21 = vpop.f32.mrb[25].mxu0  ;;  %v732_v36 = vadd.f32 %v1759_v20, %v2214_v26  ;;  %v1028_v41 = vrot.slane %v1793_v19, 2  ;;  %v723_v44 = vpop.f32.mrb[25].mxu1 }
 0x117   : > { %v1183_v24 = vadd.f32 %v2330_v16, %v1140_v18  ;;  %v1026_v50 = vrot.slane %v895_v21, 2  ;;  %v1794_v31 = vpop.f32.mrb[26].mxu0  ;;  %v2340_v35 = vadd.f32 %v723_v44, %v2222_v29  ;;  %v1760_v52 = vpop.f32.mrb[26].mxu1 }
 0x118   : > { %v1181_v37 = vadd.f32 %v2330_v16, %v1138_v4  ;;  %v1182_v39 = vadd.f32 %v2330_v16, %v1139_v15  ;;  %v1029_v54 = vrot.slane %v1794_v31, 2  ;;  %v898_v57 = vpop.f32.mrb[27].mxu0  ;;  %v2345_v26 = vadd.f32 %v1760_v52, %v2242_v58  ;;  %v726_v13 = vpop.f32.mrb[27].mxu1 }
 0x119   : > { %v1616_v59 = vmul.f32 -1.442695, %v1183_v24  ;;  %v1090_v1 = vsel %vm1058_vm3, %v1025_v53, %v1026_v50  ;;  %v1027_v14 = vrot.slane %v898_v57, 2  ;;  %v727_v19 = vadd.f32 %v726_v13, %v2226_v30 }
 0x11a   : > { %v1614_v23 = vmul.f32 -1.442695, %v1181_v37  ;;  %v1615_v17 = vmul.f32 -1.442695, %v1182_v39  ;;  %v1098_v27 = vadd.f32 %v1090_v1, %v703_v22  ;;  %v1087_v18 = vsel %vm1058_vm3, %v1028_v41, %v1029_v54 }
 0x11b   : > { %1858 = vpow2.f32 %v1616_v59  ;;  %v1101_v29 = vadd.f32 %v1087_v18, %v716_v49  ;;  %v1088_v4 = vsel %vm1058_vm3, %v1027_v14, %v1028_v41  ;;  %v1089_v58 = vsel %vm1058_vm3, %v1026_v50, %v1027_v14 }
 0x11c   : > { %1860 = vpow2.f32 %v1614_v23  ;;  %v1141_v53 = vmul.f32 %v2318_v12, %v1098_v27  ;;  %v1100_v15 = vadd.f32 %v1088_v4, %v711_v3  ;;  %v1099_v20 = vadd.f32 %v1089_v58, %v708_v51 }
 0x11d   : > { %1862 = vpow2.f32 %v1615_v17  ;;  %v1144_v22 = vmul.f32 %v2318_v12, %v1101_v29  ;;  %v1797_v21 = vpop.f32.mrb[28].mxu0  ;;  %v1763_v30 = vpop.f32.mrb[28].mxu1 }
 0x11e   : > { %v1184_v24 = vadd.f32 %v2330_v16, %v1141_v53  ;;  %v1143_v49 = vmul.f32 %v2318_v12, %v1100_v15  ;;  %v1032_v44 = vrot.slane %v1797_v21, 2  ;;  %v911_v31 = vpop.f32.mrb[29].mxu0  ;;  %v1142_v37 = vmul.f32 %v2318_v12, %v1099_v20  ;;  %v739_v3 = vpop.f32.mrb[29].mxu1 }
 0x11f   : > { %v1187_v41 = vadd.f32 %v2330_v16, %v1144_v22  ;;  %v2361_v39 = vadd.f32 %v1763_v30, %v2246_v60  ;;  %v1030_v50 = vrot.slane %v911_v31, 2  ;;  %v2363_v52 = vpop.f32.mrb[30].mxu0  ;;  %v2367_v59 = vadd.f32 %v739_v3, %v2254_v62  ;;  %v1764_v1 = vpop.f32.mrb[30].mxu1 }
 0x120   : > { %v1617_v51 = vmul.f32 -1.442695, %v1184_v24  ;;  %v1186_v57 = vadd.f32 %v2330_v16, %v1143_v49  ;;  %v1033_v13 = vrot.slane %v2363_v52, 2  ;;  %v914_v14 = vpop.f32.mrb[31].mxu0  ;;  %v1185_v17 = vadd.f32 %v2330_v16, %v1142_v37  ;;  %v742_v18 = vpop.f32.mrb[31].mxu1 }
 0x121   : > { %v1620_v23 = vmul.f32 -1.442695, %v1187_v41  ;;  %v1086_v60 = vsel %vm1058_vm3, %v1029_v54, %v1030_v50  ;;  %v2374_v27 = vadd.f32 %v1764_v1, %v2283_v38  ;;  %v2380_v15 = vadd.f32 %v742_v18, %v2258_v0 }
 0x122   : > { %1864 = vpow2.f32 %v1617_v51  ;;  %v1619_v29 = vmul.f32 -1.442695, %v1186_v57  ;;  %v1102_v4 = vadd.f32 %v1086_v60, %v2311_v56  ;;  %v1083_v62 = vsel %vm1058_vm3, %v1032_v44, %v1033_v13 }
 0x123   : > { %1866 = vpow2.f32 %v1620_v23  ;;  %v1618_v53 = vmul.f32 -1.442695, %v1185_v17  ;;  %v1105_v58 = vadd.f32 %v1083_v62, %v732_v36  ;;  %v1031_v22 = vrot.slane %v914_v14, 2 }
 0x124   : > { %1868 = vpow2.f32 %v1619_v29  ;;  %v1145_v54 = vmul.f32 %v2318_v12, %v1102_v4 }
 0x125   : > { %v1859_v38 = vpop.eup %1858  ;;  %1870 = vpow2.f32 %v1618_v53  ;;  %v1148_v20 = vmul.f32 %v2318_v12, %v1105_v58  ;;  %v2384_v21 = vpop.f32.mrb[32].mxu0  ;;  %v1084_v36 = vsel %vm1058_vm3, %v1031_v22, %v1032_v44  ;;  %v1085_v0 = vsel %vm1058_vm3, %v1030_v50, %v1031_v22 }
 0x126   : > { %v1861_v56 = vpop.eup %1860  ;;  %v1327_v24 = vadd.f32 1.0, %v1859_v38  ;;  %v1188_v49 = vadd.f32 %v2330_v16, %v1145_v54  ;;  %v1767_v30 = vpop.f32.mrb[32].mxu1  ;;  %v1103_v52 = vadd.f32 %v1085_v0, %v2340_v35  ;;  %v1104_v51 = vadd.f32 %v1084_v36, %v727_v19 }
 0x127   : > { %v927_v31 = vpop.f32.mrb[33].mxu0  ;;  %v1863_v41 = vpop.eup %1862  ;;  %v1325_v37 = vadd.f32 1.0, %v1861_v56  ;;  %v1191_v3 = vadd.f32 %v2330_v16, %v1148_v20  ;;  %v2396_v44 = vadd.f32 %v1767_v30, %v2288_v42  ;;  %v1036_v29 = vrot.slane %v2384_v21, 2 }
 0x128   : > { %v755_v57 = vpop.f32.mrb[33].mxu1  ;;  %v2393_v1 = vpop.f32.mrb[34].mxu0  ;;  %1872 = vrcp.f32 %v1327_v24  ;;  %v1326_v14 = vadd.f32 1.0, %v1863_v41  ;;  %v1621_v23 = vmul.f32 -1.442695, %v1188_v49  ;;  %v1146_v18 = vmul.f32 %v2318_v12, %v1103_v52 }
 0x129   : > { %v1768_v50 = vpop.f32.mrb[34].mxu1  ;;  %v930_v17 = vpop.f32.mrb[35].mxu0  ;;  %1874 = vrcp.f32 %v1325_v37  ;;  %v1624_v60 = vmul.f32 -1.442695, %v1191_v3  ;;  %v1147_v35 = vmul.f32 %v2318_v12, %v1104_v51  ;;  %v2402_v4 = vadd.f32 %v755_v57, %v2298_v63 }
 0x12a   : > { %v758_v19 = vpop.f32.mrb[35].mxu1  ;;  %1876 = vrcp.f32 %v1326_v14  ;;  %v1034_v62 = vrot.slane %v927_v31, 2  ;;  %v1189_v42 = vadd.f32 %v2330_v16, %v1146_v18  ;;  %v2407_v58 = vadd.f32 %v1768_v50, %v2294_v43 }
 0x12b   : > { %1878 = vpow2.f32 %v1621_v23  ;;  %v1190_v53 = vadd.f32 %v2330_v16, %v1147_v35  ;;  %v1037_v38 = vrot.slane %v2393_v1, 2  ;;  %v2414_v63 = vadd.f32 %v758_v19, %v2302_v40 }
 0x12c   : > { %v1865_v54 = vpop.eup %1864  ;;  %1880 = vpow2.f32 %v1624_v60  ;;  %v1082_v22 = vsel %vm1058_vm3, %v1033_v13, %v1034_v62  ;;  %v1622_v56 = vmul.f32 -1.442695, %v1189_v42  ;;  %v1035_v31 = vrot.slane %v930_v17, 2 }
 0x12d   : > { %v1867_v20 = vpop.eup %1866  ;;  %v1328_v21 = vadd.f32 1.0, %v1865_v54  ;;  %v1623_v24 = vmul.f32 -1.442695, %v1190_v53  ;;  %v1106_v49 = vadd.f32 %v1082_v22, %v2345_v26  ;;  %v2417_v36 = vpop.f32.mrb[36].mxu0  ;;  %v1079_v30 = vsel %vm1058_vm3, %v1036_v29, %v1037_v38 }
 0x12e   : > { %v1869_v43 = vpop.eup %1868  ;;  %v1331_v0 = vadd.f32 1.0, %v1867_v20  ;;  %v1771_v13 = vpop.f32.mrb[36].mxu1  ;;  %v1040_v41 = vrot.slane %v2417_v36, 2  ;;  %v1109_v26 = vadd.f32 %v1079_v30, %v2361_v39  ;;  %v1080_v14 = vsel %vm1058_vm3, %v1035_v31, %v1036_v29 }
 0x12f   : > { %v2422_v37 = vpop.f32.mrb[37].mxu0  ;;  %v1871_v40 = vpop.eup %1870  ;;  %1882 = vrcp.f32 %v1328_v21  ;;  %v1330_v3 = vadd.f32 1.0, %v1869_v43  ;;  %v1149_v52 = vmul.f32 %v2318_v12, %v1106_v49  ;;  %v1081_v23 = vsel %vm1058_vm3, %v1034_v62, %v1035_v31 }
 0x130   : > { %v771_v51 = vpop.f32.mrb[37].mxu1  ;;  %v2426_v57 = vpop.f32.mrb[38].mxu0  ;;  %1884 = vrcp.f32 %v1331_v0  ;;  %v1329_v1 = vadd.f32 1.0, %v1871_v40  ;;  %v1152_v60 = vmul.f32 %v2318_v12, %v1109_v26  ;;  %v1107_v18 = vadd.f32 %v1081_v23, %v2367_v59 }
 0x131   : > { %v1772_v50 = vpop.f32.mrb[38].mxu1  ;;  %v946_v17 = vpop.f32.mrb[39].mxu0  ;;  %1886 = vrcp.f32 %v1330_v3  ;;  %v1192_v39 = vadd.f32 %v2330_v16, %v1149_v52  ;;  %v1108_v42 = vadd.f32 %v1080_v14, %v2380_v15  ;;  %v2442_v29 = vadd.f32 %v1771_v13, %v2164_v45 }
 0x132   : > { %v774_v35 = vpop.f32.mrb[39].mxu1  ;;  %v1873_v19 = vpop.eup %1872  ;;  %1888 = vrcp.f32 %v1329_v1  ;;  %v2445_v62 = vadd.f32 %v771_v51, %v2170_v46  ;;  %v1195_v22 = vadd.f32 %v2330_v16, %v1152_v60  ;;  %v1150_v59 = vmul.f32 %v2318_v12, %v1107_v18 }
 0x133   : > { %v1875_v53 = vpop.eup %1874  ;;  %1436 = vst.msk [vmem:[%s2431_s9 + $0x10] sm:$0xff] %vm1433_vm4, %v1873_v19  ;;  %1890 = vpow2.f32 %v1622_v56  ;;  %v1625_v54 = vmul.f32 -1.442695, %v1192_v39  ;;  %v1151_v15 = vmul.f32 %v2318_v12, %v1108_v42  ;;  %v1038_v45 = vrot.slane %v2422_v37, 2 }
 0x134   : > { %v1877_v20 = vpop.eup %1876  ;;  %1434 = vst.msk [vmem:[%s2431_s9] sm:$0xff] %vm1433_vm4, %v1875_v53  ;;  %1892 = vpow2.f32 %v1623_v24  ;;  %v2456_v46 = vadd.f32 %v1772_v50, %v2186_v2  ;;  %v1628_v56 = vmul.f32 -1.442695, %v1195_v22  ;;  %v1193_v49 = vadd.f32 %v2330_v16, %v1150_v59 }
 0x135   : > { %v1879_v21 = vpop.eup %1878  ;;  %1435 = vst.msk [vmem:[%s2431_s9 + $0x8] sm:$0xff] %vm1433_vm4, %v1877_v20  ;;  %1894 = vpow2.f32 %v1625_v54  ;;  %v1041_v43 = vrot.slane %v2426_v57, 2  ;;  %v2462_v0 = vpop.f32.mrb[40].mxu0  ;;  %v1194_v31 = vadd.f32 %v2330_v16, %v1151_v15  ;;  %v1078_v13 = vsel %vm1058_vm3, %v1037_v38, %v1038_v45 }
 0x136   : > { %v1881_v30 = vpop.eup %1880  ;;  %v1332_v24 = vadd.f32 1.0, %v1879_v21  ;;  %v2468_v2 = vadd.f32 %v774_v35, %v2174_v47  ;;  %v1775_v37 = vpop.f32.mrb[40].mxu1  ;;  %1896 = vpow2.f32 %v1628_v56  ;;  %v1626_v52 = vmul.f32 -1.442695, %v1193_v49 }
 0x137   : > { %v2470_v40 = vpop.f32.mrb[41].mxu0  ;;  %v1335_v3 = vadd.f32 1.0, %v1881_v30  ;;  %v1110_v26 = vadd.f32 %v1078_v13, %v2374_v27  ;;  %v787_v51 = vpop.f32.mrb[41].mxu1  ;;  %v1627_v1 = vmul.f32 -1.442695, %v1194_v31  ;;  %v1075_v47 = vsel %vm1058_vm3, %v1040_v41, %v1041_v43 }
 0x138   : > { %v2473_v57 = vpop.f32.mrb[42].mxu0  ;;  %1898 = vrcp.f32 %v1332_v24  ;;  %v1039_v38 = vrot.slane %v946_v17, 2  ;;  %v1776_v14 = vpop.f32.mrb[42].mxu1  ;;  %v1113_v39 = vadd.f32 %v1075_v47, %v2396_v44  ;;  %v2484_v60 = vadd.f32 %v1775_v37, %v2198_v5 }
 0x139   : > { %v2479_v23 = vpop.f32.mrb[43].mxu0  ;;  %v1883_v50 = vpop.eup %1882  ;;  %1900 = vrcp.f32 %v1335_v3  ;;  %v1153_v27 = vmul.f32 %v2318_v12, %v1110_v26  ;;  %v1044_v44 = vrot.slane %v2462_v0, 2  ;;  %v2504_v22 = vadd.f32 %v787_v51, %v2202_v6 }
 0x13a   : > { %v790_v18 = vpop.f32.mrb[43].mxu1  ;;  %v1885_v35 = vpop.eup %1884  ;;  %1437 = vst.msk [vmem:[%s2431_s9 + $0x18] sm:$0xff] %vm1433_vm4, %v1883_v50  ;;  %1902 = vpow2.f32 %v1626_v52  ;;  %v1076_v17 = vsel %vm1058_vm3, %v1039_v38, %v1040_v41  ;;  %v1077_v19 = vsel %vm1058_vm3, %v1038_v45, %v1039_v38  ;;  %v1156_v53 = vmul.f32 %v2318_v12, %v1113_v39 }
 0x13b   : > { %v1887_v42 = vpop.eup %1886  ;;  %1440 = vst.msk [vmem:[%s2431_s9 + $0x30] sm:$0xff] %vm1433_vm4, %v1885_v35  ;;  %1904 = vpow2.f32 %v1627_v1  ;;  %v1196_v5 = vadd.f32 %v2330_v16, %v1153_v27  ;;  %v1111_v54 = vadd.f32 %v1077_v19, %v2402_v4  ;;  %v1112_v41 = vadd.f32 %v1076_v17, %v2414_v63 }
 0x13c   : > { %v1889_v36 = vpop.eup %1888  ;;  %1439 = vst.msk [vmem:[%s2431_s9 + $0x28] sm:$0xff] %vm1433_vm4, %v1887_v42  ;;  %v1042_v59 = vrot.slane %v2470_v40, 2  ;;  %v2508_v20 = vadd.f32 %v1776_v14, %v2218_v28  ;;  %v1199_v21 = vadd.f32 %v2330_v16, %v1156_v53  ;;  %v1045_v56 = vrot.slane %v2473_v57, 2 }
 0x13d   : > { %v1891_v15 = vpop.eup %1890  ;;  %1438 = vst.msk [vmem:[%s2431_s9 + $0x20] sm:$0xff] %vm1433_vm4, %v1889_v36  ;;  %v1629_v45 = vmul.f32 -1.442695, %v1196_v5  ;;  %v1154_v4 = vmul.f32 %v2318_v12, %v1111_v54  ;;  %v2515_v49 = vpop.f32.mrb[44].mxu0  ;;  %v1155_v0 = vmul.f32 %v2318_v12, %v1112_v41  ;;  %v2521_v30 = vadd.f32 %v790_v18, %v2206_v7 }
 0x13e   : > { %v1893_v63 = vpop.eup %1892  ;;  %v1333_v6 = vadd.f32 1.0, %v1891_v15  ;;  %v1074_v28 = vsel %vm1058_vm3, %v1041_v43, %v1042_v59  ;;  %v1779_v24 = vpop.f32.mrb[44].mxu1  ;;  %v1632_v40 = vmul.f32 -1.442695, %v1199_v21  ;;  %v1071_v50 = vsel %vm1058_vm3, %v1044_v44, %v1045_v56 }
 0x13f   : > { %v2523_v31 = vpop.f32.mrb[45].mxu0  ;;  %v1895_v13 = vpop.eup %1894  ;;  %v1334_v37 = vadd.f32 1.0, %v1893_v63  ;;  %1906 = vpow2.f32 %v1629_v45  ;;  %v1197_v3 = vadd.f32 %v2330_v16, %v1154_v4  ;;  %v1198_v1 = vadd.f32 %v2330_v16, %v1155_v0 }
 0x140   : > { %v803_v52 = vpop.f32.mrb[45].mxu1  ;;  %v2526_v26 = vpop.f32.mrb[46].mxu0  ;;  %1908 = vrcp.f32 %v1333_v6  ;;  %v1336_v51 = vadd.f32 1.0, %v1895_v13  ;;  %v1114_v7 = vadd.f32 %v1074_v28, %v2407_v58  ;;  %v1043_v27 = vrot.slane %v2479_v23, 2 }
 0x141   : > { %v1780_v43 = vpop.f32.mrb[46].mxu1  ;;  %v2530_v47 = vpop.f32.mrb[47].mxu0  ;;  %1910 = vrcp.f32 %v1334_v37  ;;  %v1630_v14 = vmul.f32 -1.442695, %v1197_v3  ;;  %v1631_v17 = vmul.f32 -1.442695, %v1198_v1  ;;  %v1117_v42 = vadd.f32 %v1071_v50, %v2442_v29 }
 0x142   : > { %v1897_v38 = vpop.eup %1896  ;;  %v806_v39 = vpop.f32.mrb[47].mxu1  ;;  %1912 = vrcp.f32 %v1336_v51  ;;  %v1157_v58 = vmul.f32 %v2318_v12, %v1114_v7  ;;  %v1072_v5 = vsel %vm1058_vm3, %v1043_v27, %v1044_v44  ;;  %v1073_v53 = vsel %vm1058_vm3, %v1042_v59, %v1043_v27 }
 0x143   : > { %v1899_v18 = vpop.eup %1898  ;;  %v1339_v35 = vadd.f32 1.0, %v1897_v38  ;;  %1914 = vpow2.f32 %v1632_v40  ;;  %v1115_v36 = vadd.f32 %v1073_v53, %v2445_v62  ;;  %v1116_v41 = vadd.f32 %v1072_v5, %v2468_v2 }
 0x144   : > { %v1901_v19 = vpop.eup %1900  ;;  %1441 = vst.msk [vmem:[%s2431_s9 + $0x38] sm:$0xff] %vm1433_vm4, %v1899_v18  ;;  %v1200_v54 = vadd.f32 %v2330_v16, %v1157_v58  ;;  %v1160_v29 = vmul.f32 %v2318_v12, %v1117_v42  ;;  %v2552_v44 = vadd.f32 %v1779_v24, %v2230_v32  ;;  %v1048_v28 = vrot.slane %v2515_v49, 2 }
 0x145   : > { %v1903_v23 = vpop.eup %1902  ;;  %1444 = vst.msk [vmem:[%s2431_s9 + $0x50] sm:$0xff] %vm1433_vm4, %v1901_v19  ;;  %1916 = vrcp.f32 %v1339_v35  ;;  %v2554_v21 = vpop.f32.mrb[48].mxu0  ;;  %v1158_v63 = vmul.f32 %v2318_v12, %v1115_v36  ;;  %v1159_v2 = vmul.f32 %v2318_v12, %v1116_v41  ;;  %v2566_v37 = vadd.f32 %v803_v52, %v2234_v33 }
 0x146   : > { %v1905_v15 = vpop.eup %1904  ;;  %v1337_v45 = vadd.f32 1.0, %v1903_v23  ;;  %1918 = vpow2.f32 %v1630_v14  ;;  %v1633_v4 = vmul.f32 -1.442695, %v1200_v54  ;;  %v1783_v6 = vpop.f32.mrb[48].mxu1  ;;  %v1203_v62 = vadd.f32 %v2330_v16, %v1160_v29 }
 0x147   : > { %v1338_v59 = vadd.f32 1.0, %v1905_v15  ;;  %1920 = vpow2.f32 %v1631_v17  ;;  %v2557_v0 = vpop.f32.mrb[49].mxu0  ;;  %v819_v13 = vpop.f32.mrb[49].mxu1  ;;  %v1201_v24 = vadd.f32 %v2330_v16, %v1158_v63  ;;  %v1046_v40 = vrot.slane %v2523_v31, 2 }
 0x148   : > { %1922 = vrcp.f32 %v1337_v45  ;;  %v2562_v32 = vpop.f32.mrb[50].mxu0  ;;  %v1784_v3 = vpop.f32.mrb[50].mxu1  ;;  %v1636_v7 = vmul.f32 -1.442695, %v1203_v62  ;;  %v1202_v49 = vadd.f32 %v2330_v16, %v1159_v2  ;;  %v2573_v38 = vadd.f32 %v1780_v43, %v2250_v61 }
 0x149   : > { %1924 = vrcp.f32 %v1338_v59  ;;  %v2569_v51 = vpop.f32.mrb[51].mxu0  ;;  %v1907_v1 = vpop.eup %1906  ;;  %v1634_v52 = vmul.f32 -1.442695, %v1201_v24  ;;  %v1070_v31 = vsel %vm1058_vm3, %v1045_v56, %v1046_v40  ;;  %v1049_v27 = vrot.slane %v2526_v26, 2 }
 0x14a   : > { %1926 = vpow2.f32 %v1633_v4  ;;  %v2575_v14 = vpop.f32.mrb[51].mxu1  ;;  %v1909_v50 = vpop.eup %1908  ;;  %v1340_v33 = vadd.f32 1.0, %v1907_v1  ;;  %v1635_v35 = vmul.f32 -1.442695, %v1202_v49  ;;  %v1118_v61 = vadd.f32 %v1070_v31, %v2456_v46 }
 0x14b   : > { %v1911_v18 = vpop.eup %1910  ;;  %1442 = vst.msk [vmem:[%s2431_s9 + $0x40] sm:$0xff] %vm1433_vm4, %v1909_v50  ;;  %1928 = vpow2.f32 %v1636_v7  ;;  %v2586_v43 = vadd.f32 %v806_v39, %v2238_v34  ;;  %v1067_v57 = vsel %vm1058_vm3, %v1048_v28, %v1049_v27  ;;  %v1047_v56 = vrot.slane %v2530_v47, 2 }
 0x14c   : > { %v1913_v17 = vpop.eup %1912  ;;  %1443 = vst.msk [vmem:[%s2431_s9 + $0x48] sm:$0xff] %vm1433_vm4, %v1911_v18  ;;  %1930 = vrcp.f32 %v1340_v33  ;;  %v2594_v26 = vadd.f32 %v1783_v6, %v2262_v8  ;;  %v1161_v34 = vmul.f32 %v2318_v12, %v1118_v61  ;;  %v1121_v46 = vadd.f32 %v1067_v57, %v2484_v60 }
 0x14d   : > { %v1915_v58 = vpop.eup %1914  ;;  %1445 = vst.msk [vmem:[%s2431_s9 + $0x58] sm:$0xff] %vm1433_vm4, %v1913_v17  ;;  %1932 = vpow2.f32 %v1634_v52  ;;  %v1052_v39 = vrot.slane %v2554_v21, 2  ;;  %v2601_v19 = vpop.f32.mrb[52].mxu0  ;;  %v1068_v47 = vsel %vm1058_vm3, %v1047_v56, %v1048_v28  ;;  %v1069_v8 = vsel %vm1058_vm3, %v1046_v40, %v1047_v56 }
 0x14e   : > { %v1343_v5 = vadd.f32 1.0, %v1915_v58  ;;  %1934 = vpow2.f32 %v1635_v35  ;;  %v2607_v53 = vpop.f32.mrb[53].mxu0  ;;  %v1204_v60 = vadd.f32 %v2330_v16, %v1161_v34  ;;  %v1164_v54 = vmul.f32 %v2318_v12, %v1121_v46 }
 0x14f   : > { %v1917_v42 = vpop.eup %1916  ;;  %v1119_v36 = vadd.f32 %v1069_v8, %v2504_v22  ;;  %v1120_v41 = vadd.f32 %v1068_v47, %v2521_v30  ;;  %v2615_v15 = vpop.f32.mrb[54].mxu0  ;;  %v2618_v59 = vadd.f32 %v819_v13, %v2272_v10  ;;  %v1050_v4 = vrot.slane %v2557_v0, 2 }
 0x150   : > { %v1919_v23 = vpop.eup %1918  ;;  %1448 = vst.msk [vmem:[%s2431_s9 + $0x70] sm:$0xff] %vm1433_vm4, %v1917_v42  ;;  %1936 = vrcp.f32 %v1343_v5  ;;  %v2621_v63 = vpop.f32.mrb[55].mxu0  ;;  %v1637_v2 = vmul.f32 -1.442695, %v1204_v60  ;;  %v1207_v22 = vadd.f32 %v2330_v16, %v1164_v54  ;;  %v2631_v0 = vadd.f32 %v1784_v3, %v2268_v9 }
 0x151   : > { %v1921_v45 = vpop.eup %1920  ;;  %v1341_v29 = vadd.f32 1.0, %v1919_v23  ;;  %v1162_v30 = vmul.f32 %v2318_v12, %v1119_v36  ;;  %v1163_v24 = vmul.f32 %v2318_v12, %v1120_v41  ;;  %v1066_v10 = vsel %vm1058_vm3, %v1049_v27, %v1050_v4 }
 0x152   : > { %v1923_v6 = vpop.eup %1922  ;;  %v1342_v62 = vadd.f32 1.0, %v1921_v45  ;;  %v1640_v40 = vmul.f32 -1.442695, %v1207_v22  ;;  %v1122_v7 = vadd.f32 %v1066_v10, %v2508_v20  ;;  %v1053_v33 = vrot.slane %v2562_v32, 2 }
 0x153   : > { %v1925_v28 = vpop.eup %1924  ;;  %1446 = vst.msk [vmem:[%s2431_s9 + $0x60] sm:$0xff] %vm1433_vm4, %v1923_v6  ;;  %1938 = vrcp.f32 %v1341_v29  ;;  %v1205_v1 = vadd.f32 %v2330_v16, %v1162_v30  ;;  %v1206_v50 = vadd.f32 %v2330_v16, %v1163_v24  ;;  %v2642_v31 = vadd.f32 %v2575_v14, %v2276_v11 }
 0x154   : > { %v1927_v13 = vpop.eup %1926  ;;  %1447 = vst.msk [vmem:[%s2431_s9 + $0x68] sm:$0xff] %vm1433_vm4, %v1925_v28  ;;  %1940 = vrcp.f32 %v1342_v62  ;;  %v1165_v3 = vmul.f32 %v2318_v12, %v1122_v7  ;;  %v1063_v35 = vsel %vm1058_vm3, %v1052_v39, %v1053_v33  ;;  %v1051_v11 = vrot.slane %v2569_v51, 2 }
 0x155   : > { %v1344_v49 = vadd.f32 1.0, %v1927_v13  ;;  %1942 = vpow2.f32 %v1637_v2  ;;  %v1929_v52 = vpop.eup %1928  ;;  %v1638_v9 = vmul.f32 -1.442695, %v1205_v1  ;;  %v1639_v20 = vmul.f32 -1.442695, %v1206_v50 }
 0x156   : > { %1944 = vpow2.f32 %v1640_v40  ;;  %v1931_v27 = vpop.eup %1930  ;;  %v1347_v18 = vadd.f32 1.0, %v1929_v52  ;;  %v1208_v32 = vadd.f32 %v2330_v16, %v1165_v3  ;;  %v1125_v17 = vadd.f32 %v1063_v35, %v2552_v44 }
 0x157   : > { %1946 = vrcp.f32 %v1344_v49  ;;  %v1933_v61 = vpop.eup %1932  ;;  %1449 = vst.msk [vmem:[%s2431_s9 + $0x78] sm:$0xff] %vm1433_vm4, %v1931_v27  ;;  %v1056_v56 = vrot.slane %v2601_v19, 2  ;;  %v1054_v58 = vrot.slane %v2607_v53, 2  ;;  %v1064_v44 = vsel %vm1058_vm3, %v1051_v11, %v1052_v39 }
 0x158   : > { %1948 = vpow2.f32 %v1638_v9  ;;  %v1935_v14 = vpop.eup %1934  ;;  %v1345_v57 = vadd.f32 1.0, %v1933_v61  ;;  %v1641_v46 = vmul.f32 -1.442695, %v1208_v32  ;;  %v1168_v42 = vmul.f32 %v2318_v12, %v1125_v17 }
 0x159   : > { %1950 = vrcp.f32 %v1347_v18  ;;  %v1346_v34 = vadd.f32 1.0, %v1935_v14  ;;  %v1065_v51 = vsel %vm1058_vm3, %v1050_v4, %v1051_v11  ;;  %v1062_v19 = vsel %vm1058_vm3, %v1053_v33, %v1054_v58 }
 0x15a   : > { %1952 = vpow2.f32 %v1639_v20  ;;  %v1937_v5 = vpop.eup %1936  ;;  %v1211_v47 = vadd.f32 %v2330_v16, %v1168_v42  ;;  %v1123_v8 = vadd.f32 %v1065_v51, %v2566_v37  ;;  %v1124_v53 = vadd.f32 %v1064_v44, %v2586_v43 }
 0x15b   : > { %1954 = vrcp.f32 %v1345_v57  ;;  %1452 = vst.msk [vmem:[%s2431_s9 + $0x90] sm:$0xff] %vm1433_vm4, %v1937_v5  ;;  %v1126_v39 = vadd.f32 %v1062_v19, %v2573_v38  ;;  %v1057_v23 = vrot.slane %v2615_v15, 2  ;;  %v1055_v60 = vrot.slane %v2621_v63, 2 }
 0x15c   : > { %1956 = vrcp.f32 %v1346_v34  ;;  %v1644_v36 = vmul.f32 -1.442695, %v1211_v47  ;;  %v1166_v41 = vmul.f32 %v2318_v12, %v1123_v8  ;;  %v1167_v45 = vmul.f32 %v2318_v12, %v1124_v53 }
 0x15d   : > { %v1939_v21 = vpop.eup %1938  ;;  %1958 = vpow2.f32 %v1641_v46  ;;  %v1169_v37 = vmul.f32 %v2318_v12, %v1126_v39  ;;  %v1059_v38 = vsel %vm1058_vm3, %v1056_v56, %v1057_v23  ;;  %v1094_v43 = vsel %vm1058_vm3, %v1057_v23, %v1022_v55 }
 0x15e   : > { %v1941_v54 = vpop.eup %1940  ;;  %1450 = vst.msk [vmem:[%s2431_s9 + $0x80] sm:$0xff] %vm1433_vm4, %v1939_v21  ;;  %v1060_v15 = vsel %vm1058_vm3, %v1055_v60, %v1056_v56  ;;  %1960 = vpow2.f32 %v1644_v36  ;;  %v1209_v6 = vadd.f32 %v2330_v16, %v1166_v41  ;;  %v1210_v62 = vadd.f32 %v2330_v16, %v1167_v45 }
 0x15f   : > { %v1943_v29 = vpop.eup %1942  ;;  %1451 = vst.msk [vmem:[%s2431_s9 + $0x88] sm:$0xff] %vm1433_vm4, %v1941_v54  ;;  %v1212_v30 = vadd.f32 %v2330_v16, %v1169_v37  ;;  %v1129_v48 = vadd.f32 %v1059_v38, %v2594_v26  ;;  %v1130_v28 = vadd.f32 %v1094_v43, %v2631_v0  ;;  %v1061_v13 = vsel %vm1058_vm3, %v1054_v58, %v1055_v60 }
 0x160   : > { %v1945_v4 = vpop.eup %1944  ;;  %v1348_v63 = vadd.f32 1.0, %v1943_v29  ;;  %v1642_v24 = vmul.f32 -1.442695, %v1209_v6  ;;  %v1643_v10 = vmul.f32 -1.442695, %v1210_v62  ;;  %v1127_v0 = vadd.f32 %v1061_v13, %v2618_v59 }
 0x161   : > { %v1947_v2 = vpop.eup %1946  ;;  %v1351_v22 = vadd.f32 1.0, %v1945_v4  ;;  %v1645_v7 = vmul.f32 -1.442695, %v1212_v30  ;;  %v1172_v49 = vmul.f32 %v2318_v12, %v1129_v48  ;;  %v1173_v26 = vmul.f32 %v2318_v12, %v1130_v28 }
 0x162   : > { %v1949_v55 = vpop.eup %1948  ;;  %1453 = vst.msk [vmem:[%s2431_s9 + $0x98] sm:$0xff] %vm1433_vm4, %v1947_v2  ;;  %1962 = vrcp.f32 %v1348_v63  ;;  %v1128_v33 = vadd.f32 %v1060_v15, %v2642_v31  ;;  %v1170_v18 = vmul.f32 %v2318_v12, %v1127_v0 }
 0x163   : > { %v1951_v40 = vpop.eup %1950  ;;  %1964 = vrcp.f32 %v1351_v22  ;;  %v1349_v1 = vadd.f32 1.0, %v1949_v55  ;;  %v1215_v9 = vadd.f32 %v2330_v16, %v1172_v49  ;;  %v1216_v27 = vadd.f32 %v2330_v16, %v1173_v26 }
 0x164   : > { %v1953_v50 = vpop.eup %1952  ;;  %1456 = vst.msk [vmem:[%s2431_s9 + $0xb0] sm:$0xff] %vm1433_vm4, %v1951_v40  ;;  %1966 = vpow2.f32 %v1642_v24  ;;  %v1171_v20 = vmul.f32 %v2318_v12, %v1128_v33  ;;  %v1213_v32 = vadd.f32 %v2330_v16, %v1170_v18 }
 0x165   : > { %v1955_v25 = vpop.eup %1954  ;;  %v1350_v52 = vadd.f32 1.0, %v1953_v50  ;;  %1968 = vrcp.f32 %v1349_v1  ;;  %v1648_v59 = vmul.f32 -1.442695, %v1215_v9  ;;  %v1649_v61 = vmul.f32 -1.442695, %v1216_v27 }
 0x166   : > { %v1957_v3 = vpop.eup %1956  ;;  %1454 = vst.msk [vmem:[%s2431_s9 + $0xa0] sm:$0xff] %vm1433_vm4, %v1955_v25  ;;  %1970 = vpow2.f32 %v1643_v10  ;;  %v1214_v17 = vadd.f32 %v2330_v16, %v1171_v20  ;;  %v1646_v14 = vmul.f32 -1.442695, %v1213_v32 }
 0x167   : > { %v1959_v35 = vpop.eup %1958  ;;  %1455 = vst.msk [vmem:[%s2431_s9 + $0xa8] sm:$0xff] %vm1433_vm4, %v1957_v3  ;;  %1972 = vrcp.f32 %v1350_v52 }
 0x168   : > { %v1352_v31 = vadd.f32 1.0, %v1959_v35  ;;  %1974 = vpow2.f32 %v1645_v7  ;;  %v1961_v11 = vpop.eup %1960  ;;  %v1647_v57 = vmul.f32 -1.442695, %v1214_v17 }
 0x169   : > { %1976 = vpow2.f32 %v1648_v59  ;;  %v1355_v12 = vadd.f32 1.0, %v1961_v11 }
 0x16a   : > { %1978 = vrcp.f32 %v1352_v31 }
 0x16b   : > { %1980 = vpow2.f32 %v1649_v61 }
 0x16c   : > { %v1963_v56 = vpop.eup %1962  ;;  %1982 = vpow2.f32 %v1646_v14 }
 0x16d   : > { %v1965_v58 = vpop.eup %1964  ;;  %1457 = vst.msk [vmem:[%s2431_s9 + $0xb8] sm:$0xff] %vm1433_vm4, %v1963_v56  ;;  %1984 = vrcp.f32 %v1355_v12 }
 0x16e   : > { %v1967_v34 = vpop.eup %1966  ;;  %1460 = vst.msk [vmem:[%s2431_s9 + $0xd0] sm:$0xff] %vm1433_vm4, %v1965_v58  ;;  %1986 = vpow2.f32 %v1647_v57 }
 0x16f   : > { %v1969_v16 = vpop.eup %1968  ;;  %v1353_v46 = vadd.f32 1.0, %v1967_v34 }
 0x170   : > { %v1971_v42 = vpop.eup %1970  ;;  %1458 = vst.msk [vmem:[%s2431_s9 + $0xc0] sm:$0xff] %vm1433_vm4, %v1969_v16 }
 0x171   : > { %v1973_v5 = vpop.eup %1972  ;;  %v1354_v44 = vadd.f32 1.0, %v1971_v42  ;;  %1988 = vrcp.f32 %v1353_v46 }
 0x172   : > { %v1975_v51 = vpop.eup %1974  ;;  %1459 = vst.msk [vmem:[%s2431_s9 + $0xc8] sm:$0xff] %vm1433_vm4, %v1973_v5 }
 0x173   : > { %v1977_v19 = vpop.eup %1976  ;;  %1990 = vrcp.f32 %v1354_v44  ;;  %v1356_v47 = vadd.f32 1.0, %v1975_v51 }
 0x174   : > { %v1979_v8 = vpop.eup %1978  ;;  %v1359_v53 = vadd.f32 1.0, %v1977_v19 }
 0x175   : > { %v1981_v21 = vpop.eup %1980  ;;  %1461 = vst.msk [vmem:[%s2431_s9 + $0xd8] sm:$0xff] %vm1433_vm4, %v1979_v8  ;;  %1992 = vrcp.f32 %v1356_v47 }
 0x176   : > { %v1983_v39 = vpop.eup %1982  ;;  %v1360_v23 = vadd.f32 1.0, %v1981_v21  ;;  %1994 = vrcp.f32 %v1359_v53 }
 0x177   : > { %v1985_v60 = vpop.eup %1984  ;;  %v1357_v54 = vadd.f32 1.0, %v1983_v39 }
 0x178   : > { %v1987_v36 = vpop.eup %1986  ;;  %1464 = vst.msk [vmem:[%s2431_s9 + $0xf0] sm:$0xff] %vm1433_vm4, %v1985_v60  ;;  %1996 = vrcp.f32 %v1360_v23 }
 0x179   : > { %v1358_v41 = vadd.f32 1.0, %v1987_v36  ;;  %1998 = vrcp.f32 %v1357_v54 }
 0x17b   : > { %v1989_v45 = vpop.eup %1988  ;;  %2000 = vrcp.f32 %v1358_v41 }
 0x17c   : > { %1462 = vst.msk [vmem:[%s2431_s9 + $0xe0] sm:$0xff] %vm1433_vm4, %v1989_v45 }
 0x17d   : > { %v1991_v29 = vpop.eup %1990 }
 0x17e   : > { %1463 = vst.msk [vmem:[%s2431_s9 + $0xe8] sm:$0xff] %vm1433_vm4, %v1991_v29 }
 0x17f   : > { %v1993_v37 = vpop.eup %1992 }
 0x180   : > { %v1995_v38 = vpop.eup %1994  ;;  %1465 = vst.msk [vmem:[%s2431_s9 + $0xf8] sm:$0xff] %vm1433_vm4, %v1993_v37 }
 0x181   : > { %1468 = vst.msk [vmem:[%s2431_s9 + $0x110] sm:$0xff] %vm1433_vm4, %v1995_v38 }
 0x182   : > { %v1997_v43 = vpop.eup %1996 }
 0x183   : > { %v1999_v15 = vpop.eup %1998  ;;  %1469 = vst.msk [vmem:[%s2431_s9 + $0x118] sm:$0xff] %vm1433_vm4, %v1997_v43 }
 0x184   : > { %1466 = vst.msk [vmem:[%s2431_s9 + $0x100] sm:$0xff] %vm1433_vm4, %v1999_v15 }
 0x185   : > { %v2001_v4 = vpop.eup %2000 }
 0x186   : > { %1467 = vst.msk [vmem:[%s2431_s9 + $0x108] sm:$0xff] %vm1433_vm4, %v2001_v4 }
 0x187 PF: > { %s14_s15 = sadd.s32 1, %s2008_s15  }
 0x188   : > { %p11_p4 = scmp.ge.s32.totalorder %s14_s15, 4  }
 0x18a   :  { %13 = sbr.rel (!%p11_p4) target bundleno = 1 (0x1), region = 68 }

</bundles_post_ra>
